<compile_context>
chip_gen: v5e
topology: v5e:2x2
jax: 0.10.0
libtpu: 0.0.40
codegen_flags: <defaults>
</compile_context>

<pallas_src>
import numpy as np
import jax
import jax.numpy as jnp
from jax.experimental import pallas as pl
from jax.experimental.pallas import tpu as pltpu

NUM_BINS = 64
TAIL_BOUND = 5.0
MIN_BIN_WIDTH = 1e-3
MIN_BIN_HEIGHT = 1e-3
MIN_DERIVATIVE = 1e-3
HIDDEN_CHANNEL = 32
DIM_MULT = 3 * NUM_BINS - 1  # 'quadratic': widths(64) + heights(64) + derivs(63)


def _round_up(a, b):
    return ((a + b - 1) // b) * b


# ---------------------------------------------------------------------------
# fused kernel: transform-net MLP + rational-quadratic spline (transposed)
# ---------------------------------------------------------------------------
def _fused_kernel(xt_ref, w1t_ref, b1t_ref, w2t_ref, b2t_ref, lexcl_ref,
                  out_ref, ldt_ref):
    NB = NUM_BINS
    TB = TAIL_BOUND

    xt = xt_ref[...]                        # (C, TR)  pixels on the lane axis
    c2 = ldt_ref.shape[0]
    c1 = xt.shape[0] - c2
    tr = xt.shape[1]
    h1t = xt[0:c1, :]                       # (C1, TR)

    # identity half of the coupling: passthrough (removes the host-side concat)
    out_ref[pl.ds(0, c1), :] = h1t

    # ---- transform net (1x1-conv MLP), transposed -------------------------
    # first layer has K = C1 (tiny) -> VPU broadcast-FMAs, keep the MXU free
    w1t = w1t_ref[...]                      # (H, C1)
    hidden = b1t_ref[...] + w1t[:, 0:1] * h1t[0:1, :]
    for c in range(1, c1):
        hidden = hidden + w1t[:, c:c + 1] * h1t[c:c + 1, :]
    hidden = jnp.maximum(hidden, 0.0)       # (H, TR)
    params = jnp.dot(w2t_ref[...], hidden,
                     preferred_element_type=jnp.float32) + b2t_ref[...]  # (OUTP, TR)

    # ---- rational-quadratic spline with linear tails, per coupled channel --
    lexcl = lexcl_ref[...]                  # (NB, NB): lexcl[j, k] = 1 if k < j
    biota = jax.lax.broadcasted_iota(jnp.int32, (NB, tr), 0).astype(jnp.float32)
    is_last_row = biota == float(NB - 1)
    d_base = c2 * 2 * NB

    def _softmax0(a):                       # softmax over bins (sublane axis)
        m = jnp.max(a, axis=0, keepdims=True)
        e = jnp.exp(a - m)
        s = jnp.sum(e, axis=0, keepdims=True)
        return e * pl.reciprocal(s, approx=True)

    def _gather0(a, sel):                   # per-pixel gather via masked reduce
        return jnp.sum(a * sel, axis=0, keepdims=True)      # (1, TR)

    def _softplus(a):                       # matches torch softplus (threshold 20)
        return jnp.where(a > 20.0, a, jnp.log1p(jnp.exp(jnp.minimum(a, 20.0))))

    for c in range(c2):
        x = xt[c1 + c:c1 + c + 1, :]                              # (1, TR)
        uw = params[c * 2 * NB:c * 2 * NB + NB, :]                # (NB, TR)
        uh = params[c * 2 * NB + NB:c * 2 * NB + 2 * NB, :]       # (NB, TR)
        ud = params[d_base + c * NB:d_base + (c + 1) * NB, :]     # (NB, TR), row NB-1 = pad

        w_n = MIN_BIN_WIDTH + (1.0 - MIN_BIN_WIDTH * NB) * _softmax0(uw)
        h_n = MIN_BIN_HEIGHT + (1.0 - MIN_BIN_HEIGHT * NB) * _softmax0(uh)

        # exclusive cumsum over bins on the MXU; upper knots = excl + w (VPU)
        cw_excl = jnp.dot(lexcl, w_n, preferred_element_type=jnp.float32)
        # searchsorted targets: upper knots, top one forced to TB + eps (nflows)
        search = -TB + 2.0 * TB * (cw_excl + w_n)
        search = jnp.where(is_last_row, TB + 1e-6, search)

        # ge[j] == 1  iff  x >= upper_knot_j  iff  j < idx  -> doubles as `below`
        ge = (x >= search).astype(jnp.float32)                    # (NB, TR)
        idx = jnp.clip(jnp.sum(ge, axis=0, keepdims=True), 0.0, float(NB - 1))
        onehot = (biota == idx).astype(jnp.float32)
        last_bin = idx == float(NB - 1)

        in_cw = -TB + 2.0 * TB * _gather0(cw_excl, onehot)        # lower width knot
        in_bw = jnp.where(last_bin, TB - in_cw,
                          2.0 * TB * _gather0(w_n, onehot))       # bin width
        in_ch = -TB + 2.0 * TB * _gather0(h_n, ge)                # lower height knot
        in_bh = jnp.where(last_bin, TB - in_ch,
                          2.0 * TB * _gather0(h_n, onehot))       # bin height

        # knot derivatives: endpoints forced to 1 (linear tails); softplus AFTER
        # the gather; d_lo gathers from an XLU-rolled ud instead of building an
        # onehot_m1 mask (row 0 of the rolled tensor is garbage but is always
        # overridden by the idx==0 select).
        d_lo = jnp.where(idx == 0.0, 1.0,
                         MIN_DERIVATIVE + _softplus(
                             _gather0(pltpu.roll(ud, shift=1, axis=0), onehot)))
        d_hi = jnp.where(last_bin, 1.0,
                         MIN_DERIVATIVE + _softplus(_gather0(ud, onehot)))

        inv_bw = 1.0 / in_bw                                      # one divide, reused
        in_delta = in_bh * inv_bw
        theta = (x - in_cw) * inv_bw
        theta2 = theta * theta
        tomt = theta * (1.0 - theta)
        numerator = in_bh * (in_delta * theta2 + d_lo * tomt)
        denominator = in_delta + (d_lo + d_hi - 2.0 * in_delta) * tomt
        y_sp = in_ch + numerator / denominator
        dnum = (in_delta * in_delta) * (d_hi * theta2 + 2.0 * in_delta * tomt
                                        + d_lo * (1.0 - theta) * (1.0 - theta))
        ld_sp = jnp.log(dnum) - 2.0 * jnp.log(denominator)

        inside = jnp.logical_and(x >= -TB, x <= TB)               # linear tails
        out_ref[pl.ds(c1 + c, 1), :] = jnp.where(inside, y_sp, x)
        ldt_ref[pl.ds(c, 1), :] = jnp.where(inside, ld_sp, 0.0)


# ---------------------------------------------------------------------------
# host-side weight packing for the fused kernel
# ---------------------------------------------------------------------------
def _pack_net_params(w1, b1, w2, b2, c2):
    """Canonical transform-net params -> kernel layout.

    Canonical output columns (per pixel): C2 blocks of DIM_MULT=191:
        [widths(64) | heights(64) | derivs(63)]
    Kernel rows of the transposed weight (OUTP = C2*192, 64-aligned slabs):
        [uw_0|uh_0] [uw_1|uh_1] ... | [ud_0|zero-pad] [ud_1|zero-pad] ...
    1/sqrt(hidden) is folded into the width/height rows (matches the module's
    division of unnormalized widths/heights only).
    """
    h = w1.shape[1]
    nb = NUM_BINS
    outp = c2 * 3 * nb
    perm = np.zeros(outp, dtype=np.int64)
    scl = np.zeros(outp, dtype=np.float32)
    inv = np.float32(1.0 / np.sqrt(h))
    for c in range(c2):
        src = c * DIM_MULT
        dst = c * 2 * nb
        perm[dst:dst + 2 * nb] = src + np.arange(2 * nb)          # widths|heights
        scl[dst:dst + 2 * nb] = inv
        ddst = c2 * 2 * nb + c * nb
        perm[ddst:ddst + nb - 1] = src + 2 * nb + np.arange(nb - 1)  # derivatives
        scl[ddst:ddst + nb - 1] = 1.0
        # row ddst + nb - 1 stays zero-padded (only gathered when overridden)
    perm = jnp.asarray(perm)
    scl = jnp.asarray(scl)
    w2t = (w2[:, perm] * scl[None, :]).T                          # (OUTP, H)
    b2t = (b2.reshape(-1)[perm] * scl).reshape(outp, 1)           # (OUTP, 1)
    w1t = w1.T                                                    # (H, C1)
    b1t = b1.reshape(h, 1)                                        # (H, 1)
    return w1t, b1t, w2t, b2t


# ---------------------------------------------------------------------------
# SplineCouplingLayer.forward
# ---------------------------------------------------------------------------
def spline_coupling_forward(x, w1, b1, w2, b2, row_tile=2048):
    B, C, N, M = x.shape
    c1 = (C + 1) // 2                       # torch.chunk(x, 2, dim=1) sizes
    c2 = C - c1
    R = N * M

    # free reshape: channels already on sublanes, per-batch pixels on lanes
    x3 = x.reshape(B, C, R)

    # pixel tile: lane-dense, big enough to amortize per-grid-step overhead;
    # keep >= 2 total grid steps when possible so both v7x TensorCores get work.
    tile = min(row_tile, _round_up(R, 128))
    if B * (_round_up(R, tile) // tile) < 2 and R > 128:
        tile = _round_up((R + 1) // 2, 128)
    Rp = _round_up(R, tile)
    if Rp != R:
        x3 = jnp.pad(x3, ((0, 0), (0, 0), (0, Rp - R)))

    w1t, b1t, w2t, b2t = _pack_net_params(w1, b1, w2, b2, c2)
    H = w1t.shape[0]
    OUTP = w2t.shape[0]

    # constant strictly-lower-triangular matrix for the exclusive cumsum
    lexcl = np.tril(np.ones((NUM_BINS, NUM_BINS), np.float32), k=-1)

    y_full, ldt = pl.pallas_call(
        _fused_kernel,
        out_shape=(jax.ShapeDtypeStruct((B, C, Rp), jnp.float32),
                   jax.ShapeDtypeStruct((B, c2, Rp), jnp.float32)),
        grid_spec=pltpu.PrefetchScalarGridSpec(
            num_scalar_prefetch=0,
            grid=(B, Rp // tile),
            in_specs=[
                pl.BlockSpec((None, C, tile), lambda b, i: (b, 0, i)),
                pl.BlockSpec((H, c1), lambda b, i: (0, 0)),
                pl.BlockSpec((H, 1), lambda b, i: (0, 0)),
                pl.BlockSpec((OUTP, H), lambda b, i: (0, 0)),
                pl.BlockSpec((OUTP, 1), lambda b, i: (0, 0)),
                pl.BlockSpec((NUM_BINS, NUM_BINS), lambda b, i: (0, 0)),
            ],
            out_specs=[
                pl.BlockSpec((None, C, tile), lambda b, i: (b, 0, i)),
                pl.BlockSpec((None, c2, tile), lambda b, i: (b, 0, i)),
            ],
        ),
        compiler_params=pltpu.CompilerParams(
            dimension_semantics=("parallel", "parallel"),
            # ~12 MB live VMEM at tile=2048; safe even on v7x (64 MiB physical)
            vmem_limit_bytes=32 * 1024 * 1024,
        ),
    )(x3, w1t, b1t, w2t, b2t, lexcl)

    x_out = y_full[:, :, :R].reshape(B, C, N, M)                  # channel_cat done in-kernel
    log_det = jnp.sum(ldt[:, :, :R], axis=(1, 2))
    return x_out, log_det


if __name__ == "__main__":
    key = jax.random.PRNGKey(0)
    B, C, N, M = 2, 4, 16, 16
    c1 = (C + 1) // 2
    c2 = C - c1
    OUT = c2 * DIM_MULT

    kx, k1, k2, k3, k4 = jax.random.split(key, 5)
    x = jax.random.normal(kx, (B, C, N, M), jnp.float32) * 2.0
    # TODO(synk): transform_net is user-injected in the PyTorch module; here it is
    # synthesized as a 2-layer 1x1-conv MLP (u is unused), same as before.
    w1 = jax.random.normal(k1, (c1, HIDDEN_CHANNEL), jnp.float32) / np.sqrt(c1)
    b1 = jax.random.normal(k2, (1, HIDDEN_CHANNEL), jnp.float32) * 0.1
    w2 = jax.random.normal(k3, (HIDDEN_CHANNEL, OUT), jnp.float32) / np.sqrt(HIDDEN_CHANNEL)
    b2 = jax.random.normal(k4, (1, OUT), jnp.float32) * 0.1

    x_out, log_det = jax.jit(spline_coupling_forward)(x, w1, b1, w2, b2)
    jax.block_until_ready((x_out, log_det))

    assert x_out.shape == (B, C, N, M), x_out.shape
    assert log_det.shape == (B,), log_det.shape
    assert bool(jnp.all(jnp.isfinite(x_out))) and bool(jnp.all(jnp.isfinite(log_det)))
    print("KERNEL_OK")
</pallas_src>

<mosaic_0001>
module attributes {stable_mosaic.version = 11 : i64} {
  func.func @_fused_kernel(%arg0: i32, %arg1: i32, %arg2: memref<1x4x256xf32, #tpu.memory_space<vmem>>, %arg3: memref<32x2xf32, #tpu.memory_space<vmem>>, %arg4: memref<32x1xf32, #tpu.memory_space<vmem>>, %arg5: memref<384x32xf32, #tpu.memory_space<vmem>>, %arg6: memref<384x1xf32, #tpu.memory_space<vmem>>, %arg7: memref<64x64xf32, #tpu.memory_space<vmem>>, %arg8: memref<1x4x256xf32, #tpu.memory_space<vmem>>, %arg9: memref<1x2x256xf32, #tpu.memory_space<vmem>>) attributes {dimension_semantics = [#tpu.dimension_semantics<parallel>, #tpu.dimension_semantics<parallel>], iteration_bounds = array<i64: 2, 1>, scalar_prefetch = 0 : i64, scratch_operands = 0 : i64, tpu.core_type = #tpu.core_type<tc>, window_params = [{transform_indices = @transform_0, window_bounds = array<i64: 1, 4, 256>}, {pipeline_mode = #tpu.pipeline_mode<synchronous>, transform_indices = @transform_1, window_bounds = array<i64: 32, 2>}, {pipeline_mode = #tpu.pipeline_mode<synchronous>, transform_indices = @transform_2, window_bounds = array<i64: 32, 1>}, {pipeline_mode = #tpu.pipeline_mode<synchronous>, transform_indices = @transform_3, window_bounds = array<i64: 384, 32>}, {pipeline_mode = #tpu.pipeline_mode<synchronous>, transform_indices = @transform_4, window_bounds = array<i64: 384, 1>}, {pipeline_mode = #tpu.pipeline_mode<synchronous>, transform_indices = @transform_5, window_bounds = array<i64: 64, 64>}, {transform_indices = @transform_6, window_bounds = array<i64: 1, 4, 256>}, {transform_indices = @transform_7, window_bounds = array<i64: 1, 2, 256>}]} {
    %c0 = arith.constant 0 : index
    %c0_0 = arith.constant 0 : index
    %c0_1 = arith.constant 0 : index
    %0 = vector.load %arg2[%c0, %c0_0, %c0_1] : memref<1x4x256xf32, #tpu.memory_space<vmem>>, vector<1x4x256xf32>
    %1 = vector.shape_cast %0 : vector<1x4x256xf32> to vector<4x256xf32>
    %2 = vector.extract_strided_slice %1 {offsets = [0, 0], sizes = [2, 256], strides = [1, 1]} : vector<4x256xf32> to vector<2x256xf32>
    %c0_2 = arith.constant 0 : index
    %c0_3 = arith.constant 0 : index
    %c0_4 = arith.constant 0 : index
    %3 = vector.load %arg8[%c0_2, %c0_3, %c0_4] : memref<1x4x256xf32, #tpu.memory_space<vmem>>, vector<1x2x256xf32>
    %4 = vector.shape_cast %3 : vector<1x2x256xf32> to vector<2x256xf32>
    %5 = vector.shape_cast %2 : vector<2x256xf32> to vector<1x2x256xf32>
    tpu.vector_store %arg8[%c0_2, %c0_3, %c0_4], %5 {strides = array<i32>} : memref<1x4x256xf32, #tpu.memory_space<vmem>>, vector<1x2x256xf32>,
    %c0_5 = arith.constant 0 : index
    %c0_6 = arith.constant 0 : index
    %6 = vector.load %arg3[%c0_5, %c0_6] : memref<32x2xf32, #tpu.memory_space<vmem>>, vector<32x2xf32>
    %c0_7 = arith.constant 0 : index
    %c0_8 = arith.constant 0 : index
    %7 = vector.load %arg4[%c0_7, %c0_8] : memref<32x1xf32, #tpu.memory_space<vmem>>, vector<32x1xf32>
    %8 = vector.extract_strided_slice %6 {offsets = [0, 0], sizes = [32, 1], strides = [1, 1]} : vector<32x2xf32> to vector<32x1xf32>
    %9 = vector.extract_strided_slice %2 {offsets = [0, 0], sizes = [1, 256], strides = [1, 1]} : vector<2x256xf32> to vector<1x256xf32>
    %10 = vector.broadcast %8 : vector<32x1xf32> to vector<32x256xf32>
    %11 = vector.broadcast %9 : vector<1x256xf32> to vector<32x256xf32>
    %12 = arith.mulf %10, %11 : vector<32x256xf32>
    %13 = vector.broadcast %7 : vector<32x1xf32> to vector<32x256xf32>
    %14 = arith.addf %13, %12 : vector<32x256xf32>
    %15 = vector.extract_strided_slice %6 {offsets = [0, 1], sizes = [32, 1], strides = [1, 1]} : vector<32x2xf32> to vector<32x1xf32>
    %16 = vector.extract_strided_slice %2 {offsets = [1, 0], sizes = [1, 256], strides = [1, 1]} : vector<2x256xf32> to vector<1x256xf32>
    %17 = vector.broadcast %15 : vector<32x1xf32> to vector<32x256xf32>
    %18 = vector.broadcast %16 : vector<1x256xf32> to vector<32x256xf32>
    %19 = arith.mulf %17, %18 : vector<32x256xf32>
    %20 = arith.addf %14, %19 : vector<32x256xf32>
    %cst = arith.constant 0.000000e+00 : f32
    %21 = vector.broadcast %cst : f32 to vector<32x256xf32>
    %22 = arith.maximumf %20, %21 : vector<32x256xf32>
    %c0_9 = arith.constant 0 : index
    %c0_10 = arith.constant 0 : index
    %23 = vector.load %arg5[%c0_9, %c0_10] : memref<384x32xf32, #tpu.memory_space<vmem>>, vector<384x32xf32>
    %cst_11 = arith.constant dense<0.000000e+00> : vector<384x256xf32>
    %24 = tpu.matmul %23, %22, %cst_11 {dimension_numbers = #tpu.dot_dimension_numbers<[1], [0], [0], [1], [0, 0, 1, 1], [], []>} : vector<384x32xf32>, vector<32x256xf32>, vector<384x256xf32> -> vector<384x256xf32>
    %c0_12 = arith.constant 0 : index
    %c0_13 = arith.constant 0 : index
    %25 = vector.load %arg6[%c0_12, %c0_13] : memref<384x1xf32, #tpu.memory_space<vmem>>, vector<384x1xf32>
    %26 = vector.broadcast %25 : vector<384x1xf32> to vector<384x256xf32>
    %27 = arith.addf %24, %26 : vector<384x256xf32>
    %c0_14 = arith.constant 0 : index
    %c0_15 = arith.constant 0 : index
    %28 = vector.load %arg7[%c0_14, %c0_15] : memref<64x64xf32, #tpu.memory_space<vmem>>, vector<64x64xf32>
    %29 = tpu.iota {dimensions = array<i32: 0>} : vector<64x256xi32>
    %30 = arith.sitofp %29 : vector<64x256xi32> to vector<64x256xf32>
    %cst_16 = arith.constant 6.300000e+01 : f32
    %31 = vector.broadcast %cst_16 : f32 to vector<64x256xf32>
    %32 = arith.cmpf oeq, %30, %31 : vector<64x256xf32>
    %33 = vector.extract_strided_slice %1 {offsets = [2, 0], sizes = [1, 256], strides = [1, 1]} : vector<4x256xf32> to vector<1x256xf32>
    %34 = vector.extract_strided_slice %27 {offsets = [0, 0], sizes = [64, 256], strides = [1, 1]} : vector<384x256xf32> to vector<64x256xf32>
    %35 = vector.extract_strided_slice %27 {offsets = [64, 0], sizes = [64, 256], strides = [1, 1]} : vector<384x256xf32> to vector<64x256xf32>
    %36 = vector.extract_strided_slice %27 {offsets = [256, 0], sizes = [64, 256], strides = [1, 1]} : vector<384x256xf32> to vector<64x256xf32>
    %cst_17 = arith.constant dense<0xFF800000> : vector<256xf32>
    %37 = vector.multi_reduction <maximumf>, %34, %cst_17 [0] : vector<64x256xf32> to vector<256xf32>
    %38 = vector.shape_cast %37 : vector<256xf32> to vector<1x256xf32>
    %39 = vector.broadcast %38 : vector<1x256xf32> to vector<64x256xf32>
    %40 = arith.subf %34, %39 : vector<64x256xf32>
    %41 = math.exp %40 : vector<64x256xf32>
    %cst_18 = arith.constant dense<0.000000e+00> : vector<256xf32>
    %42 = vector.multi_reduction <add>, %41, %cst_18 [0] : vector<64x256xf32> to vector<256xf32>
    %43 = vector.shape_cast %42 : vector<256xf32> to vector<1x256xf32>
    %44 = tpu.reciprocal %43 {approx = true} : vector<1x256xf32> -> vector<1x256xf32>
    %45 = vector.broadcast %44 : vector<1x256xf32> to vector<64x256xf32>
    %46 = arith.mulf %41, %45 : vector<64x256xf32>
    %cst_19 = arith.constant 0.935999989 : f32
    %47 = vector.broadcast %cst_19 : f32 to vector<64x256xf32>
    %48 = arith.mulf %47, %46 : vector<64x256xf32>
    %cst_20 = arith.constant 1.000000e-03 : f32
    %49 = vector.broadcast %cst_20 : f32 to vector<64x256xf32>
    %50 = arith.addf %49, %48 : vector<64x256xf32>
    %cst_21 = arith.constant dense<0xFF800000> : vector<256xf32>
    %51 = vector.multi_reduction <maximumf>, %35, %cst_21 [0] : vector<64x256xf32> to vector<256xf32>
    %52 = vector.shape_cast %51 : vector<256xf32> to vector<1x256xf32>
    %53 = vector.broadcast %52 : vector<1x256xf32> to vector<64x256xf32>
    %54 = arith.subf %35, %53 : vector<64x256xf32>
    %55 = math.exp %54 : vector<64x256xf32>
    %cst_22 = arith.constant dense<0.000000e+00> : vector<256xf32>
    %56 = vector.multi_reduction <add>, %55, %cst_22 [0] : vector<64x256xf32> to vector<256xf32>
    %57 = vector.shape_cast %56 : vector<256xf32> to vector<1x256xf32>
    %58 = tpu.reciprocal %57 {approx = true} : vector<1x256xf32> -> vector<1x256xf32>
    %59 = vector.broadcast %58 : vector<1x256xf32> to vector<64x256xf32>
    %60 = arith.mulf %55, %59 : vector<64x256xf32>
    %cst_23 = arith.constant 0.935999989 : f32
    %61 = vector.broadcast %cst_23 : f32 to vector<64x256xf32>
    %62 = arith.mulf %61, %60 : vector<64x256xf32>
    %cst_24 = arith.constant 1.000000e-03 : f32
    %63 = vector.broadcast %cst_24 : f32 to vector<64x256xf32>
    %64 = arith.addf %63, %62 : vector<64x256xf32>
    %cst_25 = arith.constant dense<0.000000e+00> : vector<64x256xf32>
    %65 = tpu.matmul %28, %50, %cst_25 {dimension_numbers = #tpu.dot_dimension_numbers<[1], [0], [0], [1], [0, 0, 1, 1], [], []>} : vector<64x64xf32>, vector<64x256xf32>, vector<64x256xf32> -> vector<64x256xf32>
    %66 = arith.addf %65, %50 : vector<64x256xf32>
    %cst_26 = arith.constant 1.000000e+01 : f32
    %67 = vector.broadcast %cst_26 : f32 to vector<64x256xf32>
    %68 = arith.mulf %67, %66 : vector<64x256xf32>
    %cst_27 = arith.constant -5.000000e+00 : f32
    %69 = vector.broadcast %cst_27 : f32 to vector<64x256xf32>
    %70 = arith.addf %69, %68 : vector<64x256xf32>
    %cst_28 = arith.constant 5.00000095 : f32
    %71 = vector.broadcast %cst_28 : f32 to vector<64x256xf32>
    %72 = arith.select %32, %71, %70 : vector<64x256xi1>, vector<64x256xf32>
    %73 = vector.broadcast %33 : vector<1x256xf32> to vector<64x256xf32>
    %74 = arith.cmpf oge, %73, %72 : vector<64x256xf32>
    %75 = arith.extui %74 : vector<64x256xi1> to vector<64x256xi32>
    %76 = arith.sitofp %75 : vector<64x256xi32> to vector<64x256xf32>
    %cst_29 = arith.constant dense<0.000000e+00> : vector<256xf32>
    %77 = vector.multi_reduction <add>, %76, %cst_29 [0] : vector<64x256xf32> to vector<256xf32>
    %78 = vector.shape_cast %77 : vector<256xf32> to vector<1x256xf32>
    %cst_30 = arith.constant 0.000000e+00 : f32
    %cst_31 = arith.constant 6.300000e+01 : f32
    %79 = vector.broadcast %cst_30 : f32 to vector<1x256xf32>
    %80 = arith.maximumf %79, %78 : vector<1x256xf32>
    %81 = vector.broadcast %cst_31 : f32 to vector<1x256xf32>
    %82 = arith.minimumf %81, %80 : vector<1x256xf32>
    %83 = vector.broadcast %82 : vector<1x256xf32> to vector<64x256xf32>
    %84 = arith.cmpf oeq, %30, %83 : vector<64x256xf32>
    %85 = arith.extui %84 : vector<64x256xi1> to vector<64x256xi32>
    %86 = arith.sitofp %85 : vector<64x256xi32> to vector<64x256xf32>
    %cst_32 = arith.constant 6.300000e+01 : f32
    %87 = vector.broadcast %cst_32 : f32 to vector<1x256xf32>
    %88 = arith.cmpf oeq, %82, %87 : vector<1x256xf32>
    %89 = arith.mulf %65, %86 : vector<64x256xf32>
    %cst_33 = arith.constant dense<0.000000e+00> : vector<256xf32>
    %90 = vector.multi_reduction <add>, %89, %cst_33 [0] : vector<64x256xf32> to vector<256xf32>
    %91 = vector.shape_cast %90 : vector<256xf32> to vector<1x256xf32>
    %cst_34 = arith.constant 1.000000e+01 : f32
    %92 = vector.broadcast %cst_34 : f32 to vector<1x256xf32>
    %93 = arith.mulf %92, %91 : vector<1x256xf32>
    %cst_35 = arith.constant -5.000000e+00 : f32
    %94 = vector.broadcast %cst_35 : f32 to vector<1x256xf32>
    %95 = arith.addf %94, %93 : vector<1x256xf32>
    %cst_36 = arith.constant 5.000000e+00 : f32
    %96 = vector.broadcast %cst_36 : f32 to vector<1x256xf32>
    %97 = arith.subf %96, %95 : vector<1x256xf32>
    %98 = arith.mulf %50, %86 : vector<64x256xf32>
    %cst_37 = arith.constant dense<0.000000e+00> : vector<256xf32>
    %99 = vector.multi_reduction <add>, %98, %cst_37 [0] : vector<64x256xf32> to vector<256xf32>
    %100 = vector.shape_cast %99 : vector<256xf32> to vector<1x256xf32>
    %cst_38 = arith.constant 1.000000e+01 : f32
    %101 = vector.broadcast %cst_38 : f32 to vector<1x256xf32>
    %102 = arith.mulf %101, %100 : vector<1x256xf32>
    %103 = arith.select %88, %97, %102 : vector<1x256xi1>, vector<1x256xf32>
    %104 = arith.mulf %64, %76 : vector<64x256xf32>
    %cst_39 = arith.constant dense<0.000000e+00> : vector<256xf32>
    %105 = vector.multi_reduction <add>, %104, %cst_39 [0] : vector<64x256xf32> to vector<256xf32>
    %106 = vector.shape_cast %105 : vector<256xf32> to vector<1x256xf32>
    %cst_40 = arith.constant 1.000000e+01 : f32
    %107 = vector.broadcast %cst_40 : f32 to vector<1x256xf32>
    %108 = arith.mulf %107, %106 : vector<1x256xf32>
    %cst_41 = arith.constant -5.000000e+00 : f32
    %109 = vector.broadcast %cst_41 : f32 to vector<1x256xf32>
    %110 = arith.addf %109, %108 : vector<1x256xf32>
    %cst_42 = arith.constant 5.000000e+00 : f32
    %111 = vector.broadcast %cst_42 : f32 to vector<1x256xf32>
    %112 = arith.subf %111, %110 : vector<1x256xf32>
    %113 = arith.mulf %64, %86 : vector<64x256xf32>
    %cst_43 = arith.constant dense<0.000000e+00> : vector<256xf32>
    %114 = vector.multi_reduction <add>, %113, %cst_43 [0] : vector<64x256xf32> to vector<256xf32>
    %115 = vector.shape_cast %114 : vector<256xf32> to vector<1x256xf32>
    %cst_44 = arith.constant 1.000000e+01 : f32
    %116 = vector.broadcast %cst_44 : f32 to vector<1x256xf32>
    %117 = arith.mulf %116, %115 : vector<1x256xf32>
    %118 = arith.select %88, %112, %117 : vector<1x256xi1>, vector<1x256xf32>
    %cst_45 = arith.constant 0.000000e+00 : f32
    %119 = vector.broadcast %cst_45 : f32 to vector<1x256xf32>
    %120 = arith.cmpf oeq, %82, %119 : vector<1x256xf32>
    %c1_i32 = arith.constant 1 : i32
    %121 = tpu.dynamic_rotate %36 by %c1_i32 dim 0 : vector<64x256xf32>, i32 -> vector<64x256xf32>
    %122 = arith.mulf %121, %86 : vector<64x256xf32>
    %cst_46 = arith.constant dense<0.000000e+00> : vector<256xf32>
    %123 = vector.multi_reduction <add>, %122, %cst_46 [0] : vector<64x256xf32> to vector<256xf32>
    %124 = vector.shape_cast %123 : vector<256xf32> to vector<1x256xf32>
    %cst_47 = arith.constant 2.000000e+01 : f32
    %125 = vector.broadcast %cst_47 : f32 to vector<1x256xf32>
    %126 = arith.cmpf ogt, %124, %125 : vector<1x256xf32>
    %cst_48 = arith.constant 2.000000e+01 : f32
    %127 = vector.broadcast %cst_48 : f32 to vector<1x256xf32>
    %128 = arith.minimumf %124, %127 : vector<1x256xf32>
    %129 = math.exp %128 : vector<1x256xf32>
    %130 = math.log1p %129 : vector<1x256xf32>
    %131 = arith.select %126, %124, %130 : vector<1x256xi1>, vector<1x256xf32>
    %cst_49 = arith.constant 1.000000e-03 : f32
    %132 = vector.broadcast %cst_49 : f32 to vector<1x256xf32>
    %133 = arith.addf %132, %131 : vector<1x256xf32>
    %cst_50 = arith.constant 1.000000e+00 : f32
    %134 = vector.broadcast %cst_50 : f32 to vector<1x256xf32>
    %135 = arith.select %120, %134, %133 : vector<1x256xi1>, vector<1x256xf32>
    %136 = arith.mulf %36, %86 : vector<64x256xf32>
    %cst_51 = arith.constant dense<0.000000e+00> : vector<256xf32>
    %137 = vector.multi_reduction <add>, %136, %cst_51 [0] : vector<64x256xf32> to vector<256xf32>
    %138 = vector.shape_cast %137 : vector<256xf32> to vector<1x256xf32>
    %cst_52 = arith.constant 2.000000e+01 : f32
    %139 = vector.broadcast %cst_52 : f32 to vector<1x256xf32>
    %140 = arith.cmpf ogt, %138, %139 : vector<1x256xf32>
    %cst_53 = arith.constant 2.000000e+01 : f32
    %141 = vector.broadcast %cst_53 : f32 to vector<1x256xf32>
    %142 = arith.minimumf %138, %141 : vector<1x256xf32>
    %143 = math.exp %142 : vector<1x256xf32>
    %144 = math.log1p %143 : vector<1x256xf32>
    %145 = arith.select %140, %138, %144 : vector<1x256xi1>, vector<1x256xf32>
    %cst_54 = arith.constant 1.000000e-03 : f32
    %146 = vector.broadcast %cst_54 : f32 to vector<1x256xf32>
    %147 = arith.addf %146, %145 : vector<1x256xf32>
    %cst_55 = arith.constant 1.000000e+00 : f32
    %148 = vector.broadcast %cst_55 : f32 to vector<1x256xf32>
    %149 = arith.select %88, %148, %147 : vector<1x256xi1>, vector<1x256xf32>
    %cst_56 = arith.constant 1.000000e+00 : f32
    %150 = vector.broadcast %cst_56 : f32 to vector<1x256xf32>
    %151 = arith.divf %150, %103 : vector<1x256xf32>
    %152 = arith.mulf %118, %151 : vector<1x256xf32>
    %153 = arith.subf %33, %95 : vector<1x256xf32>
    %154 = arith.mulf %153, %151 : vector<1x256xf32>
    %155 = arith.mulf %154, %154 : vector<1x256xf32>
    %cst_57 = arith.constant 1.000000e+00 : f32
    %156 = vector.broadcast %cst_57 : f32 to vector<1x256xf32>
    %157 = arith.subf %156, %154 : vector<1x256xf32>
    %158 = arith.mulf %154, %157 : vector<1x256xf32>
    %159 = arith.mulf %152, %155 : vector<1x256xf32>
    %160 = arith.mulf %135, %158 : vector<1x256xf32>
    %161 = arith.addf %159, %160 : vector<1x256xf32>
    %162 = arith.mulf %118, %161 : vector<1x256xf32>
    %163 = arith.addf %135, %149 : vector<1x256xf32>
    %cst_58 = arith.constant 2.000000e+00 : f32
    %164 = vector.broadcast %cst_58 : f32 to vector<1x256xf32>
    %165 = arith.mulf %164, %152 : vector<1x256xf32>
    %166 = arith.subf %163, %165 : vector<1x256xf32>
    %167 = arith.mulf %166, %158 : vector<1x256xf32>
    %168 = arith.addf %152, %167 : vector<1x256xf32>
    %169 = arith.divf %162, %168 : vector<1x256xf32>
    %170 = arith.addf %110, %169 : vector<1x256xf32>
    %171 = arith.mulf %152, %152 : vector<1x256xf32>
    %172 = arith.mulf %149, %155 : vector<1x256xf32>
    %cst_59 = arith.constant 2.000000e+00 : f32
    %173 = vector.broadcast %cst_59 : f32 to vector<1x256xf32>
    %174 = arith.mulf %173, %152 : vector<1x256xf32>
    %175 = arith.mulf %174, %158 : vector<1x256xf32>
    %176 = arith.addf %172, %175 : vector<1x256xf32>
    %cst_60 = arith.constant 1.000000e+00 : f32
    %177 = vector.broadcast %cst_60 : f32 to vector<1x256xf32>
    %178 = arith.subf %177, %154 : vector<1x256xf32>
    %179 = arith.mulf %135, %178 : vector<1x256xf32>
    %cst_61 = arith.constant 1.000000e+00 : f32
    %180 = vector.broadcast %cst_61 : f32 to vector<1x256xf32>
    %181 = arith.subf %180, %154 : vector<1x256xf32>
    %182 = arith.mulf %179, %181 : vector<1x256xf32>
    %183 = arith.addf %176, %182 : vector<1x256xf32>
    %184 = arith.mulf %171, %183 : vector<1x256xf32>
    %185 = math.log %184 : vector<1x256xf32>
    %186 = math.log %168 : vector<1x256xf32>
    %cst_62 = arith.constant 2.000000e+00 : f32
    %187 = vector.broadcast %cst_62 : f32 to vector<1x256xf32>
    %188 = arith.mulf %187, %186 : vector<1x256xf32>
    %189 = arith.subf %185, %188 : vector<1x256xf32>
    %cst_63 = arith.constant -5.000000e+00 : f32
    %190 = vector.broadcast %cst_63 : f32 to vector<1x256xf32>
    %191 = arith.cmpf oge, %33, %190 : vector<1x256xf32>
    %cst_64 = arith.constant 5.000000e+00 : f32
    %192 = vector.broadcast %cst_64 : f32 to vector<1x256xf32>
    %193 = arith.cmpf ole, %33, %192 : vector<1x256xf32>
    %194 = arith.andi %191, %193 : vector<1x256xi1>
    %195 = arith.select %194, %170, %33 : vector<1x256xi1>, vector<1x256xf32>
    %c0_65 = arith.constant 0 : index
    %c2 = arith.constant 2 : index
    %c0_66 = arith.constant 0 : index
    %196 = vector.load %arg8[%c0_65, %c2, %c0_66] : memref<1x4x256xf32, #tpu.memory_space<vmem>>, vector<1x1x256xf32>
    %197 = vector.shape_cast %196 : vector<1x1x256xf32> to vector<1x256xf32>
    %198 = vector.shape_cast %195 : vector<1x256xf32> to vector<1x1x256xf32>
    tpu.vector_store %arg8[%c0_65, %c2, %c0_66], %198 {strides = array<i32>} : memref<1x4x256xf32, #tpu.memory_space<vmem>>, vector<1x1x256xf32>,
    %cst_67 = arith.constant 0.000000e+00 : f32
    %199 = vector.broadcast %cst_67 : f32 to vector<1x256xf32>
    %200 = arith.select %194, %189, %199 : vector<1x256xi1>, vector<1x256xf32>
    %c0_68 = arith.constant 0 : index
    %c0_69 = arith.constant 0 : index
    %c0_70 = arith.constant 0 : index
    %201 = vector.load %arg9[%c0_68, %c0_69, %c0_70] : memref<1x2x256xf32, #tpu.memory_space<vmem>>, vector<1x1x256xf32>
    %202 = vector.shape_cast %201 : vector<1x1x256xf32> to vector<1x256xf32>
    %203 = vector.shape_cast %200 : vector<1x256xf32> to vector<1x1x256xf32>
    tpu.vector_store %arg9[%c0_68, %c0_69, %c0_70], %203 {strides = array<i32>} : memref<1x2x256xf32, #tpu.memory_space<vmem>>, vector<1x1x256xf32>,
    %204 = vector.extract_strided_slice %1 {offsets = [3, 0], sizes = [1, 256], strides = [1, 1]} : vector<4x256xf32> to vector<1x256xf32>
    %205 = vector.extract_strided_slice %27 {offsets = [128, 0], sizes = [64, 256], strides = [1, 1]} : vector<384x256xf32> to vector<64x256xf32>
    %206 = vector.extract_strided_slice %27 {offsets = [192, 0], sizes = [64, 256], strides = [1, 1]} : vector<384x256xf32> to vector<64x256xf32>
    %207 = vector.extract_strided_slice %27 {offsets = [320, 0], sizes = [64, 256], strides = [1, 1]} : vector<384x256xf32> to vector<64x256xf32>
    %cst_71 = arith.constant dense<0xFF800000> : vector<256xf32>
    %208 = vector.multi_reduction <maximumf>, %205, %cst_71 [0] : vector<64x256xf32> to vector<256xf32>
    %209 = vector.shape_cast %208 : vector<256xf32> to vector<1x256xf32>
    %210 = vector.broadcast %209 : vector<1x256xf32> to vector<64x256xf32>
    %211 = arith.subf %205, %210 : vector<64x256xf32>
    %212 = math.exp %211 : vector<64x256xf32>
    %cst_72 = arith.constant dense<0.000000e+00> : vector<256xf32>
    %213 = vector.multi_reduction <add>, %212, %cst_72 [0] : vector<64x256xf32> to vector<256xf32>
    %214 = vector.shape_cast %213 : vector<256xf32> to vector<1x256xf32>
    %215 = tpu.reciprocal %214 {approx = true} : vector<1x256xf32> -> vector<1x256xf32>
    %216 = vector.broadcast %215 : vector<1x256xf32> to vector<64x256xf32>
    %217 = arith.mulf %212, %216 : vector<64x256xf32>
    %cst_73 = arith.constant 0.935999989 : f32
    %218 = vector.broadcast %cst_73 : f32 to vector<64x256xf32>
    %219 = arith.mulf %218, %217 : vector<64x256xf32>
    %cst_74 = arith.constant 1.000000e-03 : f32
    %220 = vector.broadcast %cst_74 : f32 to vector<64x256xf32>
    %221 = arith.addf %220, %219 : vector<64x256xf32>
    %cst_75 = arith.constant dense<0xFF800000> : vector<256xf32>
    %222 = vector.multi_reduction <maximumf>, %206, %cst_75 [0] : vector<64x256xf32> to vector<256xf32>
    %223 = vector.shape_cast %222 : vector<256xf32> to vector<1x256xf32>
    %224 = vector.broadcast %223 : vector<1x256xf32> to vector<64x256xf32>
    %225 = arith.subf %206, %224 : vector<64x256xf32>
    %226 = math.exp %225 : vector<64x256xf32>
    %cst_76 = arith.constant dense<0.000000e+00> : vector<256xf32>
    %227 = vector.multi_reduction <add>, %226, %cst_76 [0] : vector<64x256xf32> to vector<256xf32>
    %228 = vector.shape_cast %227 : vector<256xf32> to vector<1x256xf32>
    %229 = tpu.reciprocal %228 {approx = true} : vector<1x256xf32> -> vector<1x256xf32>
    %230 = vector.broadcast %229 : vector<1x256xf32> to vector<64x256xf32>
    %231 = arith.mulf %226, %230 : vector<64x256xf32>
    %cst_77 = arith.constant 0.935999989 : f32
    %232 = vector.broadcast %cst_77 : f32 to vector<64x256xf32>
    %233 = arith.mulf %232, %231 : vector<64x256xf32>
    %cst_78 = arith.constant 1.000000e-03 : f32
    %234 = vector.broadcast %cst_78 : f32 to vector<64x256xf32>
    %235 = arith.addf %234, %233 : vector<64x256xf32>
    %cst_79 = arith.constant dense<0.000000e+00> : vector<64x256xf32>
    %236 = tpu.matmul %28, %221, %cst_79 {dimension_numbers = #tpu.dot_dimension_numbers<[1], [0], [0], [1], [0, 0, 1, 1], [], []>} : vector<64x64xf32>, vector<64x256xf32>, vector<64x256xf32> -> vector<64x256xf32>
    %237 = arith.addf %236, %221 : vector<64x256xf32>
    %cst_80 = arith.constant 1.000000e+01 : f32
    %238 = vector.broadcast %cst_80 : f32 to vector<64x256xf32>
    %239 = arith.mulf %238, %237 : vector<64x256xf32>
    %cst_81 = arith.constant -5.000000e+00 : f32
    %240 = vector.broadcast %cst_81 : f32 to vector<64x256xf32>
    %241 = arith.addf %240, %239 : vector<64x256xf32>
    %cst_82 = arith.constant 5.00000095 : f32
    %242 = vector.broadcast %cst_82 : f32 to vector<64x256xf32>
    %243 = arith.select %32, %242, %241 : vector<64x256xi1>, vector<64x256xf32>
    %244 = vector.broadcast %204 : vector<1x256xf32> to vector<64x256xf32>
    %245 = arith.cmpf oge, %244, %243 : vector<64x256xf32>
    %246 = arith.extui %245 : vector<64x256xi1> to vector<64x256xi32>
    %247 = arith.sitofp %246 : vector<64x256xi32> to vector<64x256xf32>
    %cst_83 = arith.constant dense<0.000000e+00> : vector<256xf32>
    %248 = vector.multi_reduction <add>, %247, %cst_83 [0] : vector<64x256xf32> to vector<256xf32>
    %249 = vector.shape_cast %248 : vector<256xf32> to vector<1x256xf32>
    %cst_84 = arith.constant 0.000000e+00 : f32
    %cst_85 = arith.constant 6.300000e+01 : f32
    %250 = vector.broadcast %cst_84 : f32 to vector<1x256xf32>
    %251 = arith.maximumf %250, %249 : vector<1x256xf32>
    %252 = vector.broadcast %cst_85 : f32 to vector<1x256xf32>
    %253 = arith.minimumf %252, %251 : vector<1x256xf32>
    %254 = vector.broadcast %253 : vector<1x256xf32> to vector<64x256xf32>
    %255 = arith.cmpf oeq, %30, %254 : vector<64x256xf32>
    %256 = arith.extui %255 : vector<64x256xi1> to vector<64x256xi32>
    %257 = arith.sitofp %256 : vector<64x256xi32> to vector<64x256xf32>
    %cst_86 = arith.constant 6.300000e+01 : f32
    %258 = vector.broadcast %cst_86 : f32 to vector<1x256xf32>
    %259 = arith.cmpf oeq, %253, %258 : vector<1x256xf32>
    %260 = arith.mulf %236, %257 : vector<64x256xf32>
    %cst_87 = arith.constant dense<0.000000e+00> : vector<256xf32>
    %261 = vector.multi_reduction <add>, %260, %cst_87 [0] : vector<64x256xf32> to vector<256xf32>
    %262 = vector.shape_cast %261 : vector<256xf32> to vector<1x256xf32>
    %cst_88 = arith.constant 1.000000e+01 : f32
    %263 = vector.broadcast %cst_88 : f32 to vector<1x256xf32>
    %264 = arith.mulf %263, %262 : vector<1x256xf32>
    %cst_89 = arith.constant -5.000000e+00 : f32
    %265 = vector.broadcast %cst_89 : f32 to vector<1x256xf32>
    %266 = arith.addf %265, %264 : vector<1x256xf32>
    %cst_90 = arith.constant 5.000000e+00 : f32
    %267 = vector.broadcast %cst_90 : f32 to vector<1x256xf32>
    %268 = arith.subf %267, %266 : vector<1x256xf32>
    %269 = arith.mulf %221, %257 : vector<64x256xf32>
    %cst_91 = arith.constant dense<0.000000e+00> : vector<256xf32>
    %270 = vector.multi_reduction <add>, %269, %cst_91 [0] : vector<64x256xf32> to vector<256xf32>
    %271 = vector.shape_cast %270 : vector<256xf32> to vector<1x256xf32>
    %cst_92 = arith.constant 1.000000e+01 : f32
    %272 = vector.broadcast %cst_92 : f32 to vector<1x256xf32>
    %273 = arith.mulf %272, %271 : vector<1x256xf32>
    %274 = arith.select %259, %268, %273 : vector<1x256xi1>, vector<1x256xf32>
    %275 = arith.mulf %235, %247 : vector<64x256xf32>
    %cst_93 = arith.constant dense<0.000000e+00> : vector<256xf32>
    %276 = vector.multi_reduction <add>, %275, %cst_93 [0] : vector<64x256xf32> to vector<256xf32>
    %277 = vector.shape_cast %276 : vector<256xf32> to vector<1x256xf32>
    %cst_94 = arith.constant 1.000000e+01 : f32
    %278 = vector.broadcast %cst_94 : f32 to vector<1x256xf32>
    %279 = arith.mulf %278, %277 : vector<1x256xf32>
    %cst_95 = arith.constant -5.000000e+00 : f32
    %280 = vector.broadcast %cst_95 : f32 to vector<1x256xf32>
    %281 = arith.addf %280, %279 : vector<1x256xf32>
    %cst_96 = arith.constant 5.000000e+00 : f32
    %282 = vector.broadcast %cst_96 : f32 to vector<1x256xf32>
    %283 = arith.subf %282, %281 : vector<1x256xf32>
    %284 = arith.mulf %235, %257 : vector<64x256xf32>
    %cst_97 = arith.constant dense<0.000000e+00> : vector<256xf32>
    %285 = vector.multi_reduction <add>, %284, %cst_97 [0] : vector<64x256xf32> to vector<256xf32>
    %286 = vector.shape_cast %285 : vector<256xf32> to vector<1x256xf32>
    %cst_98 = arith.constant 1.000000e+01 : f32
    %287 = vector.broadcast %cst_98 : f32 to vector<1x256xf32>
    %288 = arith.mulf %287, %286 : vector<1x256xf32>
    %289 = arith.select %259, %283, %288 : vector<1x256xi1>, vector<1x256xf32>
    %cst_99 = arith.constant 0.000000e+00 : f32
    %290 = vector.broadcast %cst_99 : f32 to vector<1x256xf32>
    %291 = arith.cmpf oeq, %253, %290 : vector<1x256xf32>
    %c1_i32_100 = arith.constant 1 : i32
    %292 = tpu.dynamic_rotate %207 by %c1_i32_100 dim 0 : vector<64x256xf32>, i32 -> vector<64x256xf32>
    %293 = arith.mulf %292, %257 : vector<64x256xf32>
    %cst_101 = arith.constant dense<0.000000e+00> : vector<256xf32>
    %294 = vector.multi_reduction <add>, %293, %cst_101 [0] : vector<64x256xf32> to vector<256xf32>
    %295 = vector.shape_cast %294 : vector<256xf32> to vector<1x256xf32>
    %cst_102 = arith.constant 2.000000e+01 : f32
    %296 = vector.broadcast %cst_102 : f32 to vector<1x256xf32>
    %297 = arith.cmpf ogt, %295, %296 : vector<1x256xf32>
    %cst_103 = arith.constant 2.000000e+01 : f32
    %298 = vector.broadcast %cst_103 : f32 to vector<1x256xf32>
    %299 = arith.minimumf %295, %298 : vector<1x256xf32>
    %300 = math.exp %299 : vector<1x256xf32>
    %301 = math.log1p %300 : vector<1x256xf32>
    %302 = arith.select %297, %295, %301 : vector<1x256xi1>, vector<1x256xf32>
    %cst_104 = arith.constant 1.000000e-03 : f32
    %303 = vector.broadcast %cst_104 : f32 to vector<1x256xf32>
    %304 = arith.addf %303, %302 : vector<1x256xf32>
    %cst_105 = arith.constant 1.000000e+00 : f32
    %305 = vector.broadcast %cst_105 : f32 to vector<1x256xf32>
    %306 = arith.select %291, %305, %304 : vector<1x256xi1>, vector<1x256xf32>
    %307 = arith.mulf %207, %257 : vector<64x256xf32>
    %cst_106 = arith.constant dense<0.000000e+00> : vector<256xf32>
    %308 = vector.multi_reduction <add>, %307, %cst_106 [0] : vector<64x256xf32> to vector<256xf32>
    %309 = vector.shape_cast %308 : vector<256xf32> to vector<1x256xf32>
    %cst_107 = arith.constant 2.000000e+01 : f32
    %310 = vector.broadcast %cst_107 : f32 to vector<1x256xf32>
    %311 = arith.cmpf ogt, %309, %310 : vector<1x256xf32>
    %cst_108 = arith.constant 2.000000e+01 : f32
    %312 = vector.broadcast %cst_108 : f32 to vector<1x256xf32>
    %313 = arith.minimumf %309, %312 : vector<1x256xf32>
    %314 = math.exp %313 : vector<1x256xf32>
    %315 = math.log1p %314 : vector<1x256xf32>
    %316 = arith.select %311, %309, %315 : vector<1x256xi1>, vector<1x256xf32>
    %cst_109 = arith.constant 1.000000e-03 : f32
    %317 = vector.broadcast %cst_109 : f32 to vector<1x256xf32>
    %318 = arith.addf %317, %316 : vector<1x256xf32>
    %cst_110 = arith.constant 1.000000e+00 : f32
    %319 = vector.broadcast %cst_110 : f32 to vector<1x256xf32>
    %320 = arith.select %259, %319, %318 : vector<1x256xi1>, vector<1x256xf32>
    %cst_111 = arith.constant 1.000000e+00 : f32
    %321 = vector.broadcast %cst_111 : f32 to vector<1x256xf32>
    %322 = arith.divf %321, %274 : vector<1x256xf32>
    %323 = arith.mulf %289, %322 : vector<1x256xf32>
    %324 = arith.subf %204, %266 : vector<1x256xf32>
    %325 = arith.mulf %324, %322 : vector<1x256xf32>
    %326 = arith.mulf %325, %325 : vector<1x256xf32>
    %cst_112 = arith.constant 1.000000e+00 : f32
    %327 = vector.broadcast %cst_112 : f32 to vector<1x256xf32>
    %328 = arith.subf %327, %325 : vector<1x256xf32>
    %329 = arith.mulf %325, %328 : vector<1x256xf32>
    %330 = arith.mulf %323, %326 : vector<1x256xf32>
    %331 = arith.mulf %306, %329 : vector<1x256xf32>
    %332 = arith.addf %330, %331 : vector<1x256xf32>
    %333 = arith.mulf %289, %332 : vector<1x256xf32>
    %334 = arith.addf %306, %320 : vector<1x256xf32>
    %cst_113 = arith.constant 2.000000e+00 : f32
    %335 = vector.broadcast %cst_113 : f32 to vector<1x256xf32>
    %336 = arith.mulf %335, %323 : vector<1x256xf32>
    %337 = arith.subf %334, %336 : vector<1x256xf32>
    %338 = arith.mulf %337, %329 : vector<1x256xf32>
    %339 = arith.addf %323, %338 : vector<1x256xf32>
    %340 = arith.divf %333, %339 : vector<1x256xf32>
    %341 = arith.addf %281, %340 : vector<1x256xf32>
    %342 = arith.mulf %323, %323 : vector<1x256xf32>
    %343 = arith.mulf %320, %326 : vector<1x256xf32>
    %cst_114 = arith.constant 2.000000e+00 : f32
    %344 = vector.broadcast %cst_114 : f32 to vector<1x256xf32>
    %345 = arith.mulf %344, %323 : vector<1x256xf32>
    %346 = arith.mulf %345, %329 : vector<1x256xf32>
    %347 = arith.addf %343, %346 : vector<1x256xf32>
    %cst_115 = arith.constant 1.000000e+00 : f32
    %348 = vector.broadcast %cst_115 : f32 to vector<1x256xf32>
    %349 = arith.subf %348, %325 : vector<1x256xf32>
    %350 = arith.mulf %306, %349 : vector<1x256xf32>
    %cst_116 = arith.constant 1.000000e+00 : f32
    %351 = vector.broadcast %cst_116 : f32 to vector<1x256xf32>
    %352 = arith.subf %351, %325 : vector<1x256xf32>
    %353 = arith.mulf %350, %352 : vector<1x256xf32>
    %354 = arith.addf %347, %353 : vector<1x256xf32>
    %355 = arith.mulf %342, %354 : vector<1x256xf32>
    %356 = math.log %355 : vector<1x256xf32>
    %357 = math.log %339 : vector<1x256xf32>
    %cst_117 = arith.constant 2.000000e+00 : f32
    %358 = vector.broadcast %cst_117 : f32 to vector<1x256xf32>
    %359 = arith.mulf %358, %357 : vector<1x256xf32>
    %360 = arith.subf %356, %359 : vector<1x256xf32>
    %cst_118 = arith.constant -5.000000e+00 : f32
    %361 = vector.broadcast %cst_118 : f32 to vector<1x256xf32>
    %362 = arith.cmpf oge, %204, %361 : vector<1x256xf32>
    %cst_119 = arith.constant 5.000000e+00 : f32
    %363 = vector.broadcast %cst_119 : f32 to vector<1x256xf32>
    %364 = arith.cmpf ole, %204, %363 : vector<1x256xf32>
    %365 = arith.andi %362, %364 : vector<1x256xi1>
    %366 = arith.select %365, %341, %204 : vector<1x256xi1>, vector<1x256xf32>
    %c0_120 = arith.constant 0 : index
    %c3 = arith.constant 3 : index
    %c0_121 = arith.constant 0 : index
    %367 = vector.load %arg8[%c0_120, %c3, %c0_121] : memref<1x4x256xf32, #tpu.memory_space<vmem>>, vector<1x1x256xf32>
    %368 = vector.shape_cast %367 : vector<1x1x256xf32> to vector<1x256xf32>
    %369 = vector.shape_cast %366 : vector<1x256xf32> to vector<1x1x256xf32>
    tpu.vector_store %arg8[%c0_120, %c3, %c0_121], %369 {strides = array<i32>} : memref<1x4x256xf32, #tpu.memory_space<vmem>>, vector<1x1x256xf32>,
    %cst_122 = arith.constant 0.000000e+00 : f32
    %370 = vector.broadcast %cst_122 : f32 to vector<1x256xf32>
    %371 = arith.select %365, %360, %370 : vector<1x256xi1>, vector<1x256xf32>
    %c0_123 = arith.constant 0 : index
    %c1 = arith.constant 1 : index
    %c0_124 = arith.constant 0 : index
    %372 = vector.load %arg9[%c0_123, %c1, %c0_124] : memref<1x2x256xf32, #tpu.memory_space<vmem>>, vector<1x1x256xf32>
    %373 = vector.shape_cast %372 : vector<1x1x256xf32> to vector<1x256xf32>
    %374 = vector.shape_cast %371 : vector<1x256xf32> to vector<1x1x256xf32>
    tpu.vector_store %arg9[%c0_123, %c1, %c0_124], %374 {strides = array<i32>} : memref<1x2x256xf32, #tpu.memory_space<vmem>>, vector<1x1x256xf32>,
    return
  }
  func.func @transform_0(%arg0: i32, %arg1: i32) -> (i32, i32, i32) {
    %c0_i32 = arith.constant 0 : i32
    %c0_i32_0 = arith.constant 0 : i32
    return %arg0, %c0_i32, %arg1 : i32, i32, i32
  }
  func.func @transform_1(%arg0: i32, %arg1: i32) -> (i32, i32) {
    %c0_i32 = arith.constant 0 : i32
    %c0_i32_0 = arith.constant 0 : i32
    %c0_i32_1 = arith.constant 0 : i32
    return %c0_i32, %c0_i32_0 : i32, i32
  }
  func.func @transform_2(%arg0: i32, %arg1: i32) -> (i32, i32) {
    %c0_i32 = arith.constant 0 : i32
    %c0_i32_0 = arith.constant 0 : i32
    %c0_i32_1 = arith.constant 0 : i32
    return %c0_i32, %c0_i32_0 : i32, i32
  }
  func.func @transform_3(%arg0: i32, %arg1: i32) -> (i32, i32) {
    %c0_i32 = arith.constant 0 : i32
    %c0_i32_0 = arith.constant 0 : i32
    %c0_i32_1 = arith.constant 0 : i32
    return %c0_i32, %c0_i32_0 : i32, i32
  }
  func.func @transform_4(%arg0: i32, %arg1: i32) -> (i32, i32) {
    %c0_i32 = arith.constant 0 : i32
    %c0_i32_0 = arith.constant 0 : i32
    %c0_i32_1 = arith.constant 0 : i32
    return %c0_i32, %c0_i32_0 : i32, i32
  }
  func.func @transform_5(%arg0: i32, %arg1: i32) -> (i32, i32) {
    %c0_i32 = arith.constant 0 : i32
    %c0_i32_0 = arith.constant 0 : i32
    %c0_i32_1 = arith.constant 0 : i32
    return %c0_i32, %c0_i32_0 : i32, i32
  }
  func.func @transform_6(%arg0: i32, %arg1: i32) -> (i32, i32, i32) {
    %c0_i32 = arith.constant 0 : i32
    %c0_i32_0 = arith.constant 0 : i32
    return %arg0, %c0_i32, %arg1 : i32, i32, i32
  }
  func.func @transform_7(%arg0: i32, %arg1: i32) -> (i32, i32, i32) {
    %c0_i32 = arith.constant 0 : i32
    %c0_i32_0 = arith.constant 0 : i32
    return %arg0, %c0_i32, %arg1 : i32, i32, i32
  }
}

</mosaic_0001>

<bundles_post_ra>
// kernel: mul.3
= control target key start
LH: loop header
LB: loop body
LE: loop exit
PB: predicated region body
PF: predicated region fallthrough
CT: control target
= control target key end

     0   :  { %s34_s0 = inlined_call_operand.vmem [shape: f32[384], index: 0, kind: input, shape index: {}]   ;;  %s35_s1 = inlined_call_operand.vmem [shape: f32[384], index: 1, kind: input, shape index: {}]   ;;  %s36_s2 = inlined_call_operand.vmem [shape: f32[384], index: 2, kind: output, shape index: {}]  }
   0x1   :  { %v3_v0 = vld [vmem:[%s34_s0] sm:$0x7] }
   0x2   :  { %v4_v1 = vld [vmem:[%s35_s1] sm:$0x7] }
   0x3   :  { %v7_v2 = vmul.f32 %v4_v1, %v3_v0 }
   0x5   :  { %9 = vst [vmem:[%s36_s2] sm:$0xf] %v7_v2 }

// kernel: spline_coupling_forward.1
= control target key start
LH: loop header
LB: loop body
LE: loop exit
PB: predicated region body
PF: predicated region fallthrough
CT: control target
= control target key end

     0   :  { %s4239_s24 = smov 0   ;;  %s4241_s25 = smov 0   ;;  %s7467_s0 = inlined_call_operand.vmem [shape: f32[2,4,256], index: 0, kind: input, shape index: {}]   ;;  %s7468_s1 = inlined_call_operand.vmem [shape: f32[32,2], index: 1, kind: input, shape index: {}]   ;;  %s7469_s2 = inlined_call_operand.vmem [shape: f32[32,1], index: 2, kind: input, shape index: {}]   ;;  %s7470_s3 = inlined_call_operand.vmem [shape: f32[384,32], index: 3, kind: input, shape index: {}]   ;;  %s7471_s4 = inlined_call_operand.vmem [shape: f32[384,1], index: 4, kind: input, shape index: {}]   ;;  %s7472_s5 = inlined_call_operand.vmem [shape: f32[64,64], index: 5, kind: input, shape index: {}]   ;;  %s7473_s6 = inlined_call_operand.vmem [shape: f32[2,4,256], index: 6, kind: output, shape index: {0}]   ;;  %s7474_s7 = inlined_call_operand.vmem [shape: f32[2,2,256], index: 7, kind: output, shape index: {1}]  }
   0x1   :  { %s4243_s26 = smov 0  }
   0x2 LB: > { %s30_s27 = sadd.s32 1, %s4190_s25  ;;  %p3711_p0 = scmp.ge.s32.totalorder %s4194_s26, 1  ;;  %s4194_s26 = sphi %s4243_s26, %s18_s26   ;;  %s4190_s25 = sphi %s4241_s25, %s8057_s25   ;;  %s4186_s24 = sphi %s4239_s24, %s8056_s24  }
   0x3   : > { %p32_p1 = scmp.ge.s32.totalorder %s30_s27, 2  ;;  %p263_p2 = scmp.lt.s32.totalorder %s4194_s26, 3 }
   0x5   : > { %s8059_s27 = smov (%p32_p1, %s30_s27), 0  ;;  %p264_p3 = pnand %p3711_p0, %p263_p2 }
   0x7   : > { %267 = sbr.rel (%p264_p3) target bundleno = 1046 (0x416), region = 44 }
   0xc   : > { %v351_v0 = vld [vmem:[%s7469_s2 + $0x18] sm:$0xff]  ;;  %v345_v2 = vld [vmem:[%s7468_s1 + $0x8] sm:$0xff]  ;;  %v4196_v3 = vmov 0   ;;  %v346_v4 = vld [vmem:[%s7468_s1 + $0x10] sm:$0xff]  ;;  %v4197_v6 = vmov 1   ;;  %p313_p4 = scmp.lt.s32.totalorder %s4186_s24, 1 }
   0xd   : > { %v347_v1 = vld [vmem:[%s7468_s1 + $0x18] sm:$0xff]  ;;  %3956 = vset.pattern.permute.xlu2 %v4196_v3  ;;  %3954 = vset.pattern.permute.xlu1 %v4196_v3  ;;  %v350_v5 = vld [vmem:[%s7469_s2 + $0x10] sm:$0xff]  ;;  %v349_v7 = vld [vmem:[%s7469_s2 + $0x8] sm:$0xff]  ;;  %vm797_vm0 = vcmask 261120   ;;  %vm1597_vm2 = vcmask 523264  }
   0xe   : > { %3953 = vset.pattern.permute.xlu0 %v4196_v3  ;;  %404 = vperm.xlu1 %3954, %v351_v0   ;;  %v344_v8 = vld [vmem:[%s7468_s1] sm:$0xff]  ;;  %v510_v10 = vld [vmem:[%s7471_s4 + $0x8] sm:$0xff]  ;;  %v515_v13 = vld [vmem:[%s7471_s4 + $0x30] sm:$0xff]  ;;  %s8061_s24 = smov (!%p313_p4, %s4186_s24), 1 }
   0xf   : > { %369 = vperm.xlu0 %3953, %v347_v1   ;;  %359 = vperm.xlu2 %3956, %v345_v2   ;;  %v348_v9 = vld [vmem:[%s7469_s2] sm:$0xff]  ;;  %v512_v14 = vld [vmem:[%s7471_s4 + $0x18] sm:$0xff]  ;;  %v526_v15 = vld [vmem:[%s7471_s4 + $0x88] sm:$0xff]  ;;  %s3915_s10 = sshll.u32 %s8061_s24, 3 }
  0x10   : > { %v513_v11 = vld [vmem:[%s7471_s4 + $0x20] sm:$0xff]  ;;  %v514_v16 = vld [vmem:[%s7471_s4 + $0x28] sm:$0xff]  ;;  %v511_v19 = vld [vmem:[%s7471_s4 + $0x10] sm:$0xff]  ;;  %s4365_s15 = scalar_lea.vmem %s7467_s0, %s3915_s10  ;;  %s5825_s30 = scalar_lea.vmem %s7473_s6, %s3915_s10 }
  0x11   : > { %v509_v12 = vld [vmem:[%s7471_s4] sm:$0xff]  ;;  %v532_v20 = vld [vmem:[%s7471_s4 + $0xb8] sm:$0xff]  ;;  %v519_v23 = vld [vmem:[%s7471_s4 + $0x50] sm:$0xff]  ;;  %s3917_s10 = sshll.u32 %s8061_s24, 2 }
  0x12   : > { %v529_v17 = vld [vmem:[%s7471_s4 + $0xa0] sm:$0xff]  ;;  %v528_v21 = vld [vmem:[%s7471_s4 + $0x98] sm:$0xff]  ;;  %v531_v24 = vld [vmem:[%s7471_s4 + $0xb0] sm:$0xff]  ;;  %s7113_s9 = scalar_lea.vmem %s7474_s7, %s3917_s10 }
  0x13   : > { %v525_v18 = vld [vmem:[%s7471_s4 + $0x80] sm:$0xff]  ;;  %v516_v22 = vld [vmem:[%s7471_s4 + $0x38] sm:$0xff]  ;;  %v522_v25 = vld [vmem:[%s7471_s4 + $0x68] sm:$0xff] }
  0x14   : > { %v527_v26 = vld [vmem:[%s7471_s4 + $0x90] sm:$0xff]  ;;  %v518_v27 = vld [vmem:[%s7471_s4 + $0x48] sm:$0xff]  ;;  %v533_v28 = vld [vmem:[%s7471_s4 + $0xc0] sm:$0xff] }
  0x15   : > { %v530_v29 = vld [vmem:[%s7471_s4 + $0xa8] sm:$0xff]  ;;  %v521_v30 = vld [vmem:[%s7471_s4 + $0x60] sm:$0xff]  ;;  %v536_v32 = vld [vmem:[%s7471_s4 + $0xd8] sm:$0xff] }
  0x16   : > { %3955 = vset.pattern.permute.xlu1 %v4197_v6  ;;  %v517_v31 = vld [vmem:[%s7471_s4 + $0x40] sm:$0xff]  ;;  %v524_v33 = vld [vmem:[%s7471_s4 + $0x78] sm:$0xff]  ;;  %v539_v36 = vld [vmem:[%s7471_s4 + $0xf0] sm:$0xff] }
  0x17   : > { %364 = vperm.xlu0 %3953, %v346_v4   ;;  %399 = vperm.xlu2 %3956, %v350_v5   ;;  %v520_v34 = vld [vmem:[%s7471_s4 + $0x58] sm:$0xff]  ;;  %v342_v35 = vld [vmem:[%s4365_s15] sm:$0xff]  ;;  %v535_v40 = vld [vmem:[%s7471_s4 + $0xd0] sm:$0xff] }
  0x18   : > { %428 = vperm.xlu1 %3955, %v347_v1   ;;  %v373_v38 = vperm.slane %v342_v35, 0  ;;  %v374_v39 = vperm.slane %v342_v35, 4  ;;  %v523_v43 = vld [vmem:[%s7471_s4 + $0x70] sm:$0xff]  ;;  %v431_v46 = vperm.slane %v342_v35, 1  ;;  %v432_v47 = vperm.slane %v342_v35, 5  ;;  %v542_v48 = vld [vmem:[%s7471_s4 + $0x108] sm:$0xff] }
  0x19   : > { %v538_v55 = vld [vmem:[%s7471_s4 + $0xe8] sm:$0xff]  ;;  %v544_v62 = vld [vmem:[%s7471_s4 + $0x118] sm:$0xff]  ;;  %v541_v5 = vld [vmem:[%s7471_s4 + $0x100] sm:$0xff] }
  0x1a   : > { %v377_v44 = vperm.slane %v373_v38, 0  ;;  %v378_v45 = vperm.slane %v374_v39, 0  ;;  %v435_v51 = vperm.slane %v431_v46, 1  ;;  %v436_v52 = vperm.slane %v432_v47, 1  ;;  %v534_v57 = vld [vmem:[%s7471_s4 + $0xc8] sm:$0xff]  ;;  %v493_v47 = vld [vmem:[%s7470_s3 + $0x100] sm:$0xff] }
  0x1b   : > { %v494_v46 = vld [vmem:[%s7470_s3 + $0x108] sm:$0xff] }
  0x1f   : > { %3957 = vset.pattern.permute.xlu0 %v4197_v6  ;;  %394 = vperm.xlu2 %3956, %v349_v7  }
  0x20   : > { %3958 = vset.pattern.permute.xlu1 %v4196_v3  ;;  %424 = vperm.xlu0 %3957, %v346_v4  }
  0x21   : > { %354 = vperm.xlu1 %3958, %v344_v8  }
  0x27   : > { %389 = vperm.xlu2 %3956, %v348_v9  }
  0x28   : > { %416 = vperm.xlu0 %3957, %v344_v8   ;;  %v537_v8 = vld [vmem:[%s7471_s4 + $0xe0] sm:$0xff] }
  0x29   : > { %3959 = vset.pattern.permute.xlu1 %v4197_v6 }
  0x2a   : > { %420 = vperm.xlu1 %3959, %v345_v2  }
  0x2f   : > { %564 = vperm.xlu2 %3956, %v510_v10  }
  0x30   : > { %3961 = vset.pattern.permute.xlu0 %v4196_v3 }
  0x31   : > { %569 = vperm.xlu0 %3961, %v511_v19  }
  0x32   : > { %3960 = vset.pattern.permute.xlu1 %v4196_v3 }
  0x33   : > { %559 = vperm.xlu1 %3960, %v509_v12  }
  0x37   : > { %579 = vperm.xlu2 %3956, %v513_v11  }
  0x39   : > { %594 = vperm.xlu0 %3961, %v516_v22  }
  0x3b   : > { %574 = vperm.xlu1 %3960, %v512_v14   ;;  %v547_v14 = vld [vmem:[%s7471_s4 + $0x130] sm:$0xff] }
  0x3f   : > { %589 = vperm.xlu2 %3956, %v515_v13  }
  0x41   : > { %649 = vperm.xlu0 %3961, %v527_v26  }
  0x43   : > { %584 = vperm.xlu1 %3960, %v514_v16  }
  0x47   : > { %644 = vperm.xlu2 %3956, %v526_v15  }
  0x49   : > { %664 = vperm.xlu0 %3961, %v530_v29  }
  0x4b   : > { %639 = vperm.xlu1 %3960, %v525_v18  }
  0x4f   : > { %659 = vperm.xlu2 %3956, %v529_v17  }
  0x51   : > { %599 = vperm.xlu0 %3961, %v517_v31   ;;  %v556_v31 = vld [vmem:[%s7471_s4 + $0x178] sm:$0xff] }
  0x53   : > { %654 = vperm.xlu1 %3960, %v528_v21  }
  0x57   : > { %674 = vperm.xlu2 %3956, %v532_v20   ;;  %v543_v20 = vld [vmem:[%s7471_s4 + $0x110] sm:$0xff] }
  0x59   : > { %614 = vperm.xlu0 %3961, %v520_v34  }
  0x5b   : > { %669 = vperm.xlu1 %3960, %v531_v24  }
  0x5f   : > { %609 = vperm.xlu2 %3956, %v519_v23  }
  0x61   : > { %629 = vperm.xlu0 %3961, %v523_v43  }
  0x63   : > { %604 = vperm.xlu1 %3960, %v518_v27  }
  0x67   : > { %624 = vperm.xlu2 %3956, %v522_v25   ;;  %v540_v25 = vld [vmem:[%s7471_s4 + $0xf8] sm:$0xff] }
  0x69   : > { %v360_v37 = vpop.permute.xlu2 %359  ;;  %684 = vperm.xlu0 %3961, %v534_v57   ;;  %v552_v57 = vld [vmem:[%s7471_s4 + $0x158] sm:$0xff] }
  0x6a   : > { %v381_v19 = vmul.f32 %v377_v44, %v360_v37  ;;  %v382_v21 = vmul.f32 %v378_v45, %v360_v37 }
  0x6b   : > { %619 = vperm.xlu1 %3960, %v521_v30  }
  0x6f   : > { %679 = vperm.xlu2 %3956, %v533_v28  }
  0x71   : > { %v400_v53 = vpop.permute.xlu2 %399  ;;  %699 = vperm.xlu0 %3961, %v537_v8   ;;  %v469_v8 = vld [vmem:[%s7470_s3 + $0x40] sm:$0xff] }
  0x73   : > { %634 = vperm.xlu1 %3960, %v524_v33  }
  0x77   : > { %694 = vperm.xlu2 %3956, %v536_v32  }
  0x79   : > { %v395_v6 = vpop.permute.xlu2 %394  ;;  %714 = vperm.xlu0 %3961, %v540_v25   ;;  %v506_v25 = vld [vmem:[%s7470_s3 + $0x168] sm:$0xff] }
  0x7a   : > { %v409_v27 = vadd.f32 %v395_v6, %v381_v19  ;;  %v410_v32 = vadd.f32 %v395_v6, %v382_v21  ;;  %v468_v6 = vld [vmem:[%s7470_s3 + $0x38] sm:$0xff] }
  0x7b   : > { %689 = vperm.xlu1 %3960, %v535_v40   ;;  %v472_v19 = vld [vmem:[%s7470_s3 + $0x58] sm:$0xff] }
  0x7f   : > { %709 = vperm.xlu2 %3956, %v539_v36  }
  0x80   : > { %v405_v41 = vpop.permute.xlu1 %404 }
  0x81   : > { %v370_v42 = vpop.permute.xlu0 %369  ;;  %v390_v28 = vpop.permute.xlu2 %389 }
  0x82   : > { %v385_v49 = vmul.f32 %v377_v44, %v370_v42  ;;  %v386_v50 = vmul.f32 %v378_v45, %v370_v42 }
  0x83   : > { %704 = vperm.xlu1 %3960, %v538_v55   ;;  %v463_v55 = vld [vmem:[%s7470_s3 + $0x10] sm:$0xff] }
  0x84   : > { %v413_v58 = vadd.f32 %v405_v41, %v385_v49  ;;  %v414_v59 = vadd.f32 %v405_v41, %v386_v50  ;;  %v546_v49 = vld [vmem:[%s7471_s4 + $0x128] sm:$0xff]  ;;  %v548_v50 = vld [vmem:[%s7471_s4 + $0x138] sm:$0xff] }
  0x85   : > { %754 = vperm.xlu0 %3961, %v548_v50  }
  0x87   : > { %724 = vperm.xlu2 %3956, %v542_v48   ;;  %v553_v48 = vld [vmem:[%s7471_s4 + $0x160] sm:$0xff] }
  0x89   : > { %v365_v54 = vpop.permute.xlu0 %364 }
  0x8a   : > { %v429_v56 = vpop.permute.xlu1 %428  ;;  %v383_v1 = vmul.f32 %v377_v44, %v365_v54  ;;  %v384_v2 = vmul.f32 %v378_v45, %v365_v54  ;;  %v545_v54 = vld [vmem:[%s7471_s4 + $0x120] sm:$0xff] }
  0x8b   : > { %v443_v60 = vmul.f32 %v435_v51, %v429_v56  ;;  %v444_v61 = vmul.f32 %v436_v52, %v429_v56  ;;  %719 = vperm.xlu1 %3960, %v541_v5   ;;  %v496_v56 = vld [vmem:[%s7470_s3 + $0x118] sm:$0xff] }
  0x8c   : > { %v411_v9 = vadd.f32 %v400_v53, %v383_v1  ;;  %v412_v10 = vadd.f32 %v400_v53, %v384_v2  ;;  %v550_v53 = vld [vmem:[%s7471_s4 + $0x148] sm:$0xff]  ;;  %v500_v5 = vld [vmem:[%s7470_s3 + $0x138] sm:$0xff] }
  0x8d   : > { %v451_v63 = vadd.f32 %v443_v60, %v413_v58  ;;  %v452_v0 = vadd.f32 %v444_v61, %v414_v59  ;;  %739 = vperm.xlu0 %3961, %v545_v54   ;;  %v549_v58 = vld [vmem:[%s7471_s4 + $0x140] sm:$0xff]  ;;  %v464_v59 = vld [vmem:[%s7470_s3 + $0x18] sm:$0xff]  ;;  %v555_v61 = vld [vmem:[%s7471_s4 + $0x170] sm:$0xff] }
  0x8e   : > { %v497_v60 = vld [vmem:[%s7470_s3 + $0x120] sm:$0xff]  ;;  %v554_v1 = vld [vmem:[%s7471_s4 + $0x168] sm:$0xff] }
  0x8f   : > { %734 = vperm.xlu2 %3956, %v544_v62   ;;  %v459_v3 = vmax.f32 %v451_v63, 0.0  ;;  %v460_v4 = vmax.f32 %v452_v0, 0.0  ;;  %v551_v62 = vld [vmem:[%s7471_s4 + $0x150] sm:$0xff]  ;;  %v465_v63 = vld [vmem:[%s7470_s3 + $0x20] sm:$0xff]  ;;  %v498_v0 = vld [vmem:[%s7470_s3 + $0x128] sm:$0xff] }
  0x90   : > { %v466_v2 = vld [vmem:[%s7470_s3 + $0x28] sm:$0xff] }
  0x91   : > { %954 = vmatpush.msra.mxu0 %v459_v3  ;;  %3918 = vmatpush.msra.mxu2 %v459_v3  ;;  %v499_v3 = vld [vmem:[%s7470_s3 + $0x130] sm:$0xff] }
  0x92   : > { %1115 = vmatpush.msra.mxu1 %v460_v4  ;;  %3922 = vmatpush.msra.mxu3 %v460_v4  ;;  %v425_v7 = vpop.permute.xlu0 %424  ;;  %v467_v4 = vld [vmem:[%s7470_s3 + $0x30] sm:$0xff] }
  0x93   : > { %v441_v11 = vmul.f32 %v435_v51, %v425_v7  ;;  %v442_v12 = vmul.f32 %v436_v52, %v425_v7  ;;  %v355_v13 = vpop.permute.xlu1 %354  ;;  %729 = vperm.xlu1 %3960, %v543_v20   ;;  %v501_v7 = vld [vmem:[%s7470_s3 + $0x140] sm:$0xff] }
  0x94   : > { %v379_v22 = vmul.f32 %v377_v44, %v355_v13  ;;  %v380_v23 = vmul.f32 %v378_v45, %v355_v13  ;;  %v461_v45 = vld [vmem:[%s7470_s3] sm:$0xff]  ;;  %v4541_v13 = vpop.permute.xlu2 %564 }
  0x95   : > { %v449_v15 = vadd.f32 %v441_v11, %v411_v9  ;;  %v450_v16 = vadd.f32 %v442_v12, %v412_v10  ;;  %759 = vperm.xlu0 %3961, %v549_v58   ;;  %v502_v9 = vld [vmem:[%s7470_s3 + $0x148] sm:$0xff]  ;;  %v503_v12 = vld [vmem:[%s7470_s3 + $0x150] sm:$0xff]  ;;  %v505_v20 = vld [vmem:[%s7470_s3 + $0x160] sm:$0xff] }
  0x96   : > { %v407_v33 = vadd.f32 %v390_v28, %v379_v22  ;;  %v408_v36 = vadd.f32 %v390_v28, %v380_v23  ;;  %v470_v11 = vld [vmem:[%s7470_s3 + $0x48] sm:$0xff] }
  0x97   : > { %749 = vperm.xlu2 %3956, %v547_v14   ;;  %v457_v17 = vmax.f32 %v449_v15, 0.0  ;;  %v458_v18 = vmax.f32 %v450_v16, 0.0  ;;  %v471_v14 = vld [vmem:[%s7470_s3 + $0x50] sm:$0xff]  ;;  %v504_v15 = vld [vmem:[%s7470_s3 + $0x158] sm:$0xff]  ;;  %v474_v28 = vld [vmem:[%s7470_s3 + $0x68] sm:$0xff] }
  0x99   : > { %955 = vmatpush.msra.mxu0 %v457_v17  ;;  %3919 = vmatpush.msra.mxu2 %v457_v17 }
  0x9a   : > { %1116 = vmatpush.msra.mxu1 %v458_v18  ;;  %3923 = vmatpush.msra.mxu3 %v458_v18  ;;  %v417_v24 = vpop.permute.xlu0 %416 }
  0x9b   : > { %v437_v26 = vmul.f32 %v435_v51, %v417_v24  ;;  %v438_v29 = vmul.f32 %v436_v52, %v417_v24  ;;  %744 = vperm.xlu1 %3960, %v546_v49   ;;  %v473_v24 = vld [vmem:[%s7470_s3 + $0x60] sm:$0xff]  ;;  %v478_v49 = vld [vmem:[%s7470_s3 + $0x88] sm:$0xff] }
  0x9c   : > { %v421_v30 = vpop.permute.xlu1 %420  ;;  %v4555_v17 = vpop.permute.xlu2 %579 }
  0x9d   : > { %v439_v34 = vmul.f32 %v435_v51, %v421_v30  ;;  %v440_v35 = vmul.f32 %v436_v52, %v421_v30  ;;  %v445_v39 = vadd.f32 %v437_v26, %v407_v33  ;;  %v446_v40 = vadd.f32 %v438_v29, %v408_v36  ;;  %v462_v51 = vld [vmem:[%s7470_s3 + $0x8] sm:$0xff]  ;;  %v495_v52 = vld [vmem:[%s7470_s3 + $0x110] sm:$0xff]  ;;  %769 = vperm.xlu0 %3961, %v551_v62   ;;  %v508_v33 = vld [vmem:[%s7470_s3 + $0x178] sm:$0xff] }
  0x9e   : > { %v507_v29 = vld [vmem:[%s7470_s3 + $0x170] sm:$0xff]  ;;  %v476_v36 = vld [vmem:[%s7470_s3 + $0x78] sm:$0xff] }
  0x9f   : > { %794 = vperm.xlu2 %3956, %v556_v31   ;;  %v447_v37 = vadd.f32 %v439_v34, %v409_v27  ;;  %v448_v38 = vadd.f32 %v440_v35, %v410_v32  ;;  %v453_v43 = vmax.f32 %v445_v39, 0.0  ;;  %v454_v44 = vmax.f32 %v446_v40, 0.0  ;;  %v475_v32 = vld [vmem:[%s7470_s3 + $0x70] sm:$0xff] }
  0xa1   : > { %v455_v41 = vmax.f32 %v447_v37, 0.0  ;;  %v456_v42 = vmax.f32 %v448_v38, 0.0 }
  0xa3   : > { %956 = vmatpush.msra.mxu0 %v455_v41  ;;  %3920 = vmatpush.msra.mxu2 %v455_v41  ;;  %v4561_v18 = vpop.permute.xlu0 %569  ;;  %v477_v41 = vld [vmem:[%s7470_s3 + $0x80] sm:$0xff] }
  0xa4   : > { %1117 = vmatpush.msra.mxu1 %v456_v42  ;;  %3924 = vmatpush.msra.mxu3 %v456_v42  ;;  %v4575_v22 = vpop.permute.xlu2 %589 }
  0xa5   : > { %957 = vmatpush.msra.mxu0 %v453_v43  ;;  %3921 = vmatpush.msra.mxu2 %v453_v43  ;;  %v4533_v10 = vpop.permute.xlu1 %559 }
  0xa6   : > { %1118 = vmatpush.msra.mxu1 %v454_v44  ;;  %3925 = vmatpush.msra.mxu3 %v454_v44 }
  0xa7   : > { %3718 = vmatmul.msk.f32.vlgmr.msra.gmra.mxu0 %vm797_vm0, %v461_v45  ;;  %3751 = vmatmul.msk.f32.vlgmr.msra.gmra.mxu2 %vm797_vm0, %v494_v46 }
  0xa8   : > { %3766 = vmatmul.msk.f32.vlgmr.msra.gmra.mxu1 %vm797_vm0, %v461_v45  ;;  %3798 = vmatmul.msk.f32.vlgmr.msra.gmra.mxu3 %vm797_vm0, %v493_v47 }
  0xa9   : > { %779 = vperm.xlu2 %3956, %v553_v48   ;;  %764 = vperm.xlu1 %3960, %v550_v53  }
  0xaa   : > { %784 = vperm.xlu0 %3961, %v554_v1  }
  0xab   : > { %v4577_v23 = vpop.permute.xlu0 %594 }
  0xac   : > { %v4591_v27 = vpop.permute.xlu2 %644 }
  0xad   : > { %v4553_v16 = vpop.permute.xlu1 %574 }
  0xaf   : > { %3719 = vmatmul.msk.f32.gmra.mxu0 %vm797_vm0, %v462_v51  ;;  %3752 = vmatmul.msk.f32.gmra.mxu2 %vm797_vm0, %v495_v52 }
  0xb0   : > { %3767 = vmatmul.msk.f32.gmra.mxu1 %vm797_vm0, %v462_v51  ;;  %3799 = vmatmul.msk.f32.gmra.mxu3 %vm797_vm0, %v494_v46 }
  0xb1   : > { %774 = vperm.xlu1 %3960, %v552_v57  }
  0xb3   : > { %v4599_v30 = vpop.permute.xlu0 %649 }
  0xb4   : > { %v4613_v34 = vpop.permute.xlu2 %659 }
  0xb5   : > { %v4569_v21 = vpop.permute.xlu1 %584 }
  0xb7   : > { %3720 = vmatmul.msk.f32.gmra.mxu0 %vm797_vm0, %v463_v55  ;;  %3753 = vmatmul.msk.f32.gmra.mxu2 %vm797_vm0, %v496_v56 }
  0xb8   : > { %3768 = vmatmul.msk.f32.gmra.mxu1 %vm797_vm0, %v463_v55  ;;  %3800 = vmatmul.msk.f32.gmra.mxu3 %vm797_vm0, %v495_v52 }
  0xb9   : > { %789 = vperm.xlu1 %3960, %v555_v61  }
  0xbb   : > { %v4617_v35 = vpop.permute.xlu0 %664 }
  0xbc   : > { %v4626_v38 = vpop.permute.xlu2 %674 }
  0xbd   : > { %v4589_v26 = vpop.permute.xlu1 %639 }
  0xbf   : > { %3721 = vmatmul.msk.f32.gmra.mxu0 %vm797_vm0, %v464_v59  ;;  %3754 = vmatmul.msk.f32.gmra.mxu2 %vm797_vm0, %v497_v60 }
  0xc0   : > { %3769 = vmatmul.msk.f32.gmra.mxu1 %vm797_vm0, %v464_v59  ;;  %3801 = vmatmul.msk.f32.gmra.mxu3 %vm797_vm0, %v496_v56  ;;  %v479_v56 = vld [vmem:[%s7470_s3 + $0x90] sm:$0xff] }
  0xc3   : > { %v4631_v39 = vpop.permute.xlu0 %599 }
  0xc4   : > { %v4644_v44 = vpop.permute.xlu2 %609 }
  0xc5   : > { %v4605_v31 = vpop.permute.xlu1 %654 }
  0xc7   : > { %3722 = vmatmul.msk.f32.gmra.mxu0 %vm797_vm0, %v465_v63  ;;  %3755 = vmatmul.msk.f32.gmra.mxu2 %vm797_vm0, %v498_v0 }
  0xc8   : > { %3770 = vmatmul.msk.f32.gmra.mxu1 %vm797_vm0, %v465_v63  ;;  %3802 = vmatmul.msk.f32.gmra.mxu3 %vm797_vm0, %v497_v60  ;;  %v480_v63 = vld [vmem:[%s7470_s3 + $0x98] sm:$0xff] }
  0xcb   : > { %v4650_v47 = vpop.permute.xlu0 %614 }
  0xcc   : > { %v4661_v53 = vpop.permute.xlu2 %624 }
  0xcd   : > { %v4624_v37 = vpop.permute.xlu1 %669 }
  0xcf   : > { %3723 = vmatmul.msk.f32.gmra.mxu0 %vm797_vm0, %v466_v2  ;;  %3756 = vmatmul.msk.f32.gmra.mxu2 %vm797_vm0, %v499_v3 }
  0xd0   : > { %3771 = vmatmul.msk.f32.gmra.mxu1 %vm797_vm0, %v466_v2  ;;  %3803 = vmatmul.msk.f32.gmra.mxu3 %vm797_vm0, %v498_v0 }
  0xd3   : > { %v4668_v58 = vpop.permute.xlu0 %629 }
  0xd4   : > { %v4681_v0 = vpop.permute.xlu2 %679 }
  0xd5   : > { %v4640_v43 = vpop.permute.xlu1 %604  ;;  %7658 = vst [vmem:[#allocation8_spill] sm:$0xff] %v4681_v0 }
  0xd7   : > { %3724 = vmatmul.msk.f32.gmra.mxu0 %vm797_vm0, %v467_v4  ;;  %3757 = vmatmul.msk.f32.gmra.mxu2 %vm797_vm0, %v500_v5 }
  0xd8   : > { %3772 = vmatmul.msk.f32.gmra.mxu1 %vm797_vm0, %v467_v4  ;;  %3804 = vmatmul.msk.f32.gmra.mxu3 %vm797_vm0, %v499_v3 }
  0xdb   : > { %v4684_v2 = vpop.permute.xlu0 %684 }
  0xdc   : > { %7659 = vst [vmem:[#allocation9_spill] sm:$0xff] %v4684_v2 }
  0xdd   : > { %v4657_v51 = vpop.permute.xlu1 %619 }
  0xdf   : > { %3725 = vmatmul.msk.f32.gmra.mxu0 %vm797_vm0, %v468_v6  ;;  %3758 = vmatmul.msk.f32.gmra.mxu2 %vm797_vm0, %v501_v7 }
  0xe0   : > { %3773 = vmatmul.msk.f32.gmra.mxu1 %vm797_vm0, %v468_v6  ;;  %3805 = vmatmul.msk.f32.gmra.mxu3 %vm797_vm0, %v500_v5  ;;  %v481_v6 = vld [vmem:[%s7470_s3 + $0xa0] sm:$0xff] }
  0xe5   : > { %v4674_v60 = vpop.permute.xlu1 %634 }
  0xe7   : > { %3726 = vmatmul.msk.f32.gmra.mxu0 %vm797_vm0, %v469_v8  ;;  %3759 = vmatmul.msk.f32.gmra.mxu2 %vm797_vm0, %v502_v9 }
  0xe8   : > { %3774 = vmatmul.msk.f32.gmra.mxu1 %vm797_vm0, %v469_v8  ;;  %3806 = vmatmul.msk.f32.gmra.mxu3 %vm797_vm0, %v501_v7 }
  0xed   : > { %v4694_v7 = vpop.permute.xlu1 %689 }
  0xee   : > { %7662 = vst [vmem:[#allocation12_spill] sm:$0xff] %v4694_v7 }
  0xef   : > { %3727 = vmatmul.msk.f32.gmra.mxu0 %vm797_vm0, %v470_v11  ;;  %3760 = vmatmul.msk.f32.gmra.mxu2 %vm797_vm0, %v503_v12 }
  0xf0   : > { %3775 = vmatmul.msk.f32.gmra.mxu1 %vm797_vm0, %v470_v11  ;;  %3807 = vmatmul.msk.f32.gmra.mxu3 %vm797_vm0, %v502_v9  ;;  %v4696_v9 = vpop.permute.xlu2 %694  ;;  %v4700_v11 = vpop.permute.xlu0 %699 }
  0xf1   : > { %7663 = vst [vmem:[#allocation13_spill] sm:$0xff] %v4696_v9 }
  0xf2   : > { %7664 = vst [vmem:[#allocation14_spill] sm:$0xff] %v4700_v11 }
  0xf7   : > { %3728 = vmatmul.msk.f32.gmra.mxu0 %vm797_vm0, %v471_v14  ;;  %3761 = vmatmul.msk.f32.gmra.mxu2 %vm797_vm0, %v504_v15 }
  0xf8   : > { %3776 = vmatmul.msk.f32.gmra.mxu1 %vm797_vm0, %v471_v14  ;;  %3808 = vmatmul.msk.f32.gmra.mxu3 %vm797_vm0, %v503_v12 }
  0xff   : > { %3729 = vmatmul.msk.f32.gmra.mxu0 %vm797_vm0, %v472_v19  ;;  %3762 = vmatmul.msk.f32.gmra.mxu2 %vm797_vm0, %v505_v20 }
 0x100   : > { %3777 = vmatmul.msk.f32.gmra.mxu1 %vm797_vm0, %v472_v19  ;;  %3809 = vmatmul.msk.f32.gmra.mxu3 %vm797_vm0, %v504_v15  ;;  %v482_v19 = vld [vmem:[%s7470_s3 + $0xa8] sm:$0xff] }
 0x107   : > { %3730 = vmatmul.msk.f32.gmra.mxu0 %vm797_vm0, %v473_v24  ;;  %3763 = vmatmul.msk.f32.gmra.mxu2 %vm797_vm0, %v506_v25 }
 0x108   : > { %3778 = vmatmul.msk.f32.gmra.mxu1 %vm797_vm0, %v473_v24  ;;  %3810 = vmatmul.msk.f32.gmra.mxu3 %vm797_vm0, %v505_v20  ;;  %v4709_v24 = vpop.permute.xlu1 %704 }
 0x109   : > { %7667 = vst [vmem:[#allocation17_spill] sm:$0xff] %v4709_v24 }
 0x10f   : > { %3731 = vmatmul.msk.f32.gmra.mxu0 %vm797_vm0, %v474_v28  ;;  %3764 = vmatmul.msk.f32.gmra.mxu2 %vm797_vm0, %v507_v29 }
 0x110   : > { %3779 = vmatmul.msk.f32.gmra.mxu1 %vm797_vm0, %v474_v28  ;;  %3811 = vmatmul.msk.f32.gmra.mxu3 %vm797_vm0, %v506_v25  ;;  %v4713_v25 = vpop.permute.xlu2 %709 }
 0x111   : > { %7668 = vst [vmem:[#allocation18_spill] sm:$0xff] %v4713_v25 }
 0x117   : > { %3732 = vmatmul.msk.f32.gmra.mxu0 %vm797_vm0, %v475_v32  ;;  %3765 = vmatmul.msk.f32.gmra.mxu2 %vm797_vm0, %v508_v33 }
 0x118   : > { %3780 = vmatmul.msk.f32.gmra.mxu1 %vm797_vm0, %v475_v32  ;;  %3812 = vmatmul.msk.f32.gmra.mxu3 %vm797_vm0, %v507_v29  ;;  %v4719_v32 = vpop.permute.xlu0 %714 }
 0x119   : > { %7671 = vst [vmem:[#allocation21_spill] sm:$0xff] %v4719_v32 }
 0x11f   : > { %3733 = vmatmul.msk.f32.gmra.mxu0 %vm797_vm0, %v476_v36 }
 0x120   : > { %3781 = vmatmul.msk.f32.gmra.mxu1 %vm797_vm0, %v476_v36  ;;  %3813 = vmatmul.msk.f32.gmra.mxu3 %vm797_vm0, %v508_v33  ;;  %v483_v36 = vld [vmem:[%s7470_s3 + $0xb0] sm:$0xff] }
 0x124   : > { %v4633_v40 = vpop.f32.mrf.mxu0 }
 0x125   : > { %v4638_v42 = vpop.f32.mrf.mxu1 }
 0x127   : > { %3734 = vmatmul.msk.f32.gmra.mxu0 %vm797_vm0, %v477_v41 }
 0x128   : > { %3782 = vmatmul.msk.f32.gmra.mxu1 %vm797_vm0, %v477_v41 }
 0x12a   : > { %v4646_v45 = vpop.f32.mrf.mxu2 }
 0x12b   : > { %7652 = vst [vmem:[#allocation2_spill] sm:$0xff] %v4646_v45  ;;  %v4648_v46 = vpop.f32.mrf.mxu3 }
 0x12c   : > { %7653 = vst [vmem:[#allocation3_spill] sm:$0xff] %v4648_v46  ;;  %v962_v48 = vpop.f32.mrf.mxu0 }
 0x12d   : > { %v1123_v50 = vpop.f32.mrf.mxu1 }
 0x12f   : > { %3735 = vmatmul.msk.f32.gmra.mxu0 %vm797_vm0, %v478_v49 }
 0x130   : > { %3783 = vmatmul.msk.f32.gmra.mxu1 %vm797_vm0, %v478_v49 }
 0x132   : > { %v4659_v52 = vpop.f32.mrf.mxu2 }
 0x133   : > { %7654 = vst [vmem:[#allocation4_spill] sm:$0xff] %v4659_v52  ;;  %v4663_v54 = vpop.f32.mrf.mxu3 }
 0x134   : > { %7655 = vst [vmem:[#allocation5_spill] sm:$0xff] %v4663_v54  ;;  %v965_v55 = vpop.f32.mrf.mxu0 }
 0x135   : > { %v1126_v57 = vpop.f32.mrf.mxu1  ;;  %v4725_v49 = vadd.f32 %v965_v55, %v4561_v18  ;;  %v4745_v55 = vadd.f32 %v962_v48, %v4541_v13 }
 0x137   : > { %3736 = vmatmul.msk.f32.gmra.mxu0 %vm797_vm0, %v479_v56 }
 0x138   : > { %3784 = vmatmul.msk.f32.gmra.mxu1 %vm797_vm0, %v479_v56 }
 0x13a   : > { %v4672_v59 = vpop.f32.mrf.mxu2 }
 0x13b   : > { %7656 = vst [vmem:[#allocation6_spill] sm:$0xff] %v4672_v59  ;;  %v4676_v61 = vpop.f32.mrf.mxu3 }
 0x13c   : > { %7657 = vst [vmem:[#allocation7_spill] sm:$0xff] %v4676_v61  ;;  %v968_v62 = vpop.f32.mrf.mxu0 }
 0x13d   : > { %v1129_v1 = vpop.f32.mrf.mxu1  ;;  %v4728_v56 = vadd.f32 %v968_v62, %v4553_v16 }
 0x13f   : > { %3737 = vmatmul.msk.f32.gmra.mxu0 %vm797_vm0, %v480_v63 }
 0x140   : > { %3785 = vmatmul.msk.f32.gmra.mxu1 %vm797_vm0, %v480_v63  ;;  %v4732_v63 = vadd.f32 %v1126_v57, %v4561_v18  ;;  %v4758_v57 = vadd.f32 %v1123_v50, %v4541_v13 }
 0x142   : > { %v4687_v3 = vpop.f32.mrf.mxu2 }
 0x143   : > { %7660 = vst [vmem:[#allocation10_spill] sm:$0xff] %v4687_v3  ;;  %v4689_v4 = vpop.f32.mrf.mxu3 }
 0x144   : > { %7661 = vst [vmem:[#allocation11_spill] sm:$0xff] %v4689_v4  ;;  %v971_v5 = vpop.f32.mrf.mxu0 }
 0x145   : > { %v1132_v8 = vpop.f32.mrf.mxu1  ;;  %v4748_v62 = vadd.f32 %v971_v5, %v4555_v17  ;;  %v4768_v5 = vpop.permute.xlu2 %724 }
 0x146   : > { %7674 = vst [vmem:[#allocation24_spill] sm:$0xff] %v4768_v5 }
 0x147   : > { %3738 = vmatmul.msk.f32.gmra.mxu0 %vm797_vm0, %v481_v6 }
 0x148   : > { %3786 = vmatmul.msk.f32.gmra.mxu1 %vm797_vm0, %v481_v6  ;;  %v4735_v6 = vadd.f32 %v1129_v1, %v4553_v16  ;;  %v4755_v16 = vadd.f32 %v4638_v42, %v4533_v10  ;;  %v4761_v1 = vadd.f32 %v1132_v8, %v4555_v17 }
 0x14a   : > { %v4702_v12 = vpop.f32.mrf.mxu2  ;;  %v1310_v17 = vmax.f32 %v4755_v16, %v4732_v63 }
 0x14b   : > { %7665 = vst [vmem:[#allocation15_spill] sm:$0xff] %v4702_v12  ;;  %v4704_v14 = vpop.f32.mrf.mxu3 }
 0x14c   : > { %7666 = vst [vmem:[#allocation16_spill] sm:$0xff] %v4704_v14  ;;  %v974_v15 = vpop.f32.mrf.mxu0  ;;  %v1312_v14 = vmax.f32 %v1310_v17, %v4761_v1 }
 0x14d   : > { %v1135_v20 = vpop.f32.mrf.mxu1  ;;  %v4751_v18 = vadd.f32 %v974_v15, %v4569_v21 }
 0x14f   : > { %3739 = vmatmul.msk.f32.gmra.mxu0 %vm797_vm0, %v482_v19 }
 0x150   : > { %3787 = vmatmul.msk.f32.gmra.mxu1 %vm797_vm0, %v482_v19  ;;  %v4738_v19 = vpop.permute.xlu1 %719 }
 0x151   : > { %7672 = vst [vmem:[#allocation22_spill] sm:$0xff] %v4738_v19 }
 0x152   : > { %v4715_v28 = vpop.f32.mrf.mxu2 }
 0x153   : > { %7669 = vst [vmem:[#allocation19_spill] sm:$0xff] %v4715_v28  ;;  %v4717_v29 = vpop.f32.mrf.mxu3  ;;  %v4794_v28 = vpop.permute.xlu0 %754 }
 0x154   : > { %7670 = vst [vmem:[#allocation20_spill] sm:$0xff] %v4717_v29  ;;  %v977_v33 = vpop.f32.mrf.mxu0  ;;  %v4742_v29 = vadd.f32 %v4633_v40, %v4533_v10  ;;  %v4764_v40 = vadd.f32 %v1135_v20, %v4569_v21  ;;  %v1298_v10 = vmax.f32 %v4745_v55, %v4728_v56  ;;  %v1311_v21 = vmax.f32 %v4758_v57, %v4735_v6  ;;  %v484_v20 = vld [vmem:[%s7470_s3 + $0xb8] sm:$0xff] }
 0x155   : > { %v1138_v41 = vpop.f32.mrf.mxu1  ;;  %v4775_v42 = vadd.f32 %v977_v33, %v4575_v22  ;;  %7676 = vst [vmem:[#allocation26_spill] sm:$0xff] %v4794_v28 }
 0x156   : > { %v1297_v15 = vmax.f32 %v4742_v29, %v4725_v49  ;;  %v4784_v50 = vadd.f32 %v1138_v41, %v4575_v22  ;;  %v1300_v33 = vmax.f32 %v1298_v10, %v4751_v18  ;;  %v1313_v22 = vmax.f32 %v1311_v21, %v4764_v40 }
 0x157   : > { %3740 = vmatmul.msk.f32.gmra.mxu0 %vm797_vm0, %v483_v36 }
 0x158   : > { %3788 = vmatmul.msk.f32.gmra.mxu1 %vm797_vm0, %v483_v36  ;;  %v1299_v36 = vmax.f32 %v1297_v15, %v4748_v62  ;;  %v1314_v15 = vmax.f32 %v1312_v14, %v4784_v50  ;;  %v4809_v21 = vpop.permute.xlu1 %729  ;;  %v4816_v14 = vpop.permute.xlu2 %734 }
 0x159   : > { %7677 = vst [vmem:[#allocation27_spill] sm:$0xff] %v4809_v21 }
 0x15a   : > { %v4766_v48 = vpop.f32.mrf.mxu2  ;;  %v1301_v12 = vmax.f32 %v1299_v36, %v4775_v42  ;;  %7679 = vst [vmem:[#allocation29_spill] sm:$0xff] %v4816_v14 }
 0x15b   : > { %7673 = vst [vmem:[#allocation23_spill] sm:$0xff] %v4766_v48  ;;  %v4777_v13 = vpop.f32.mrf.mxu3 }
 0x15c   : > { %7675 = vst [vmem:[#allocation25_spill] sm:$0xff] %v4777_v13  ;;  %v980_v8 = vpop.f32.mrf.mxu0 }
 0x15d   : > { %v4792_v13 = vadd.f32 %v980_v8, %v4577_v23  ;;  %v1141_v48 = vpop.f32.mrf.mxu1 }
 0x15e   : > { %v4799_v41 = vadd.f32 %v1141_v48, %v4577_v23 }
 0x15f   : > { %v1302_v4 = vmax.f32 %v1300_v33, %v4792_v13  ;;  %3741 = vmatmul.msk.f32.gmra.mxu0 %vm797_vm0, %v484_v20  ;;  %v485_v33 = vld [vmem:[%s7470_s3 + $0xc0] sm:$0xff] }
 0x160   : > { %v1315_v10 = vmax.f32 %v1313_v22, %v4799_v41  ;;  %3789 = vmatmul.msk.f32.gmra.mxu1 %vm797_vm0, %v484_v20  ;;  %v4824_v45 = vpop.permute.xlu1 %744 }
 0x161   : > { %v1303_v8 = vmax.f32 %v1301_v12, %v1302_v4  ;;  %v4819_v12 = vpop.permute.xlu0 %739  ;;  %7681 = vst [vmem:[#allocation31_spill] sm:$0xff] %v4824_v45 }
 0x162   : > { %v1316_v28 = vmax.f32 %v1314_v15, %v1315_v10  ;;  %v4807_v17 = vpop.f32.mrf.mxu2  ;;  %7680 = vst [vmem:[#allocation30_spill] sm:$0xff] %v4819_v12 }
 0x163   : > { %v1304_v23 = vrot.slane %v1303_v8, 4  ;;  %v4811_v48 = vpop.f32.mrf.mxu3 }
 0x164   : > { %7678 = vst [vmem:[#allocation28_spill] sm:$0xff] %v4811_v48  ;;  %v1317_v36 = vrot.slane %v1316_v28, 4  ;;  %v983_v3 = vpop.f32.mrf.mxu0 }
 0x165   : > { %v1305_v22 = vmax.f32 %v1303_v8, %v1304_v23  ;;  %v1144_v61 = vpop.f32.mrf.mxu1 }
 0x166   : > { %v1318_v20 = vmax.f32 %v1316_v28, %v1317_v36  ;;  %v486_v28 = vld [vmem:[%s7470_s3 + $0xc8] sm:$0xff]  ;;  %v7482_v36 = vlaneseq }
 0x167   : > { %v1306_v4 = vrot.slane %v1305_v22, 2  ;;  %3742 = vmatmul.msk.f32.gmra.mxu0 %vm797_vm0, %v485_v33 }
 0x168   : > { %v1319_v15 = vrot.slane %v1318_v20, 2  ;;  %3790 = vmatmul.msk.f32.gmra.mxu1 %vm797_vm0, %v485_v33  ;;  %v4833_v33 = vpop.permute.xlu2 %749 }
 0x169   : > { %v1307_v10 = vmax.f32 %v1305_v22, %v1306_v4  ;;  %7682 = vst [vmem:[#allocation32_spill] sm:$0xff] %v4833_v33  ;;  %v760_v45 = vpop.permute.xlu0 %759 }
 0x16a   : > { %v1320_v48 = vmax.f32 %v1318_v20, %v1319_v15  ;;  %v4822_v59 = vpop.f32.mrf.mxu2 }
 0x16b   : > { %v1308_v54 = vrot.slane %v1307_v10, 1  ;;  %v4826_v5 = vpop.f32.mrf.mxu3 }
 0x16c   : > { %v1321_v8 = vrot.slane %v1320_v48, 1  ;;  %v986_v23 = vpop.f32.mrf.mxu0 }
 0x16d   : > { %v1309_v12 = vmax.f32 %v1307_v10, %v1308_v54  ;;  %v1147_v14 = vpop.f32.mrf.mxu1  ;;  %v4843_v54 = vshrl.u32 %v7482_v36, 7 }
 0x16e   : > { %v4831_v52 = vmax.f32 %v1320_v48, %v1321_v8 }
 0x16f   : > { %v1323_v22 = vsub.f32 %v4742_v29, %v1309_v12  ;;  %v1325_v20 = vsub.f32 %v4745_v55, %v1309_v12  ;;  %v1327_v4 = vsub.f32 %v4725_v49, %v1309_v12  ;;  %v1329_v15 = vsub.f32 %v4728_v56, %v1309_v12  ;;  %3743 = vmatmul.msk.f32.gmra.mxu0 %vm797_vm0, %v486_v28 }
 0x170   : > { %v1331_v21 = vsub.f32 %v4748_v62, %v1309_v12  ;;  %3791 = vmatmul.msk.f32.gmra.mxu1 %vm797_vm0, %v486_v28  ;;  %7683 = vst [vmem:[#allocation33_spill] sm:$0xff] %v4843_v54  ;;  %v1333_v48 = vsub.f32 %v4751_v18, %v1309_v12  ;;  %v1335_v55 = vsub.f32 %v4775_v42, %v1309_v12  ;;  %v765_v62 = vpop.permute.xlu1 %764  ;;  %vm2108_vm1 = vcmp.lt.s32.totalorder %v4843_v54, 1 }
 0x171   : > { %v1339_v10 = vmul.f32 1.442695, %v1323_v22  ;;  %v1343_v29 = vmul.f32 1.442695, %v1325_v20  ;;  %v1347_v8 = vmul.f32 1.442695, %v1327_v4  ;;  %v4848_v49 = vadd.f32 %v983_v3, %v4631_v39 }
 0x172   : > { %v4851_v56 = vadd.f32 %v1144_v61, %v4631_v39  ;;  %v1085_v33 = vpop.f32.mrf.mxu2  ;;  %v1337_v28 = vsub.f32 %v4792_v13, %v1309_v12  ;;  %v1351_v36 = vmul.f32 1.442695, %v1329_v15  ;;  %v1324_v18 = vsub.f32 %v4755_v16, %v4831_v52  ;;  %v487_v61 = vld [vmem:[%s7470_s3 + $0xd0] sm:$0xff] }
 0x173   : > { %3962 = vpow2.f32 %v1339_v10  ;;  %v1243_v22 = vpop.f32.mrf.mxu3  ;;  %v1355_v20 = vmul.f32 1.442695, %v1331_v21  ;;  %v1326_v42 = vsub.f32 %v4758_v57, %v4831_v52  ;;  %v1328_v3 = vsub.f32 %v4732_v63, %v4831_v52 }
 0x174   : > { %3964 = vpow2.f32 %v1343_v29  ;;  %v989_v39 = vpop.f32.mrf.mxu0  ;;  %v1359_v13 = vmul.f32 1.442695, %v1333_v48  ;;  %v1330_v16 = vsub.f32 %v4735_v6, %v4831_v52  ;;  %v1332_v21 = vsub.f32 %v4761_v1, %v4831_v52 }
 0x175   : > { %v1334_v57 = vsub.f32 %v4764_v40, %v4831_v52  ;;  %v1150_v12 = vpop.f32.mrf.mxu1  ;;  %3966 = vpow2.f32 %v1347_v8  ;;  %v1363_v63 = vmul.f32 1.442695, %v1335_v55  ;;  %v4871_v4 = vadd.f32 %v986_v23, %v4640_v43  ;;  %v770_v8 = vpop.permute.xlu0 %769 }
 0x176   : > { %v4874_v15 = vadd.f32 %v1147_v14, %v4640_v43  ;;  %3968 = vpow2.f32 %v1351_v36  ;;  %v1367_v48 = vmul.f32 1.442695, %v1337_v28  ;;  %v1336_v6 = vsub.f32 %v4784_v50, %v4831_v52  ;;  %v4884_v43 = vpop.permute.xlu2 %794 }
 0x177   : > { %v1341_v10 = vmul.f32 1.442695, %v1324_v18  ;;  %3744 = vmatmul.msk.f32.gmra.mxu0 %vm797_vm0, %v487_v61  ;;  %3970 = vpow2.f32 %v1355_v20  ;;  %v1338_v1 = vsub.f32 %v4799_v41, %v4831_v52  ;;  %v1345_v40 = vmul.f32 1.442695, %v1326_v42  ;;  %7684 = vst [vmem:[#allocation34_spill] sm:$0xff] %v4884_v43 }
 0x178   : > { %v1349_v29 = vmul.f32 1.442695, %v1328_v3  ;;  %3792 = vmatmul.msk.f32.gmra.mxu1 %vm797_vm0, %v487_v61  ;;  %3972 = vpow2.f32 %v1359_v13  ;;  %v1353_v14 = vmul.f32 1.442695, %v1330_v16  ;;  %v1357_v36 = vmul.f32 1.442695, %v1332_v21 }
 0x179   : > { %v4882_v23 = vpop.eup %3962  ;;  %v1361_v55 = vmul.f32 1.442695, %v1334_v57  ;;  %v4889_v28 = vadd.f32 %v4807_v17, %v760_v45  ;;  %v4892_v52 = vadd.f32 %v4822_v59, %v765_v62  ;;  %v4895_v41 = vadd.f32 %v4826_v5, %v760_v45  ;;  %v488_v21 = vld [vmem:[%s7470_s3 + $0xd8] sm:$0xff] }
 0x17a   : > { %v4886_v50 = vpop.eup %3964  ;;  %v4898_v18 = vadd.f32 %v1150_v12, %v4644_v44  ;;  %v1088_v20 = vpop.f32.mrf.mxu2  ;;  %3974 = vpow2.f32 %v1341_v10  ;;  %v4902_v3 = vadd.f32 %v1085_v33, %v770_v8  ;;  %v4904_v61 = vadd.f32 %v1243_v22, %v765_v62 }
 0x17b   : > { %7685 = vst [vmem:[#allocation35_spill] sm:$0xff] %v4889_v28  ;;  %v1371_v42 = vadd.f32 %v4886_v50, %v4882_v23  ;;  %v1246_v17 = vpop.f32.mrf.mxu3  ;;  %v4906_v13 = vpop.eup %3966  ;;  %3976 = vpow2.f32 %v1345_v40  ;;  %v7485_v59 = vrot.slane %v4889_v28, 7  ;;  %v3222_v45 = vrot.slane %v4892_v52, 7 }
 0x17c   : > { %7686 = vst [vmem:[#allocation36_spill] sm:$0xff] %v4892_v52  ;;  %v992_v16 = vpop.f32.mrf.mxu0  ;;  %v4914_v57 = vpop.eup %3968  ;;  %3978 = vpow2.f32 %v1363_v63  ;;  %v1365_v22 = vmul.f32 1.442695, %v1336_v6  ;;  %v3224_v12 = vrot.slane %v4902_v3, 7  ;;  %v3223_v52 = vrot.slane %v4904_v61, 7 }
 0x17d   : > { %7687 = vst [vmem:[#allocation37_spill] sm:$0xff] %v4895_v41  ;;  %v775_v33 = vpop.permute.xlu1 %774  ;;  %v1372_v62 = vadd.f32 %v4906_v13, %v1371_v42  ;;  %v1153_v10 = vpop.f32.mrf.mxu1  ;;  %3980 = vpow2.f32 %v1349_v29  ;;  %v4924_v5 = vsel %vm2108_vm1, %v7485_v59, %v3222_v45  ;;  %v4928_v43 = vadd.f32 %v989_v39, %v4644_v44 }
 0x17e   : > { %7688 = vst [vmem:[#allocation38_spill] sm:$0xff] %v4902_v3  ;;  %v4918_v40 = vpop.eup %3970  ;;  %3982 = vpow2.f32 %v1367_v48  ;;  %v4935_v42 = vsel %vm2108_vm1, %v3222_v45, %v3224_v12  ;;  %v1460_v29 = vmax.f32 %v4851_v56, %v4898_v18  ;;  %v7692_v59 = vrot.slane %v4895_v41, 7 }
 0x17f   : > { %7689 = vst [vmem:[#allocation39_spill] sm:$0xff] %v4904_v61  ;;  %v4930_v63 = vpop.eup %3972  ;;  %v1373_v6 = vadd.f32 %v4914_v57, %v1372_v62  ;;  %3745 = vmatmul.msk.f32.gmra.mxu0 %vm797_vm0, %v488_v21  ;;  %3984 = vpow2.f32 %v1353_v14  ;;  %v4946_v39 = vadd.f32 %v1088_v20, %v775_v33  ;;  %v4948_v48 = vadd.f32 %v1246_v17, %v770_v8 }
 0x180   : > { %7690 = vst [vmem:[#allocation40_spill] sm:$0xff] %v4924_v5  ;;  %v4944_v44 = vsel %vm2108_vm1, %v7692_v59, %v3223_v52  ;;  %3793 = vmatmul.msk.f32.gmra.mxu1 %vm797_vm0, %v488_v21  ;;  %v4951_v45 = vpop.eup %3974  ;;  %3986 = vpow2.f32 %v1357_v36  ;;  %v4955_v61 = vadd.f32 %v992_v16, %v4650_v47  ;;  %v4958_v14 = vadd.f32 %v1153_v10, %v4650_v47 }
 0x181   : > { %7691 = vst [vmem:[#allocation41_spill] sm:$0xff] %v4935_v42  ;;  %v1374_v62 = vadd.f32 %v4918_v40, %v1373_v6  ;;  %v4960_v41 = vpop.eup %3976  ;;  %3988 = vpow2.f32 %v1361_v55  ;;  %v1369_v20 = vmul.f32 1.442695, %v1338_v1  ;;  %v3226_v8 = vrot.slane %v4946_v39, 7  ;;  %v489_v42 = vld [vmem:[%s7470_s3 + $0xe0] sm:$0xff] }
 0x182   : > { %7693 = vst [vmem:[#allocation42_spill] sm:$0xff] %v4944_v44  ;;  %v3225_v17 = vrot.slane %v4948_v48, 7  ;;  %v1091_v59 = vpop.f32.mrf.mxu2  ;;  %v4964_v21 = vpop.eup %3978  ;;  %v1384_v16 = vadd.f32 %v4960_v41, %v4951_v45  ;;  %v1448_v47 = vmax.f32 %v4871_v4, %v4955_v61  ;;  %v1461_v55 = vmax.f32 %v4874_v15, %v4958_v14 }
 0x183   : > { %7694 = vst [vmem:[#allocation43_spill] sm:$0xff] %v4946_v39  ;;  %v780_v44 = vpop.permute.xlu2 %779  ;;  %v1375_v36 = vadd.f32 %v4930_v63, %v1374_v62  ;;  %v1249_v1 = vpop.f32.mrf.mxu3  ;;  %v4977_v6 = vsel %vm2108_vm1, %v3224_v12, %v3226_v8  ;;  %3990 = vpow2.f32 %v1365_v22 }
 0x184   : > { %7695 = vst [vmem:[#allocation44_spill] sm:$0xff] %v4948_v48  ;;  %v4973_v10 = vpop.eup %3980  ;;  %v4981_v48 = vsel %vm2108_vm1, %v3223_v52, %v3225_v17  ;;  %v4983_v62 = vadd.f32 %v1091_v59, %v780_v44  ;;  %v4985_v39 = vadd.f32 %v1249_v1, %v775_v33  ;;  %v995_v3 = vpop.f32.mrf.mxu0  ;;  %3992 = vpow2.f32 %v1369_v20 }
 0x185   : > { %7696 = vst [vmem:[#allocation45_spill] sm:$0xff] %v4977_v6  ;;  %v4990_v5 = vpop.eup %3982  ;;  %v1376_v28 = vadd.f32 %v4964_v21, %v1375_v36  ;;  %v1385_v12 = vadd.f32 %v4973_v10, %v1384_v16  ;;  %v1447_v6 = vmax.f32 %v4848_v49, %v4928_v43  ;;  %v4997_v52 = vadd.f32 %v995_v3, %v4657_v51  ;;  %v1156_v59 = vpop.f32.mrf.mxu1 }
 0x186   : > { %7697 = vst [vmem:[#allocation46_spill] sm:$0xff] %v4981_v48  ;;  %v4999_v33 = vpop.eup %3984  ;;  %v3228_v1 = vrot.slane %v4983_v62, 7  ;;  %v3227_v48 = vrot.slane %v4985_v39, 7  ;;  %v5004_v46 = vadd.f32 %v1156_v59, %v4657_v51  ;;  %v785_v22 = vpop.permute.xlu0 %784 }
 0x187   : > { %7698 = vst [vmem:[#allocation47_spill] sm:$0xff] %v4983_v62  ;;  %v5006_v36 = vpop.eup %3986  ;;  %v1377_v16 = vadd.f32 %v4990_v5, %v1376_v28  ;;  %v1386_v19 = vadd.f32 %v4999_v33, %v1385_v12  ;;  %v5011_v3 = vmax.f32 %v1447_v6, %v4997_v52  ;;  %3746 = vmatmul.msk.f32.gmra.mxu0 %vm797_vm0, %v489_v42 }
 0x188   : > { %7699 = vst [vmem:[#allocation48_spill] sm:$0xff] %v4985_v39  ;;  %v5014_v32 = vpop.eup %3988  ;;  %v5018_v39 = vsel %vm2108_vm1, %v3226_v8, %v3228_v1  ;;  %v5022_v51 = vsel %vm2108_vm1, %v3225_v17, %v3227_v48  ;;  %v5025_v28 = vmax.f32 %v1460_v29, %v5004_v46  ;;  %3794 = vmatmul.msk.f32.gmra.mxu1 %vm797_vm0, %v489_v42  ;;  %v490_v29 = vld [vmem:[%s7470_s3 + $0xe8] sm:$0xff] }
 0x189   : > { %7700 = vst [vmem:[#allocation49_spill] sm:$0xff] %v5018_v39  ;;  %v1378_v6 = vrot.slane %v1377_v16, 4  ;;  %v1387_v12 = vadd.f32 %v5006_v36, %v1386_v19  ;;  %v5032_v39 = vpop.eup %3990 }
 0x18a   : > { %7701 = vst [vmem:[#allocation50_spill] sm:$0xff] %v5022_v51  ;;  %v1094_v59 = vpop.f32.mrf.mxu2 }
 0x18b   : > { %v1379_v62 = vadd.f32 %v1378_v6, %v1377_v16  ;;  %v1388_v20 = vadd.f32 %v5014_v32, %v1387_v12  ;;  %v5030_v25 = vadd.f32 %v1094_v59, %v785_v22  ;;  %v1252_v8 = vpop.f32.mrf.mxu3  ;;  %v5044_v12 = vpop.eup %3992 }
 0x18c   : > { %v5034_v24 = vadd.f32 %v1252_v8, %v780_v44  ;;  %v998_v17 = vpop.f32.mrf.mxu0 }
 0x18d   : > { %7702 = vst [vmem:[#allocation51_spill] sm:$0xff] %v5030_v25  ;;  %v1380_v42 = vrot.slane %v1379_v62, 2  ;;  %v1389_v51 = vadd.f32 %v5032_v39, %v1388_v20  ;;  %v3230_v19 = vrot.slane %v5030_v25, 7  ;;  %v5042_v16 = vadd.f32 %v998_v17, %v4661_v53  ;;  %v1159_v6 = vpop.f32.mrf.mxu1 }
 0x18e   : > { %7703 = vst [vmem:[#allocation52_spill] sm:$0xff] %v5034_v24  ;;  %v3229_v59 = vrot.slane %v5034_v24, 7  ;;  %v5048_v44 = vadd.f32 %v1159_v6, %v4661_v53 }
 0x18f   : > { %v1381_v8 = vadd.f32 %v1380_v42, %v1379_v62  ;;  %v1390_v11 = vadd.f32 %v5044_v12, %v1389_v51  ;;  %v5053_v9 = vsel %vm2108_vm1, %v3228_v1, %v3230_v19  ;;  %v1450_v20 = vmax.f32 %v1448_v47, %v5042_v16  ;;  %3747 = vmatmul.msk.f32.gmra.mxu0 %vm797_vm0, %v490_v29  ;;  %v790_v42 = vpop.permute.xlu1 %789 }
 0x190   : > { %7704 = vst [vmem:[#allocation53_spill] sm:$0xff] %v5053_v9  ;;  %v5059_v17 = vsel %vm2108_vm1, %v3227_v48, %v3229_v59  ;;  %v1463_v24 = vmax.f32 %v1461_v55, %v5048_v44  ;;  %3795 = vmatmul.msk.f32.gmra.mxu1 %vm797_vm0, %v490_v29  ;;  %v491_v48 = vld [vmem:[%s7470_s3 + $0xf0] sm:$0xff] }
 0x191   : > { %7705 = vst [vmem:[#allocation54_spill] sm:$0xff] %v5059_v17  ;;  %v1382_v53 = vrot.slane %v1381_v8, 1  ;;  %v1391_v62 = vrot.slane %v1390_v11, 4 }
 0x192   : > { %v1097_v51 = vpop.f32.mrf.mxu2 }
 0x193   : > { %v1383_v6 = vadd.f32 %v1382_v53, %v1381_v8  ;;  %v1392_v25 = vadd.f32 %v1391_v62, %v1390_v11  ;;  %v5063_v1 = vadd.f32 %v1097_v51, %v790_v42  ;;  %v1255_v9 = vpop.f32.mrf.mxu3 }
 0x194   : > { %v5065_v47 = vadd.f32 %v1255_v9, %v785_v22  ;;  %v1001_v2 = vpop.f32.mrf.mxu0 }
 0x195   : > { %7706 = vst [vmem:[#allocation55_spill] sm:$0xff] %v5063_v1  ;;  %3994 = vrcp.f32 %v1383_v6  ;;  %v1393_v55 = vrot.slane %v1392_v25, 2  ;;  %v7506_v29 = vrot.slane %v5063_v1, 7  ;;  %v5072_v17 = vadd.f32 %v1001_v2, %v4668_v58  ;;  %v1162_v7 = vpop.f32.mrf.mxu1 }
 0x196   : > { %7707 = vst [vmem:[#allocation56_spill] sm:$0xff] %v5065_v47  ;;  %v3231_v11 = vrot.slane %v5065_v47, 7  ;;  %v5076_v8 = vadd.f32 %v1162_v7, %v4668_v58 }
 0x197   : > { %v1394_v9 = vadd.f32 %v1393_v55, %v1392_v25  ;;  %v5082_v22 = vsel %vm2108_vm1, %v3230_v19, %v7506_v29  ;;  %v1451_v53 = vmax.f32 %v5011_v3, %v5072_v17  ;;  %3748 = vmatmul.msk.f32.gmra.mxu0 %vm797_vm0, %v491_v48  ;;  %v492_v3 = vld [vmem:[%s7470_s3 + $0xf8] sm:$0xff] }
 0x198   : > { %7708 = vst [vmem:[#allocation57_spill] sm:$0xff] %v5082_v22  ;;  %v5089_v2 = vsel %vm2108_vm1, %v3229_v59, %v3231_v11  ;;  %v1464_v58 = vmax.f32 %v5025_v28, %v5076_v8  ;;  %3796 = vmatmul.msk.f32.gmra.mxu1 %vm797_vm0, %v491_v48 }
 0x199   : > { %7709 = vst [vmem:[#allocation58_spill] sm:$0xff] %v5089_v2  ;;  %v1395_v7 = vrot.slane %v1394_v9, 1 }
 0x19b   : > { %v5094_v25 = vpop.eup %3994  ;;  %v1396_v62 = vadd.f32 %v1395_v7, %v1394_v9  ;;  %v1258_v19 = vpop.f32.mrf.mxu3 }
 0x19c   : > { %v5096_v51 = vadd.f32 %v1258_v19, %v790_v42  ;;  %v1004_v6 = vpop.f32.mrf.mxu0  ;;  %v1413_v59 = vmul.f32 %v5094_v25, %v4990_v5  ;;  %v1411_v28 = vmul.f32 %v5094_v25, %v4964_v21  ;;  %v1409_v48 = vmul.f32 %v5094_v25, %v4930_v63 }
 0x19d   : > { %3996 = vrcp.f32 %v1396_v62  ;;  %v5108_v55 = vadd.f32 %v1004_v6, %v4674_v60  ;;  %v1165_v42 = vpop.f32.mrf.mxu1  ;;  %v1407_v9 = vmul.f32 %v5094_v25, %v4918_v40 }
 0x19e   : > { %7710 = vst [vmem:[#allocation59_spill] sm:$0xff] %v5096_v51  ;;  %v7507_v7 = vrot.slane %v5096_v51, 7  ;;  %v5114_v19 = vadd.f32 %v1165_v42, %v4674_v60  ;;  %v1429_v5 = vmul.f32 0.936, %v1413_v59  ;;  %v1427_v29 = vmul.f32 0.936, %v1411_v28 }
 0x19f   : > { %v1452_v21 = vmax.f32 %v1450_v20, %v5108_v55  ;;  %3749 = vmatmul.msk.f32.gmra.mxu0 %vm797_vm0, %v492_v3  ;;  %v1425_v63 = vmul.f32 0.936, %v1409_v48  ;;  %v1423_v59 = vmul.f32 0.936, %v1407_v9  ;;  %v1405_v48 = vmul.f32 %v5094_v25, %v4914_v57 }
 0x1a0   : > { %v5122_v62 = vsel %vm2108_vm1, %v3231_v11, %v7507_v7  ;;  %v1465_v40 = vmax.f32 %v1463_v24, %v5114_v19  ;;  %3797 = vmatmul.msk.f32.gmra.mxu1 %vm797_vm0, %v492_v3  ;;  %v5126_v6 = vadd.f32 0.001, %v1429_v5  ;;  %v5129_v20 = vadd.f32 0.001, %v1427_v29 }
 0x1a1   : > { %7711 = vst [vmem:[#allocation60_spill] sm:$0xff] %v5122_v62  ;;  %v1453_v60 = vmax.f32 %v1451_v53, %v1452_v21  ;;  %v5135_v7 = vadd.f32 0.001, %v1425_v63  ;;  %v1403_v29 = vmul.f32 %v5094_v25, %v4906_v13  ;;  %v5150_v21 = vadd.f32 0.001, %v1423_v59  ;;  %v4170_v13 = vld [vmem:[%s7470_s3 + $0x100] sm:$0xff] }
 0x1a2   : > { %7712 = vst [vmem:[#allocation61_spill] sm:$0xff] %v5126_v6  ;;  %v1466_v28 = vmax.f32 %v1464_v58, %v1465_v40  ;;  %1630 = vmatpush.msrb.mxu2 %v5126_v6 }
 0x1a3   : > { %7713 = vst [vmem:[#allocation62_spill] sm:$0xff] %v5129_v20  ;;  %v5133_v42 = vpop.eup %3996  ;;  %v1454_v11 = vrot.slane %v1453_v60, 4 }
 0x1a4   : > { %7714 = vst [vmem:[#allocation63_spill] sm:$0xff] %v5135_v7  ;;  %v1467_v24 = vrot.slane %v1466_v28, 4  ;;  %v1414_v3 = vmul.f32 %v5133_v42, %v5044_v12  ;;  %1631 = vmatpush.msrb.mxu2 %v5129_v20  ;;  %v1412_v53 = vmul.f32 %v5133_v42, %v5032_v39  ;;  %v5142_v58 = vpop.f32.mrf.mxu0  ;;  %v1410_v5 = vmul.f32 %v5133_v42, %v5014_v32 }
 0x1a5   : > { %v1455_v57 = vmax.f32 %v1453_v60, %v1454_v11  ;;  %v5146_v9 = vpop.f32.mrf.mxu1  ;;  %7715 = vst [vmem:[#allocation64_spill] sm:$0xff] %v5150_v21  ;;  %v1408_v12 = vmul.f32 %v5133_v42, %v5006_v36  ;;  %v1421_v39 = vmul.f32 0.936, %v1405_v48  ;;  %v1401_v32 = vmul.f32 %v5094_v25, %v4886_v50 }
 0x1a6   : > { %v1468_v63 = vmax.f32 %v1466_v28, %v1467_v24  ;;  %v1430_v40 = vmul.f32 0.936, %v1414_v3  ;;  %v1428_v47 = vmul.f32 0.936, %v1412_v53  ;;  %1632 = vmatpush.msrb.mxu2 %v5135_v7  ;;  %v1426_v2 = vmul.f32 0.936, %v1410_v5 }
 0x1a7   : > { %v1456_v62 = vrot.slane %v1455_v57, 2  ;;  %3750 = vmatmul.msk.f32.gmra.mxu0 %vm797_vm0, %v4170_v13  ;;  %v1424_v48 = vmul.f32 0.936, %v1408_v12  ;;  %v5167_v24 = vadd.f32 0.001, %v1421_v39  ;;  %v1406_v3 = vmul.f32 %v5133_v42, %v4999_v33 }
 0x1a8   : > { %v1469_v60 = vrot.slane %v1468_v63, 2  ;;  %v5161_v59 = vadd.f32 0.001, %v1430_v40  ;;  %1633 = vmatpush.msrb.mxu2 %v5150_v21  ;;  %v5164_v28 = vadd.f32 0.001, %v1428_v47 }
 0x1a9   : > { %v1457_v36 = vmax.f32 %v1455_v57, %v1456_v62  ;;  %v1419_v53 = vmul.f32 0.936, %v1403_v29  ;;  %v5171_v50 = vadd.f32 0.001, %v1426_v2  ;;  %v1417_v40 = vmul.f32 0.936, %v1401_v32 }
 0x1aa   : > { %7716 = vst [vmem:[#allocation65_spill] sm:$0xff] %v5161_v59  ;;  %v1470_v11 = vmax.f32 %v1468_v63, %v1469_v60  ;;  %1671 = vmatpush.msrb.mxu3 %v5161_v59  ;;  %1634 = vmatpush.msrb.mxu2 %v5167_v24  ;;  %v1422_v47 = vmul.f32 0.936, %v1406_v3  ;;  %v5179_v63 = vadd.f32 0.001, %v1424_v48  ;;  %v1404_v29 = vmul.f32 %v5133_v42, %v4973_v10 }
 0x1ab   : > { %7717 = vst [vmem:[#allocation66_spill] sm:$0xff] %v5164_v28  ;;  %v1458_v5 = vrot.slane %v1457_v36, 1  ;;  %v5175_v62 = vadd.f32 0.001, %v1419_v53  ;;  %v5191_v32 = vadd.f32 0.001, %v1417_v40 }
 0x1ac   : > { %7718 = vst [vmem:[#allocation67_spill] sm:$0xff] %v5171_v50  ;;  %v1471_v13 = vrot.slane %v1470_v11, 1  ;;  %1672 = vmatpush.msrb.mxu3 %v5164_v28  ;;  %v5177_v57 = vpop.f32.mrf.mxu0  ;;  %v5186_v2 = vadd.f32 0.001, %v1422_v47 }
 0x1ad   : > { %v1459_v12 = vmax.f32 %v1457_v36, %v1458_v5  ;;  %7719 = vst [vmem:[#allocation68_spill] sm:$0xff] %v5179_v63  ;;  %v5181_v39 = vpop.f32.mrf.mxu1  ;;  %1635 = vmatpush.msrb.mxu2 %v5175_v62 }
 0x1ae   : > { %v5183_v33 = vmax.f32 %v1470_v11, %v1471_v13  ;;  %1673 = vmatpush.msrb.mxu3 %v5171_v50  ;;  %7720 = vst [vmem:[#allocation69_spill] sm:$0xff] %v5186_v2 }
 0x1af   : > { %v1473_v60 = vsub.f32 %v4848_v49, %v1459_v12  ;;  %v1475_v36 = vsub.f32 %v4871_v4, %v1459_v12  ;;  %v1477_v48 = vsub.f32 %v4928_v43, %v1459_v12  ;;  %v1479_v11 = vsub.f32 %v4955_v61, %v1459_v12  ;;  %1636 = vmatpush.msrb.mxu2 %v5191_v32 }
 0x1b0   : > { %v1481_v3 = vsub.f32 %v4997_v52, %v1459_v12  ;;  %v1483_v53 = vsub.f32 %v5042_v16, %v1459_v12  ;;  %v1485_v5 = vsub.f32 %v5072_v17, %v1459_v12  ;;  %v1487_v13 = vsub.f32 %v5108_v55, %v1459_v12  ;;  %1674 = vmatpush.msrb.mxu3 %v5179_v63 }
 0x1b1   : > { %v1489_v10 = vmul.f32 1.442695, %v1473_v60  ;;  %v1493_v40 = vmul.f32 1.442695, %v1475_v36  ;;  %v1474_v49 = vsub.f32 %v4851_v56, %v5183_v33  ;;  %v1497_v4 = vmul.f32 1.442695, %v1477_v48 }
 0x1b2   : > { %v1476_v43 = vsub.f32 %v4874_v15, %v5183_v33  ;;  %1675 = vmatpush.msrb.mxu3 %v5186_v2  ;;  %v1402_v61 = vmul.f32 %v5133_v42, %v4960_v41  ;;  %v1399_v52 = vmul.f32 %v5094_v25, %v4882_v23  ;;  %v1501_v16 = vmul.f32 1.442695, %v1479_v11  ;;  %v7742_v2 = vld [vmem:[#allocation21_spill] sm:$0xff] }
 0x1b3   : > { %3998 = vpow2.f32 %v1489_v10  ;;  %v1478_v17 = vsub.f32 %v4898_v18, %v5183_v33  ;;  %v1420_v56 = vmul.f32 0.936, %v1404_v29  ;;  %v1480_v55 = vsub.f32 %v4958_v14, %v5183_v33 }
 0x1b4   : > { %4000 = vpow2.f32 %v1493_v40  ;;  %v1482_v15 = vsub.f32 %v5004_v46, %v5183_v33  ;;  %v1484_v47 = vsub.f32 %v5048_v44, %v5183_v33  ;;  %v5220_v41 = vpop.f32.mrf.mxu0  ;;  %v1505_v12 = vmul.f32 1.442695, %v1481_v3 }
 0x1b5   : > { %v1486_v23 = vsub.f32 %v5076_v8, %v5183_v33  ;;  %v1488_v18 = vsub.f32 %v5114_v19, %v5183_v33  ;;  %v1400_v25 = vmul.f32 %v5133_v42, %v4951_v45  ;;  %v5228_v29 = vpop.f32.mrf.mxu1  ;;  %4002 = vpow2.f32 %v1497_v4 }
 0x1b6   : > { %v1509_v14 = vmul.f32 1.442695, %v1483_v53  ;;  %v1418_v46 = vmul.f32 0.936, %v1402_v61  ;;  %v1491_v60 = vmul.f32 1.442695, %v1474_v49  ;;  %4004 = vpow2.f32 %v1501_v16 }
 0x1b7   : > { %v1495_v44 = vmul.f32 1.442695, %v1476_v43  ;;  %v5230_v36 = vadd.f32 0.001, %v1420_v56  ;;  %4006 = vpow2.f32 %v1505_v12  ;;  %v1513_v8 = vmul.f32 1.442695, %v1485_v5 }
 0x1b8   : > { %v1415_v11 = vmul.f32 0.936, %v1399_v52  ;;  %v1416_v3 = vmul.f32 0.936, %v1400_v25  ;;  %4008 = vpow2.f32 %v1509_v14  ;;  %v1517_v45 = vmul.f32 1.442695, %v1487_v13 }
 0x1b9   : > { %7721 = vst [vmem:[#allocation70_spill] sm:$0xff] %v5230_v36  ;;  %v5232_v48 = vpop.eup %3998  ;;  %v1499_v42 = vmul.f32 1.442695, %v1478_v17  ;;  %1676 = vmatpush.msrb.mxu3 %v5230_v36  ;;  %v5237_v33 = vadd.f32 0.001, %v1418_v46  ;;  %4010 = vpow2.f32 %v1491_v60  ;;  %v5246_v5 = vld [vmem:[%s7472_s5] sm:$0xff]  ;;  %v5328_v20 = vadd.f32 %v5220_v41, %v4599_v30 }
 0x1ba   : > { %v5234_v19 = vpop.eup %4000  ;;  %v5241_v10 = vadd.f32 0.001, %v1415_v11  ;;  %4012 = vpow2.f32 %v1495_v44  ;;  %v1503_v13 = vmul.f32 1.442695, %v1480_v55  ;;  %v5251_v49 = vadd.f32 0.001, %v1416_v3 }
 0x1bb   : > { %7722 = vst [vmem:[#allocation71_spill] sm:$0xff] %v5237_v33  ;;  %v1521_v53 = vadd.f32 %v5234_v19, %v5232_v48  ;;  %v5248_v40 = vpop.eup %4002  ;;  %1677 = vmatpush.msrb.mxu3 %v5237_v33  ;;  %4014 = vpow2.f32 %v1513_v8  ;;  %v1507_v16 = vmul.f32 1.442695, %v1482_v15  ;;  %v1511_v12 = vmul.f32 1.442695, %v1484_v47  ;;  %v5284_v11 = vld [vmem:[%s7472_s5 + $0x8] sm:$0xff] }
 0x1bc   : > { %7723 = vst [vmem:[#allocation72_spill] sm:$0xff] %v5251_v49  ;;  %v5253_v4 = vpop.f32.mrf.mxu0  ;;  %1637 = vmatpush.msrb.mxu2 %v5241_v10  ;;  %v5259_v52 = vpop.eup %4004  ;;  %4016 = vpow2.f32 %v1499_v42  ;;  %v1515_v46 = vmul.f32 1.442695, %v1486_v23  ;;  %v1519_v3 = vmul.f32 1.442695, %v1488_v18 }
 0x1bd   : > { %v1522_v43 = vadd.f32 %v5248_v40, %v1521_v53  ;;  %v5257_v61 = vpop.f32.mrf.mxu1  ;;  %1678 = vmatpush.msrb.mxu3 %v5251_v49  ;;  %3814 = vmatmul.msk.f32.vlgmr.msrb.gmra.mxu2 %vm1597_vm2, %v5246_v5  ;;  %v5264_v17 = vpop.eup %4006  ;;  %4018 = vpow2.f32 %v1517_v45 }
 0x1be   : > { %3822 = vmatmul.msk.f32.vlgmr.msrb.gmra.mxu3 %vm1597_vm2, %v5246_v5  ;;  %v5269_v55 = vpop.eup %4008  ;;  %4020 = vpow2.f32 %v1503_v13  ;;  %v5344_v41 = vadd.f32 %v5257_v61, %v4605_v31 }
 0x1bf   : > { %v1523_v56 = vadd.f32 %v5259_v52, %v1522_v43  ;;  %v5271_v25 = vpop.eup %4010  ;;  %4022 = vpow2.f32 %v1507_v16 }
 0x1c0   : > { %v5274_v14 = vpop.eup %4012  ;;  %4024 = vpow2.f32 %v1511_v12 }
 0x1c1   : > { %v1524_v15 = vadd.f32 %v5264_v17, %v1523_v56  ;;  %v5276_v60 = vpop.eup %4014  ;;  %v1534_v8 = vadd.f32 %v5274_v14, %v5271_v25  ;;  %4026 = vpow2.f32 %v1515_v46 }
 0x1c2   : > { %v5286_v47 = vpop.eup %4016  ;;  %4028 = vpow2.f32 %v1519_v3 }
 0x1c3   : > { %v1525_v44 = vadd.f32 %v5269_v55, %v1524_v15  ;;  %v5288_v42 = vpop.eup %4018  ;;  %v1535_v53 = vadd.f32 %v5286_v47, %v1534_v8 }
 0x1c4   : > { %v1019_v45 = vpop.f32.mrf.mxu0  ;;  %v5292_v43 = vpop.eup %4020 }
 0x1c5   : > { %v1526_v23 = vadd.f32 %v5276_v60, %v1525_v44  ;;  %v1180_v13 = vpop.f32.mrf.mxu1  ;;  %3815 = vmatmul.msk.f32.gmra.mxu2 %vm1597_vm2, %v5284_v11  ;;  %v1536_v56 = vadd.f32 %v5292_v43, %v1535_v53  ;;  %v5300_v18 = vpop.eup %4022 }
 0x1c6   : > { %3823 = vmatmul.msk.f32.gmra.mxu3 %vm1597_vm2, %v5284_v11  ;;  %v5303_v44 = vpop.eup %4024 }
 0x1c7   : > { %v1527_v16 = vadd.f32 %v5288_v42, %v1526_v23  ;;  %v1537_v15 = vadd.f32 %v5300_v18, %v1536_v56  ;;  %v5309_v23 = vld [vmem:[%s7472_s5 + $0x10] sm:$0xff]  ;;  %v5311_v53 = vpop.eup %4026 }
 0x1c8   : > { %v5314_v59 = vpop.eup %4028 }
 0x1c9   : > { %v1528_v12 = vrot.slane %v1527_v16, 4  ;;  %v1538_v46 = vadd.f32 %v5303_v44, %v1537_v15 }
 0x1cb   : > { %v1529_v8 = vadd.f32 %v1528_v12, %v1527_v16  ;;  %v1539_v1 = vadd.f32 %v5311_v53, %v1538_v46  ;;  %v5324_v46 = vld [vmem:[%s7472_s5 + $0x18] sm:$0xff] }
 0x1cc   : > { %v1022_v51 = vpop.f32.mrf.mxu0 }
 0x1cd   : > { %v1530_v22 = vrot.slane %v1529_v8, 2  ;;  %v1183_v3 = vpop.f32.mrf.mxu1  ;;  %3816 = vmatmul.msk.f32.gmra.mxu2 %vm1597_vm2, %v5309_v23  ;;  %v1540_v56 = vadd.f32 %v5314_v59, %v1539_v1  ;;  %v5332_v1 = vadd.f32 %v5228_v29, %v4599_v30  ;;  %v5353_v29 = vadd.f32 %v5146_v9, %v4589_v26 }
 0x1ce   : > { %3824 = vmatmul.msk.f32.gmra.mxu3 %vm1597_vm2, %v5309_v23 }
 0x1cf   : > { %v1531_v16 = vadd.f32 %v1530_v22, %v1529_v8  ;;  %v1541_v15 = vrot.slane %v1540_v56, 4  ;;  %v5336_v8 = vadd.f32 %v5253_v4, %v4605_v31  ;;  %v5357_v4 = vadd.f32 %v5177_v57, %v4591_v27 }
 0x1d0   : > { %v5362_v31 = vadd.f32 %v1022_v51, %v4617_v35 }
 0x1d1   : > { %v1532_v12 = vrot.slane %v1531_v16, 1  ;;  %v1542_v28 = vadd.f32 %v1541_v15, %v1540_v56  ;;  %v5340_v56 = vadd.f32 %v5142_v58, %v4589_v26  ;;  %v5366_v58 = vadd.f32 %v5181_v39, %v4591_v27 }
 0x1d2   : > { %v2463_v26 = vmax.f32 %v5353_v29, %v5332_v1  ;;  %v2451_v9 = vmax.f32 %v5357_v4, %v5336_v8  ;;  %v5381_v27 = vadd.f32 %v1183_v3, %v4617_v35 }
 0x1d3   : > { %v1533_v6 = vadd.f32 %v1532_v12, %v1531_v16  ;;  %v1543_v22 = vrot.slane %v1542_v28, 2  ;;  %v2464_v57 = vmax.f32 %v5366_v58, %v5344_v41 }
 0x1d4   : > { %v1025_v50 = vpop.f32.mrf.mxu0  ;;  %v2453_v15 = vmax.f32 %v2451_v9, %v5362_v31 }
 0x1d5   : > { %4030 = vrcp.f32 %v1533_v6  ;;  %v1186_v16 = vpop.f32.mrf.mxu1  ;;  %v5347_v6 = vadd.f32 %v1019_v45, %v4613_v34  ;;  %3817 = vmatmul.msk.f32.gmra.mxu2 %vm1597_vm2, %v5324_v46  ;;  %v1544_v30 = vadd.f32 %v1543_v22, %v1542_v28  ;;  %v2450_v28 = vmax.f32 %v5340_v56, %v5328_v20  ;;  %v5387_v22 = vld [vmem:[%s7472_s5 + $0x20] sm:$0xff] }
 0x1d6   : > { %3825 = vmatmul.msk.f32.gmra.mxu3 %vm1597_vm2, %v5324_v46  ;;  %v5378_v45 = vadd.f32 %v1180_v13, %v4613_v34  ;;  %v5390_v7 = vadd.f32 %v1025_v50, %v4624_v37 }
 0x1d7   : > { %v1545_v61 = vrot.slane %v1544_v30, 1  ;;  %v2452_v51 = vmax.f32 %v2450_v28, %v5347_v6  ;;  %v5393_v28 = vadd.f32 %v1186_v16, %v4624_v37  ;;  %v2466_v16 = vmax.f32 %v2464_v57, %v5381_v27 }
 0x1d9   : > { %v1546_v12 = vadd.f32 %v1545_v61, %v1544_v30 }
 0x1db   : > { %v4031_v39 = vpop.eup %4030  ;;  %4032 = vrcp.f32 %v1546_v12 }
 0x1dc   : > { %v5396_v34 = vmul.f32 %v4031_v39, %v5288_v42  ;;  %v1028_v35 = vpop.f32.mrf.mxu0  ;;  %v5399_v13 = vmul.f32 %v4031_v39, %v5232_v48  ;;  %v5402_v3 = vmul.f32 %v4031_v39, %v5234_v19  ;;  %v5405_v30 = vmul.f32 %v4031_v39, %v5248_v40 }
 0x1dd   : > { %v5408_v50 = vadd.f32 %v1028_v35, %v4626_v38  ;;  %v1189_v61 = vpop.f32.mrf.mxu1  ;;  %v5411_v37 = vmul.f32 %v4031_v39, %v5259_v52  ;;  %v5414_v42 = vmul.f32 %v4031_v39, %v5264_v17  ;;  %v2465_v48 = vmax.f32 %v2463_v26, %v5378_v45  ;;  %3818 = vmatmul.msk.f32.gmra.mxu2 %vm1597_vm2, %v5387_v22 }
 0x1de   : > { %7724 = vst [vmem:[#allocation73_spill] sm:$0xff] %v5396_v34  ;;  %v5421_v19 = vadd.f32 %v1189_v61, %v4626_v38  ;;  %3826 = vmatmul.msk.f32.gmra.mxu3 %vm1597_vm2, %v5387_v22  ;;  %v2454_v40 = vmax.f32 %v2452_v51, %v5390_v7  ;;  %v5428_v17 = vmul.f32 %v4031_v39, %v5269_v55  ;;  %v5438_v61 = vld [vmem:[%s7472_s5 + $0x28] sm:$0xff] }
 0x1df   : > { %7725 = vst [vmem:[#allocation74_spill] sm:$0xff] %v5411_v37  ;;  %v2455_v52 = vmax.f32 %v2453_v15, %v5408_v50  ;;  %v2467_v26 = vmax.f32 %v2465_v48, %v5393_v28  ;;  %v5433_v35 = vmul.f32 %v4031_v39, %v5276_v60 }
 0x1e0   : > { %7726 = vst [vmem:[#allocation75_spill] sm:$0xff] %v5414_v42  ;;  %v2468_v9 = vmax.f32 %v2466_v16, %v5421_v19 }
 0x1e1   : > { %7727 = vst [vmem:[#allocation76_spill] sm:$0xff] %v5428_v17  ;;  %v2456_v57 = vmax.f32 %v2454_v40, %v2455_v52  ;;  %v4033_v38 = vpop.eup %4032 }
 0x1e2   : > { %v2469_v12 = vmax.f32 %v2467_v26, %v2468_v9  ;;  %7728 = vst [vmem:[#allocation77_spill] sm:$0xff] %v5433_v35  ;;  %v5441_v15 = vmul.f32 %v4033_v38, %v5314_v59  ;;  %v5444_v48 = vmul.f32 %v4033_v38, %v5271_v25  ;;  %v5447_v16 = vmul.f32 %v4033_v38, %v5274_v14 }
 0x1e3   : > { %v2457_v51 = vrot.slane %v2456_v57, 4  ;;  %v5450_v39 = vmul.f32 %v4033_v38, %v5286_v47  ;;  %v5453_v40 = vmul.f32 %v4033_v38, %v5292_v43  ;;  %v5460_v25 = vmul.f32 %v4033_v38, %v5300_v18 }
 0x1e4   : > { %7729 = vst [vmem:[#allocation78_spill] sm:$0xff] %v5441_v15  ;;  %v2470_v55 = vrot.slane %v2469_v12, 4  ;;  %v1031_v34 = vpop.f32.mrf.mxu0  ;;  %v5463_v26 = vmul.f32 %v4033_v38, %v5303_v44  ;;  %v5466_v43 = vmul.f32 %v4033_v38, %v5311_v53 }
 0x1e5   : > { %v2458_v60 = vmax.f32 %v2456_v57, %v2457_v51  ;;  %7730 = vst [vmem:[#allocation79_spill] sm:$0xff] %v5453_v40  ;;  %3819 = vmatmul.msk.f32.gmra.mxu2 %vm1597_vm2, %v5438_v61 }
 0x1e6   : > { %v2471_v59 = vmax.f32 %v2469_v12, %v2470_v55  ;;  %3827 = vmatmul.msk.f32.gmra.mxu3 %vm1597_vm2, %v5438_v61  ;;  %7731 = vst [vmem:[#allocation80_spill] sm:$0xff] %v5460_v25  ;;  %v5471_v12 = vld [vmem:[%s7472_s5 + $0x30] sm:$0xff] }
 0x1e7   : > { %v2459_v52 = vrot.slane %v2458_v60, 2  ;;  %7732 = vst [vmem:[#allocation81_spill] sm:$0xff] %v5463_v26 }
 0x1e8   : > { %v2472_v14 = vrot.slane %v2471_v59, 2  ;;  %7733 = vst [vmem:[#allocation82_spill] sm:$0xff] %v5466_v43 }
 0x1e9   : > { %v2460_v47 = vmax.f32 %v2458_v60, %v2459_v52  ;;  %7734 = vst [vmem:[#allocation83_spill] sm:$0xff] %v5471_v12 }
 0x1ea   : > { %v2473_v9 = vmax.f32 %v2471_v59, %v2472_v14 }
 0x1eb   : > { %v2461_v57 = vrot.slane %v2460_v47, 1 }
 0x1ec   : > { %v2474_v51 = vrot.slane %v2473_v9, 1  ;;  %v1034_v55 = vpop.f32.mrf.mxu0 }
 0x1ed   : > { %v2462_v15 = vmax.f32 %v2460_v47, %v2461_v57  ;;  %3820 = vmatmul.msk.f32.gmra.mxu2 %vm1597_vm2, %v5471_v12 }
 0x1ee   : > { %v5478_v53 = vmax.f32 %v2473_v9, %v2474_v51  ;;  %3828 = vmatmul.msk.f32.gmra.mxu3 %vm1597_vm2, %v5471_v12 }
 0x1ef   : > { %v2476_v18 = vsub.f32 %v5340_v56, %v2462_v15  ;;  %v2478_v44 = vsub.f32 %v5357_v4, %v2462_v15  ;;  %v2480_v60 = vsub.f32 %v5328_v20, %v2462_v15  ;;  %v2482_v38 = vsub.f32 %v5336_v8, %v2462_v15  ;;  %v5490_v20 = vld [vmem:[%s7472_s5 + $0x38] sm:$0xff] }
 0x1f0   : > { %v2484_v59 = vsub.f32 %v5347_v6, %v2462_v15  ;;  %v2486_v47 = vsub.f32 %v5362_v31, %v2462_v15  ;;  %v2477_v56 = vsub.f32 %v5353_v29, %v5478_v53  ;;  %7735 = vst [vmem:[#allocation84_spill] sm:$0xff] %v5490_v20  ;;  %v2479_v8 = vsub.f32 %v5366_v58, %v5478_v53 }
 0x1f1   : > { %v2492_v52 = vmul.f32 1.442695, %v2476_v18  ;;  %v2496_v14 = vmul.f32 1.442695, %v2478_v44  ;;  %v2500_v57 = vmul.f32 1.442695, %v2480_v60  ;;  %v2488_v9 = vsub.f32 %v5390_v7, %v2462_v15 }
 0x1f2   : > { %v2504_v4 = vmul.f32 1.442695, %v2482_v38  ;;  %v2508_v51 = vmul.f32 1.442695, %v2484_v59  ;;  %v2512_v31 = vmul.f32 1.442695, %v2486_v47  ;;  %v2481_v18 = vsub.f32 %v5332_v1, %v5478_v53 }
 0x1f3   : > { %4034 = vpow2.f32 %v2492_v52  ;;  %v2490_v29 = vsub.f32 %v5408_v50, %v2462_v15  ;;  %v2494_v44 = vmul.f32 1.442695, %v2477_v56  ;;  %v5501_v60 = vadd.f32 %v1031_v34, %v4681_v0  ;;  %v7736_v38 = vld [vmem:[#allocation12_spill] sm:$0xff] }
 0x1f4   : > { %4036 = vpow2.f32 %v2496_v14  ;;  %v1037_v6 = vpop.f32.mrf.mxu0  ;;  %v2483_v7 = vsub.f32 %v5344_v41, %v5478_v53  ;;  %v2498_v58 = vmul.f32 1.442695, %v2479_v8  ;;  %v2516_v52 = vmul.f32 1.442695, %v2488_v9 }
 0x1f5   : > { %4038 = vpow2.f32 %v2500_v57  ;;  %3821 = vmatmul.msk.f32.gmra.mxu2 %vm1597_vm2, %v5490_v20  ;;  %v5508_v59 = vadd.f32 %v1037_v6, %v7736_v38  ;;  %v2485_v34 = vsub.f32 %v5378_v45, %v5478_v53  ;;  %v2502_v15 = vmul.f32 1.442695, %v2481_v18  ;;  %v7737_v6 = vld [vmem:[#allocation9_spill] sm:$0xff]  ;;  %v7739_v38 = vld [vmem:[#allocation14_spill] sm:$0xff] }
 0x1f6   : > { %3829 = vmatmul.msk.f32.gmra.mxu3 %vm1597_vm2, %v5490_v20  ;;  %4040 = vpow2.f32 %v2504_v4  ;;  %v2520_v47 = vmul.f32 1.442695, %v2490_v29  ;;  %v2487_v56 = vsub.f32 %v5381_v27, %v5478_v53  ;;  %v2506_v4 = vmul.f32 1.442695, %v2483_v7 }
 0x1f7   : > { %4042 = vpow2.f32 %v2508_v51  ;;  %v2600_v14 = vmax.f32 %v5501_v60, %v5508_v59  ;;  %v5526_v9 = vadd.f32 %v1034_v55, %v7737_v6  ;;  %v7738_v51 = vld [vmem:[#allocation13_spill] sm:$0xff]  ;;  %v2489_v29 = vsub.f32 %v5393_v28, %v5478_v53 }
 0x1f8   : > { %4044 = vpow2.f32 %v2512_v31 }
 0x1f9   : > { %v5510_v1 = vpop.eup %4034  ;;  %4046 = vpow2.f32 %v2494_v44  ;;  %v2510_v44 = vmul.f32 1.442695, %v2485_v34  ;;  %v2518_v34 = vmul.f32 1.442695, %v2489_v29 }
 0x1fa   : > { %v5512_v50 = vpop.eup %4036  ;;  %4048 = vpow2.f32 %v2498_v58 }
 0x1fb   : > { %v2524_v41 = vadd.f32 %v5512_v50, %v5510_v1  ;;  %v5520_v57 = vpop.eup %4038  ;;  %4050 = vpow2.f32 %v2516_v52  ;;  %v2491_v52 = vsub.f32 %v5421_v19, %v5478_v53 }
 0x1fc   : > { %v1040_v8 = vpop.f32.mrf.mxu0  ;;  %v5531_v18 = vpop.eup %4040  ;;  %4052 = vpow2.f32 %v2502_v15 }
 0x1fd   : > { %v2525_v45 = vadd.f32 %v5520_v57, %v2524_v41  ;;  %v5529_v31 = vadd.f32 %v1040_v8, %v7738_v51  ;;  %v5535_v27 = vpop.eup %4042  ;;  %4054 = vpow2.f32 %v2520_v47  ;;  %v2514_v41 = vmul.f32 1.442695, %v2487_v56 }
 0x1fe   : > { %v4045_v55 = vpop.eup %4044  ;;  %4056 = vpow2.f32 %v2506_v4  ;;  %v2522_v51 = vmul.f32 1.442695, %v2491_v52 }
 0x1ff   : > { %v2526_v7 = vadd.f32 %v5531_v18, %v2525_v45  ;;  %v2601_v58 = vmax.f32 %v5526_v9, %v5529_v31  ;;  %v5542_v8 = vpop.eup %4046  ;;  %4058 = vpow2.f32 %v2510_v44 }
 0x200   : > { %v5545_v15 = vpop.eup %4048  ;;  %4060 = vpow2.f32 %v2514_v41 }
 0x201   : > { %v2527_v28 = vadd.f32 %v5535_v27, %v2526_v7  ;;  %v4051_v47 = vpop.eup %4050  ;;  %v2537_v45 = vadd.f32 %v5545_v15, %v5542_v8  ;;  %4062 = vpow2.f32 %v2518_v34 }
 0x202   : > { %v5549_v0 = vpop.eup %4052  ;;  %4064 = vpow2.f32 %v2522_v51 }
 0x203   : > { %v2528_v6 = vadd.f32 %v4045_v55, %v2527_v28  ;;  %v4055_v53 = vpop.eup %4054  ;;  %v2538_v4 = vadd.f32 %v5549_v0, %v2537_v45 }
 0x204   : > { %v1043_v19 = vpop.f32.mrf.mxu0  ;;  %v5555_v43 = vpop.eup %4056 }
 0x205   : > { %v2529_v56 = vadd.f32 %v4051_v47, %v2528_v6  ;;  %v5553_v7 = vadd.f32 %v1043_v19, %v7739_v38  ;;  %v2539_v44 = vadd.f32 %v5555_v43, %v2538_v4  ;;  %v4059_v35 = vpop.eup %4058  ;;  %v7740_v38 = vld [vmem:[#allocation17_spill] sm:$0xff] }
 0x206   : > { %v4061_v26 = vpop.eup %4060 }
 0x207   : > { %v2530_v29 = vadd.f32 %v4055_v53, %v2529_v56  ;;  %v2602_v28 = vmax.f32 %v2600_v14, %v5553_v7  ;;  %v2540_v52 = vadd.f32 %v4059_v35, %v2539_v44  ;;  %v4063_v20 = vpop.eup %4062 }
 0x208   : > { %v4065_v34 = vpop.eup %4064 }
 0x209   : > { %v2531_v41 = vrot.slane %v2530_v29, 4  ;;  %v2541_v6 = vadd.f32 %v4061_v26, %v2540_v52 }
 0x20b   : > { %v2532_v17 = vadd.f32 %v2531_v41, %v2530_v29  ;;  %v2542_v19 = vadd.f32 %v4063_v20, %v2541_v6  ;;  %v7741_v41 = vld [vmem:[#allocation18_spill] sm:$0xff] }
 0x20c   : > { %v1046_v45 = vpop.f32.mrf.mxu0 }
 0x20d   : > { %v2533_v25 = vrot.slane %v2532_v17, 2  ;;  %v5560_v42 = vadd.f32 %v1046_v45, %v7740_v38  ;;  %v2543_v63 = vadd.f32 %v4065_v34, %v2542_v19 }
 0x20f   : > { %v2534_v56 = vadd.f32 %v2533_v25, %v2532_v17  ;;  %v2603_v4 = vmax.f32 %v2601_v58, %v5560_v42  ;;  %v2544_v12 = vrot.slane %v2543_v63, 4 }
 0x211   : > { %v2535_v14 = vrot.slane %v2534_v56, 1  ;;  %v2545_v21 = vadd.f32 %v2544_v12, %v2543_v63 }
 0x213   : > { %v2536_v51 = vadd.f32 %v2535_v14, %v2534_v56  ;;  %v2546_v29 = vrot.slane %v2545_v21, 2 }
 0x214   : > { %v1049_v44 = vpop.f32.mrf.mxu0 }
 0x215   : > { %4066 = vrcp.f32 %v2536_v51  ;;  %v5564_v52 = vadd.f32 %v1049_v44, %v7741_v41  ;;  %v2547_v40 = vadd.f32 %v2546_v29, %v2545_v21 }
 0x217   : > { %v2604_v6 = vmax.f32 %v2602_v28, %v5564_v52  ;;  %v2548_v45 = vrot.slane %v2547_v40, 1 }
 0x219   : > { %v2549_v37 = vadd.f32 %v2548_v45, %v2547_v40 }
 0x21b   : > { %v4067_v38 = vpop.eup %4066  ;;  %4068 = vrcp.f32 %v2549_v37 }
 0x21c   : > { %v1052_v17 = vpop.f32.mrf.mxu0  ;;  %v2566_v25 = vmul.f32 %v4067_v38, %v4055_v53  ;;  %v2564_v19 = vmul.f32 %v4067_v38, %v4051_v47  ;;  %v2562_v58 = vmul.f32 %v4067_v38, %v4045_v55  ;;  %v2560_v14 = vmul.f32 %v4067_v38, %v5535_v27 }
 0x21d   : > { %v5568_v56 = vadd.f32 %v1052_v17, %v7742_v2  ;;  %v2558_v21 = vmul.f32 %v4067_v38, %v5531_v18  ;;  %v2556_v53 = vmul.f32 %v4067_v38, %v5520_v57 }
 0x21e   : > { %v2582_v63 = vmul.f32 0.936, %v2566_v25  ;;  %v2580_v12 = vmul.f32 0.936, %v2564_v19  ;;  %v2578_v44 = vmul.f32 0.936, %v2562_v58 }
 0x21f   : > { %v2605_v51 = vmax.f32 %v2603_v4, %v5568_v56  ;;  %v2576_v55 = vmul.f32 0.936, %v2560_v14  ;;  %v2574_v45 = vmul.f32 0.936, %v2558_v21 }
 0x220   : > { %v5573_v28 = vadd.f32 0.001, %v2582_v63  ;;  %v5577_v37 = vadd.f32 0.001, %v2580_v12  ;;  %v5580_v4 = vadd.f32 0.001, %v2578_v44 }
 0x221   : > { %v2606_v40 = vmax.f32 %v2604_v6, %v2605_v51  ;;  %v4069_v47 = vpop.eup %4068  ;;  %v2572_v6 = vmul.f32 0.936, %v2556_v53  ;;  %v5583_v63 = vadd.f32 0.001, %v2576_v55  ;;  %v2552_v51 = vmul.f32 %v4067_v38, %v5510_v1 }
 0x222   : > { %7743 = vst [vmem:[#allocation85_spill] sm:$0xff] %v5573_v28  ;;  %2758 = vmatpush.msra.mxu2 %v5573_v28  ;;  %v2567_v17 = vmul.f32 %v4069_v47, %v4065_v34  ;;  %v2565_v27 = vmul.f32 %v4069_v47, %v4063_v20  ;;  %v2563_v18 = vmul.f32 %v4069_v47, %v4061_v26 }
 0x223   : > { %7744 = vst [vmem:[#allocation86_spill] sm:$0xff] %v5577_v37  ;;  %v2607_v29 = vrot.slane %v2606_v40, 4  ;;  %v2561_v19 = vmul.f32 %v4069_v47, %v4059_v35  ;;  %v2559_v12 = vmul.f32 %v4069_v47, %v5555_v43  ;;  %v2554_v34 = vmul.f32 %v4067_v38, %v5512_v50 }
 0x224   : > { %2759 = vmatpush.msra.mxu2 %v5577_v37  ;;  %7745 = vst [vmem:[#allocation87_spill] sm:$0xff] %v5580_v4  ;;  %v2583_v58 = vmul.f32 0.936, %v2567_v17  ;;  %v2581_v57 = vmul.f32 0.936, %v2565_v27  ;;  %v2557_v38 = vmul.f32 %v4069_v47, %v5549_v0  ;;  %v2555_v0 = vmul.f32 %v4069_v47, %v5545_v15 }
 0x225   : > { %v2608_v25 = vmax.f32 %v2606_v40, %v2607_v29  ;;  %7746 = vst [vmem:[#allocation88_spill] sm:$0xff] %v5583_v63  ;;  %v2579_v21 = vmul.f32 0.936, %v2563_v18  ;;  %v5591_v35 = vadd.f32 0.001, %v2574_v45 }
 0x226   : > { %2760 = vmatpush.msra.mxu2 %v5580_v4  ;;  %v5588_v20 = vadd.f32 0.001, %v2583_v58  ;;  %v2577_v44 = vmul.f32 0.936, %v2561_v19  ;;  %v5594_v40 = vadd.f32 0.001, %v2581_v57 }
 0x227   : > { %v2609_v14 = vrot.slane %v2608_v25, 2  ;;  %7748 = vst [vmem:[#allocation90_spill] sm:$0xff] %v5591_v35  ;;  %v2575_v43 = vmul.f32 0.936, %v2559_v12  ;;  %v5597_v53 = vadd.f32 0.001, %v2572_v6 }
 0x228   : > { %7747 = vst [vmem:[#allocation89_spill] sm:$0xff] %v5588_v20  ;;  %2761 = vmatpush.msra.mxu2 %v5583_v63  ;;  %2799 = vmatpush.msra.mxu3 %v5588_v20  ;;  %v2570_v50 = vmul.f32 0.936, %v2554_v34  ;;  %v2568_v55 = vmul.f32 0.936, %v2552_v51  ;;  %v7776_v4 = vmov 0.0  }
 0x229   : > { %v2610_v26 = vmax.f32 %v2608_v25, %v2609_v14  ;;  %7749 = vst [vmem:[#allocation91_spill] sm:$0xff] %v5594_v40  ;;  %v5601_v29 = vadd.f32 0.001, %v2579_v21  ;;  %v5604_v17 = vadd.f32 0.001, %v2577_v44 }
 0x22a   : > { %2762 = vmatpush.msra.mxu2 %v5591_v35  ;;  %7750 = vst [vmem:[#allocation92_spill] sm:$0xff] %v5597_v53  ;;  %2800 = vmatpush.msra.mxu3 %v5594_v40  ;;  %v5606_v27 = vadd.f32 0.001, %v2570_v50  ;;  %v5609_v18 = vadd.f32 0.001, %v2575_v43  ;;  %v7550_v40 = vmov 0.0  }
 0x22b   : > { %v2611_v1 = vrot.slane %v2610_v26, 1  ;;  %7751 = vst [vmem:[#allocation93_spill] sm:$0xff] %v5601_v29  ;;  %v2573_v25 = vmul.f32 0.936, %v2557_v38  ;;  %v5612_v19 = vadd.f32 0.001, %v2568_v55  ;;  %v5636_v38 = vpop.f32.mrf.mxu2 }
 0x22c   : > { %2763 = vmatpush.msra.mxu2 %v5597_v53  ;;  %7752 = vst [vmem:[#allocation94_spill] sm:$0xff] %v5604_v17  ;;  %2801 = vmatpush.msra.mxu3 %v5601_v29 }
 0x22d   : > { %v2612_v45 = vmax.f32 %v2610_v26, %v2611_v1  ;;  %7753 = vst [vmem:[#allocation95_spill] sm:$0xff] %v5606_v27 }
 0x22e   : > { %7754 = vst [vmem:[#allocation96_spill] sm:$0xff] %v5609_v18  ;;  %2764 = vmatpush.msra.mxu2 %v5606_v27  ;;  %2802 = vmatpush.msra.mxu3 %v5604_v17 }
 0x22f   : > { %7755 = vst [vmem:[#allocation97_spill] sm:$0xff] %v5612_v19  ;;  %v2626_v6 = vsub.f32 %v5501_v60, %v2612_v45  ;;  %v2628_v58 = vsub.f32 %v5526_v9, %v2612_v45  ;;  %v2630_v57 = vsub.f32 %v5508_v59, %v2612_v45  ;;  %v2632_v12 = vsub.f32 %v5529_v31, %v2612_v45 }
 0x230   : > { %v2634_v14 = vsub.f32 %v5553_v7, %v2612_v45  ;;  %v2636_v34 = vsub.f32 %v5560_v42, %v2612_v45  ;;  %v2638_v51 = vsub.f32 %v5564_v52, %v2612_v45  ;;  %v2640_v15 = vsub.f32 %v5568_v56, %v2612_v45  ;;  %2765 = vmatpush.msra.mxu2 %v5612_v19 }
 0x231   : > { %v2642_v21 = vmul.f32 1.442695, %v2626_v6  ;;  %v2646_v60 = vmul.f32 1.442695, %v2628_v58  ;;  %v2650_v9 = vmul.f32 1.442695, %v2630_v57  ;;  %2803 = vmatpush.msra.mxu3 %v5609_v18  ;;  %v2553_v31 = vmul.f32 %v4069_v47, %v5542_v8  ;;  %3863 = vmatmul.msk.f32.vlgmr.msra.gmra.mxu2 %vm1597_vm2, %v5246_v5  ;;  %v5640_v47 = vpop.f32.mrf.mxu3 }
 0x232   : > { %v5626_v59 = vadd.f32 0.001, %v2573_v25  ;;  %v2654_v42 = vmul.f32 1.442695, %v2632_v12  ;;  %v2571_v7 = vmul.f32 0.936, %v2555_v0 }
 0x233   : > { %4070 = vpow2.f32 %v2642_v21  ;;  %v2658_v52 = vmul.f32 1.442695, %v2634_v14  ;;  %v2569_v56 = vmul.f32 0.936, %v2553_v31  ;;  %v2662_v26 = vmul.f32 1.442695, %v2636_v34 }
 0x234   : > { %7756 = vst [vmem:[#allocation98_spill] sm:$0xff] %v5626_v59  ;;  %4072 = vpow2.f32 %v2646_v60  ;;  %2804 = vmatpush.msra.mxu3 %v5626_v59  ;;  %v5632_v44 = vadd.f32 0.001, %v2571_v7  ;;  %v2666_v1 = vmul.f32 1.442695, %v2638_v51  ;;  %v5673_v21 = vcvt.s32.f32 %v4843_v54  ;;  %v5681_v7 = vld [vmem:[%s4365_s15] sm:$0xff] }
 0x235   : > { %4074 = vpow2.f32 %v2650_v9  ;;  %7758 = vst [vmem:[#allocation100_spill] sm:$0xff] %v5636_v38  ;;  %v5643_v50 = vadd.f32 0.001, %v2569_v56  ;;  %v2670_v25 = vmul.f32 1.442695, %v2640_v15 }
 0x236   : > { %4076 = vpow2.f32 %v2654_v42  ;;  %7757 = vst [vmem:[#allocation99_spill] sm:$0xff] %v5632_v44  ;;  %2805 = vmatpush.msra.mxu3 %v5632_v44  ;;  %vm1289_vm3 = vcmp.eq.f32.partialorder %v5673_v21, 63.0  ;;  %v1569_v18 = vmul.f32 0.936, %v5405_v30 }
 0x237   : > { %7759 = vst [vmem:[#allocation101_spill] sm:$0xff] %v5640_v47  ;;  %4078 = vpow2.f32 %v2658_v52  ;;  %v1768_v52 = vperm.slane %v5681_v7, 2 }
 0x238   : > { %7760 = vst [vmem:[#allocation102_spill] sm:$0xff] %v5643_v50  ;;  %4080 = vpow2.f32 %v2662_v26  ;;  %2806 = vmatpush.msra.mxu3 %v5643_v50  ;;  %v1274_v26 = vadd.s32 8, %v4843_v54  ;;  %v5780_v28 = vadd.f32 0.001, %v1569_v18 }
 0x239   : > { %v5634_v43 = vpop.eup %4070  ;;  %3864 = vmatmul.msk.f32.gmra.mxu2 %vm1597_vm2, %v5284_v11  ;;  %3871 = vmatmul.msk.f32.vlgmr.msra.gmra.mxu3 %vm1597_vm2, %v5246_v5  ;;  %4082 = vpow2.f32 %v2666_v1  ;;  %7765 = vst [vmem:[#allocation107_spill] sm:$0xff] %v5673_v21 }
 0x23a   : > { %v5638_v8 = vpop.eup %4072  ;;  %4084 = vpow2.f32 %v2670_v25  ;;  %7767 = vst [vmem:[#allocation109_spill] sm:$0xff] %v5681_v7 }
 0x23b   : > { %v2674_v55 = vadd.f32 %v5638_v8, %v5634_v43  ;;  %v5649_v45 = vpop.eup %4074  ;;  %343 = vst [vmem:[%s5825_s30] sm:$0x33] %v5681_v7 }
 0x23c   : > { %v5655_v6 = vpop.eup %4076 }
 0x23d   : > { %v2675_v0 = vadd.f32 %v5649_v45, %v2674_v55  ;;  %7761 = vst [vmem:[#allocation103_spill] sm:$0xff] %v5655_v6  ;;  %v5658_v57 = vpop.eup %4078 }
 0x23e   : > { %7762 = vst [vmem:[#allocation104_spill] sm:$0xff] %v5658_v57  ;;  %v5663_v34 = vpop.eup %4080 }
 0x23f   : > { %v2676_v58 = vadd.f32 %v5655_v6, %v2675_v0  ;;  %7763 = vst [vmem:[#allocation105_spill] sm:$0xff] %v5663_v34  ;;  %v5677_v9 = vpop.eup %4082  ;;  %v1769_v0 = vperm.slane %v5681_v7, 6 }
 0x240   : > { %v5661_v14 = vpop.f32.mrf.mxu2  ;;  %7766 = vst [vmem:[#allocation108_spill] sm:$0xff] %v5677_v9  ;;  %v5687_v1 = vpop.eup %4084 }
 0x241   : > { %v2677_v12 = vadd.f32 %v5658_v57, %v2676_v58  ;;  %v1704_v51 = vadd.f32 %v5661_v14, %v5241_v10  ;;  %v5667_v15 = vpop.f32.mrf.mxu3  ;;  %3865 = vmatmul.msk.f32.gmra.mxu2 %vm1597_vm2, %v5309_v23  ;;  %3872 = vmatmul.msk.f32.gmra.mxu3 %vm1597_vm2, %v5284_v11  ;;  %7768 = vst [vmem:[#allocation110_spill] sm:$0xff] %v5687_v1  ;;  %v5694_v58 = vperm.slane %v1768_v52, 2  ;;  %v1567_v52 = vmul.f32 0.936, %v5402_v3 }
 0x242   : > { %7764 = vst [vmem:[#allocation106_spill] sm:$0xff] %v5667_v15  ;;  %v1705_v60 = vadd.f32 %v5667_v15, %v5251_v49 }
 0x243   : > { %v2678_v5 = vadd.f32 %v5663_v34, %v2677_v12  ;;  %v1720_v31 = vmul.f32 10.0, %v1704_v51  ;;  %v5696_v51 = vcvt.s32.f32 %v1274_v26 }
 0x244   : > { %v1721_v56 = vmul.f32 10.0, %v1705_v60 }
 0x245   : > { %v2679_v42 = vadd.f32 %v5677_v9, %v2678_v5  ;;  %v1736_v55 = vadd.f32 -5.0, %v1720_v31  ;;  %7769 = vst [vmem:[#allocation111_spill] sm:$0xff] %v5696_v51  ;;  %vm1290_vm5 = vcmp.eq.f32.partialorder %v5696_v51, 63.0 }
 0x246   : > { %v1737_v12 = vadd.f32 -5.0, %v1721_v56  ;;  %v5710_v56 = vperm.slane %v1769_v0, 2  ;;  %v1566_v0 = vmul.f32 0.936, %v5444_v48 }
 0x247   : > { %v5690_v25 = vadd.f32 %v5687_v1, %v2679_v42  ;;  %v1752_v11 = vsel %vm1289_vm3, 5.000001, %v1736_v55  ;;  %v1565_v42 = vmul.f32 0.936, %v5399_v13  ;;  %v1275_v13 = vadd.s32 16, %v4843_v54 }
 0x248   : > { %v5698_v5 = vpop.f32.mrf.mxu2  ;;  %vm1774_vm4 = vcmp.ge.f32.partialorder %v5694_v58, %v1752_v11  ;;  %v1753_v55 = vsel %vm1289_vm3, 5.000001, %v1737_v12 }
 0x249   : > { %v1706_v60 = vadd.f32 %v5698_v5, %v5191_v32  ;;  %v5704_v31 = vpop.f32.mrf.mxu3  ;;  %3866 = vmatmul.msk.f32.gmra.mxu2 %vm1597_vm2, %v5324_v46  ;;  %3873 = vmatmul.msk.f32.gmra.mxu3 %vm1597_vm2, %v5309_v23  ;;  %v5724_v29 = vsel %vm1774_vm4, 1.0, %v7550_v40  ;;  %vm1775_vm6 = vcmp.ge.f32.partialorder %v5710_v56, %v1753_v55  ;;  %v5729_v17 = vadd.f32 0.001, %v1565_v42 }
 0x24a   : > { %7770 = vst [vmem:[#allocation112_spill] sm:$0xff] %v5704_v31  ;;  %v1707_v47 = vadd.f32 %v5704_v31, %v5237_v33  ;;  %v5731_v23 = vadd.f32 0.001, %v1567_v52  ;;  %v1276_v55 = vadd.s32 24, %v4843_v54  ;;  %v1279_v33 = vadd.s32 48, %v4843_v54 }
 0x24b   : > { %v1722_v26 = vmul.f32 10.0, %v1706_v60  ;;  %v1568_v60 = vmul.f32 0.936, %v5447_v16  ;;  %v1996_v52 = vmul.f32 %v5724_v29, %v5729_v17 }
 0x24c   : > { %v1723_v3 = vmul.f32 10.0, %v1707_v47  ;;  %v5734_v47 = vcvt.s32.f32 %v1275_v13  ;;  %v5752_v13 = vadd.f32 0.001, %v1566_v0 }
 0x24d   : > { %v1738_v20 = vadd.f32 -5.0, %v1722_v26 }
 0x24e   : > { %v1739_v11 = vadd.f32 -5.0, %v1723_v3  ;;  %7771 = vst [vmem:[#allocation113_spill] sm:$0xff] %v5734_v47  ;;  %v5757_v3 = vsel %vm1775_vm6, 1.0, %v7550_v40  ;;  %vm1291_vm9 = vcmp.eq.f32.partialorder %v5734_v47, 63.0 }
 0x24f   : > { %v1754_v12 = vsel %vm1290_vm5, 5.000001, %v1738_v20  ;;  %7773 = vst [vmem:[#allocation115_spill] sm:$0xff] %v5752_v13 }
 0x250   : > { %vm1776_vm7 = vcmp.ge.f32.partialorder %v5694_v58, %v1754_v12  ;;  %v5736_v48 = vpop.f32.mrf.mxu2  ;;  %v1755_v26 = vsel %vm1290_vm5, 5.000001, %v1739_v11  ;;  %v5761_v12 = vadd.f32 0.001, %v1568_v60  ;;  %v1997_v60 = vmul.f32 %v5757_v3, %v5752_v13 }
 0x251   : > { %v5739_v16 = vsel %vm1776_vm7, 1.0, %v7550_v40  ;;  %v1708_v20 = vadd.f32 %v5736_v48, %v5175_v62  ;;  %v5746_v42 = vpop.f32.mrf.mxu3  ;;  %3867 = vmatmul.msk.f32.gmra.mxu2 %vm1597_vm2, %v5387_v22  ;;  %vm1777_vm8 = vcmp.ge.f32.partialorder %v5710_v56, %v1755_v26  ;;  %3874 = vmatmul.msk.f32.gmra.mxu3 %vm1597_vm2, %v5324_v46  ;;  %v5783_v46 = vcvt.s32.f32 %v1276_v55  ;;  %v7779_v55 = vld [vmem:[#allocation69_spill] sm:$0xff] }
 0x252   : > { %7772 = vst [vmem:[#allocation114_spill] sm:$0xff] %v5746_v42  ;;  %v1998_v30 = vmul.f32 %v5739_v16, %v5731_v23  ;;  %v1709_v38 = vadd.f32 %v5746_v42, %v5230_v36  ;;  %v5767_v0 = vsel %vm1777_vm8, 1.0, %v7550_v40 }
 0x253   : > { %7774 = vst [vmem:[#allocation116_spill] sm:$0xff] %v5761_v12  ;;  %v1724_v11 = vmul.f32 10.0, %v1708_v20  ;;  %v1999_v26 = vmul.f32 %v5767_v0, %v5761_v12  ;;  %vm1292_vm12 = vcmp.eq.f32.partialorder %v5783_v46, 63.0 }
 0x254   : > { %v2012_v59 = vadd.f32 %v1998_v30, %v1996_v52  ;;  %v1725_v50 = vmul.f32 10.0, %v1709_v38  ;;  %v1570_v52 = vmul.f32 0.936, %v5450_v39  ;;  %7775 = vst [vmem:[#allocation117_spill] sm:$0xff] %v5783_v46 }
 0x255   : > { %v1740_v20 = vadd.f32 -5.0, %v1724_v11  ;;  %v2025_v30 = vadd.f32 %v1999_v26, %v1997_v60  ;;  %v1277_v26 = vadd.s32 32, %v4843_v54 }
 0x256   : > { %v1741_v44 = vadd.f32 -5.0, %v1725_v50  ;;  %v5800_v18 = vadd.f32 0.001, %v1570_v52  ;;  %v7780_v52 = vld [vmem:[#allocation74_spill] sm:$0xff] }
 0x257   : > { %v1756_v40 = vsel %vm1291_vm9, 5.000001, %v1740_v20  ;;  %v1571_v53 = vmul.f32 0.936, %v7780_v52  ;;  %v7788_v52 = vld [vmem:[#allocation68_spill] sm:$0xff] }
 0x258   : > { %vm1778_vm10 = vcmp.ge.f32.partialorder %v5694_v58, %v1756_v40  ;;  %v5785_v37 = vpop.f32.mrf.mxu2  ;;  %v1757_v38 = vsel %vm1291_vm9, 5.000001, %v1741_v44  ;;  %7778 = vst [vmem:[#allocation119_spill] sm:$0xff] %v5800_v18 }
 0x259   : > { %v5788_v63 = vsel %vm1778_vm10, 1.0, %v7776_v4  ;;  %v1710_v39 = vadd.f32 %v5785_v37, %v5167_v24  ;;  %v5794_v11 = vpop.f32.mrf.mxu3  ;;  %3868 = vmatmul.msk.f32.gmra.mxu2 %vm1597_vm2, %v5438_v61  ;;  %vm1779_vm11 = vcmp.ge.f32.partialorder %v5710_v56, %v1757_v38  ;;  %3875 = vmatmul.msk.f32.gmra.mxu3 %vm1597_vm2, %v5387_v22 }
 0x25a   : > { %7777 = vst [vmem:[#allocation118_spill] sm:$0xff] %v5794_v11  ;;  %v2000_v40 = vmul.f32 %v5788_v63, %v5780_v28  ;;  %v5804_v50 = vsel %vm1779_vm11, 1.0, %v7776_v4  ;;  %v1711_v60 = vadd.f32 %v5794_v11, %v7779_v55 }
 0x25b   : > { %v1726_v44 = vmul.f32 10.0, %v1710_v39  ;;  %v2001_v35 = vmul.f32 %v5804_v50, %v5800_v18  ;;  %v7781_v39 = vld [vmem:[#allocation79_spill] sm:$0xff]  ;;  %v7790_v18 = vld [vmem:[#allocation80_spill] sm:$0xff] }
 0x25c   : > { %v2013_v20 = vadd.f32 %v2012_v59, %v2000_v40  ;;  %v1727_v1 = vmul.f32 10.0, %v1711_v60  ;;  %v1572_v27 = vmul.f32 0.936, %v7781_v39  ;;  %v5818_v59 = vcvt.s32.f32 %v1277_v26  ;;  %v7786_v26 = vld [vmem:[#allocation83_spill] sm:$0xff] }
 0x25d   : > { %v1742_v38 = vadd.f32 -5.0, %v1726_v44  ;;  %v2026_v9 = vadd.f32 %v2025_v30, %v2001_v35  ;;  %v5827_v40 = vadd.f32 0.001, %v1571_v53  ;;  %v7784_v30 = vld [vmem:[#allocation64_spill] sm:$0xff]  ;;  %v7789_v39 = vld [vmem:[#allocation75_spill] sm:$0xff] }
 0x25e   : > { %v1743_v19 = vadd.f32 -5.0, %v1727_v1  ;;  %7782 = vst [vmem:[#allocation74_spill] sm:$0xff] %v5818_v59  ;;  %vm1293_vm15 = vcmp.eq.f32.partialorder %v5818_v59, 63.0  ;;  %v1573_v7 = vmul.f32 0.936, %v7789_v39 }
 0x25f   : > { %v1758_v34 = vsel %vm1292_vm12, 5.000001, %v1742_v38  ;;  %7783 = vst [vmem:[#allocation79_spill] sm:$0xff] %v5827_v40 }
 0x260   : > { %vm1780_vm13 = vcmp.ge.f32.partialorder %v5694_v58, %v1758_v34  ;;  %v5830_v22 = vpop.f32.mrf.mxu2  ;;  %v1759_v1 = vsel %vm1292_vm12, 5.000001, %v1743_v19  ;;  %v5847_v34 = vadd.f32 0.001, %v1572_v27  ;;  %v1278_v27 = vadd.s32 40, %v4843_v54 }
 0x261   : > { %v5835_v35 = vsel %vm1780_vm13, 1.0, %v7776_v4  ;;  %v1712_v44 = vadd.f32 %v5830_v22, %v7784_v30  ;;  %v5841_v60 = vpop.f32.mrf.mxu3  ;;  %3869 = vmatmul.msk.f32.gmra.mxu2 %vm1597_vm2, %v7786_v26  ;;  %vm1781_vm14 = vcmp.ge.f32.partialorder %v5710_v56, %v1759_v1  ;;  %3876 = vmatmul.msk.f32.gmra.mxu3 %vm1597_vm2, %v5438_v61  ;;  %v5865_v39 = vadd.f32 0.001, %v1573_v7  ;;  %v7796_v7 = vld [vmem:[#allocation84_spill] sm:$0xff] }
 0x262   : > { %7785 = vst [vmem:[#allocation64_spill] sm:$0xff] %v5841_v60  ;;  %v2002_v53 = vmul.f32 %v5835_v35, %v5827_v40  ;;  %v1713_v38 = vadd.f32 %v5841_v60, %v7788_v52  ;;  %v5853_v19 = vsel %vm1781_vm14, 1.0, %v7776_v4  ;;  %v1574_v52 = vmul.f32 0.936, %v7790_v18 }
 0x263   : > { %7787 = vst [vmem:[#allocation83_spill] sm:$0xff] %v5847_v34  ;;  %v1728_v57 = vmul.f32 10.0, %v1712_v44  ;;  %v2003_v41 = vmul.f32 %v5853_v19, %v5847_v34  ;;  %v5870_v44 = vcvt.s32.f32 %v1278_v27 }
 0x264   : > { %v2014_v6 = vadd.f32 %v2013_v20, %v2002_v53  ;;  %v1729_v2 = vmul.f32 10.0, %v1713_v38  ;;  %7791 = vst [vmem:[#allocation75_spill] sm:$0xff] %v5865_v39  ;;  %v5877_v18 = vadd.f32 0.001, %v1574_v52  ;;  %v7797_v53 = vld [vmem:[#allocation67_spill] sm:$0xff]  ;;  %v2681_v38 = vrot.slane %v5690_v25, 4 }
 0x265   : > { %v1744_v1 = vadd.f32 -5.0, %v1728_v57  ;;  %v2027_v55 = vadd.f32 %v2026_v9, %v2003_v41  ;;  %7792 = vst [vmem:[#allocation80_spill] sm:$0xff] %v5870_v44  ;;  %vm1294_vm6 = vcmp.eq.f32.partialorder %v5870_v44, 63.0 }
 0x266   : > { %v1745_v12 = vadd.f32 -5.0, %v1729_v2  ;;  %7793 = vst [vmem:[#allocation120_spill] sm:$0xff] %v5877_v18  ;;  %v7794_v2 = vld [vmem:[#allocation63_spill] sm:$0xff]  ;;  %v2682_v31 = vadd.f32 %v2681_v38, %v5690_v25  ;;  %v7803_v25 = vld [vmem:[#allocation62_spill] sm:$0xff] }
 0x267   : > { %v1760_v13 = vsel %vm1293_vm15, 5.000001, %v1744_v1  ;;  %v7798_v1 = vld [vmem:[#allocation76_spill] sm:$0xff]  ;;  %v7806_v38 = vld [vmem:[#allocation66_spill] sm:$0xff] }
 0x268   : > { %vm1782_vm0 = vcmp.ge.f32.partialorder %v5694_v58, %v1760_v13  ;;  %v1761_v20 = vsel %vm1293_vm15, 5.000001, %v1745_v12  ;;  %v5872_v61 = vpop.f32.mrf.mxu2 }
 0x269   : > { %v5875_v57 = vsel %vm1782_vm0, 1.0, %v7776_v4  ;;  %vm1783_vm4 = vcmp.ge.f32.partialorder %v5710_v56, %v1761_v20  ;;  %v1714_v41 = vadd.f32 %v5872_v61, %v7794_v2  ;;  %v5882_v9 = vpop.f32.mrf.mxu3  ;;  %3870 = vmatmul.msk.f32.gmra.mxu2 %vm1597_vm2, %v7796_v7  ;;  %v1575_v20 = vmul.f32 0.936, %v7798_v1  ;;  %3877 = vmatmul.msk.f32.gmra.mxu3 %vm1597_vm2, %v7786_v26 }
 0x26a   : > { %7795 = vst [vmem:[#allocation63_spill] sm:$0xff] %v5882_v9  ;;  %v2004_v13 = vmul.f32 %v5875_v57, %v5865_v39  ;;  %v5889_v12 = vsel %vm1783_vm4, 1.0, %v7776_v4  ;;  %v1715_v52 = vadd.f32 %v5882_v9, %v7797_v53  ;;  %v7799_v53 = vld [vmem:[#allocation81_spill] sm:$0xff]  ;;  %v5910_v26 = vcvt.s32.f32 %v1279_v33 }
 0x26b   : > { %v2005_v27 = vmul.f32 %v5889_v12, %v5877_v18  ;;  %v1730_v34 = vmul.f32 10.0, %v1714_v41  ;;  %v1576_v9 = vmul.f32 0.936, %v7799_v53  ;;  %v5905_v41 = vadd.f32 0.001, %v1575_v20  ;;  %v7807_v18 = vld [vmem:[#allocation82_spill] sm:$0xff] }
 0x26c   : > { %v2015_v36 = vadd.f32 %v2014_v6, %v2004_v13  ;;  %v1731_v60 = vmul.f32 10.0, %v1715_v52  ;;  %7801 = vst [vmem:[#allocation76_spill] sm:$0xff] %v5910_v26  ;;  %v2683_v20 = vrot.slane %v2682_v31, 2  ;;  %vm1295_vm10 = vcmp.eq.f32.partialorder %v5910_v26, 63.0 }
 0x26d   : > { %v2028_v49 = vadd.f32 %v2027_v55, %v2005_v27  ;;  %v1746_v11 = vadd.f32 -5.0, %v1730_v34  ;;  %7800 = vst [vmem:[#allocation84_spill] sm:$0xff] %v5905_v41  ;;  %v5915_v34 = vadd.f32 0.001, %v1576_v9 }
 0x26e   : > { %v1747_v42 = vadd.f32 -5.0, %v1731_v60 }
 0x26f   : > { %v1762_v1 = vsel %vm1294_vm6, 5.000001, %v1746_v11  ;;  %7802 = vst [vmem:[#allocation81_spill] sm:$0xff] %v5915_v34 }
 0x270   : > { %vm1784_vm7 = vcmp.ge.f32.partialorder %v5694_v58, %v1762_v1  ;;  %v1763_v6 = vsel %vm1294_vm6, 5.000001, %v1747_v42  ;;  %v5912_v13 = vpop.f32.mrf.mxu2  ;;  %v7805_v42 = vld [vmem:[#allocation77_spill] sm:$0xff] }
 0x271   : > { %v3840_v55 = vsel %vm1784_vm7, 1.0, %v7776_v4  ;;  %vm1785_vm8 = vcmp.ge.f32.partialorder %v5710_v56, %v1763_v6  ;;  %v1716_v11 = vadd.f32 %v5912_v13, %v7803_v25  ;;  %v5920_v60 = vpop.f32.mrf.mxu3  ;;  %v1577_v33 = vmul.f32 0.936, %v7805_v42  ;;  %3878 = vmatmul.msk.f32.gmra.mxu3 %vm1597_vm2, %v7796_v7  ;;  %v5933_v25 = vpop.f32.mrf.mxu1 }
 0x272   : > { %7804 = vst [vmem:[#allocation121_spill] sm:$0xff] %v5920_v60  ;;  %v2006_v53 = vmul.f32 %v3840_v55, %v5905_v41  ;;  %v3841_v52 = vsel %vm1785_vm8, 1.0, %v7776_v4  ;;  %v1717_v27 = vadd.f32 %v5920_v60, %v7806_v38  ;;  %v1578_v6 = vmul.f32 0.936, %v7807_v18  ;;  %v7810_v18 = vld [vmem:[#allocation73_spill] sm:$0xff] }
 0x273   : > { %v2007_v9 = vmul.f32 %v3841_v52, %v5915_v34  ;;  %v1732_v1 = vmul.f32 10.0, %v1716_v11  ;;  %v1280_v41 = vadd.s32 56, %v4843_v54  ;;  %7808 = vst [vmem:[#allocation77_spill] sm:$0xff] %v5933_v25  ;;  %v1822_v38 = vadd.f32 %v5739_v16, %v5724_v29  ;;  %v7816_v25 = vld [vmem:[#allocation22_spill] sm:$0xff] }
 0x274   : > { %v2016_v15 = vadd.f32 %v2015_v36, %v2006_v53  ;;  %v1733_v39 = vmul.f32 10.0, %v1717_v27  ;;  %v5937_v34 = vadd.f32 0.001, %v1577_v33  ;;  %v1579_v36 = vmul.f32 0.936, %v7810_v18 }
 0x275   : > { %v2029_v42 = vadd.f32 %v2028_v49, %v2007_v9  ;;  %v1748_v40 = vadd.f32 -5.0, %v1732_v1  ;;  %v2684_v53 = vadd.f32 %v2683_v20, %v2682_v31  ;;  %v1835_v27 = vadd.f32 %v5767_v0, %v5757_v3  ;;  %v7813_v0 = vld [vmem:[#allocation61_spill] sm:$0xff] }
 0x276   : > { %7809 = vst [vmem:[#allocation82_spill] sm:$0xff] %v5937_v34  ;;  %v1749_v11 = vadd.f32 -5.0, %v1733_v39  ;;  %v5944_v60 = vadd.f32 0.001, %v1578_v6  ;;  %v1823_v49 = vadd.f32 %v5788_v63, %v1822_v38  ;;  %v5950_v16 = vcvt.s32.f32 %v1280_v41  ;;  %v7815_v20 = vld [vmem:[#allocation65_spill] sm:$0xff] }
 0x277   : > { %v1764_v7 = vsel %vm1295_vm10, 5.000001, %v1748_v40  ;;  %v1836_v31 = vadd.f32 %v5804_v50, %v1835_v27  ;;  %v2685_v1 = vrot.slane %v2684_v53, 1 }
 0x278   : > { %7811 = vst [vmem:[#allocation73_spill] sm:$0xff] %v5944_v60  ;;  %vm1786_vm2 = vcmp.ge.f32.partialorder %v5694_v58, %v1764_v7  ;;  %v1765_v29 = vsel %vm1295_vm10, 5.000001, %v1749_v11  ;;  %v5952_v39 = vpop.f32.mrf.mxu2  ;;  %v1824_v63 = vadd.f32 %v5835_v35, %v1823_v49  ;;  %vm1296_vm13 = vcmp.eq.f32.partialorder %v5950_v16, 63.0 }
 0x279   : > { %7812 = vst [vmem:[#allocation122_spill] sm:$0xff] %v5950_v16  ;;  %v3842_v3 = vsel %vm1786_vm2, 1.0, %v7776_v4  ;;  %vm1787_vm11 = vcmp.ge.f32.partialorder %v5710_v56, %v1765_v29  ;;  %v1718_v40 = vadd.f32 %v5952_v39, %v7813_v0  ;;  %v5959_v33 = vpop.f32.mrf.mxu3  ;;  %v1837_v50 = vadd.f32 %v5853_v19, %v1836_v31  ;;  %v7819_v31 = vld [vmem:[#allocation27_spill] sm:$0xff] }
 0x27a   : > { %7814 = vst [vmem:[#allocation123_spill] sm:$0xff] %v5959_v33  ;;  %v2008_v38 = vmul.f32 %v3842_v3, %v5937_v34  ;;  %v3843_v41 = vsel %vm1787_vm11, 1.0, %v7776_v4  ;;  %v1719_v9 = vadd.f32 %v5959_v33, %v7815_v20  ;;  %v1825_v18 = vadd.f32 %v5875_v57, %v1824_v63  ;;  %v7817_v34 = vld [vmem:[#allocation3_spill] sm:$0xff]  ;;  %v5981_v57 = vpop.f32.mrf.mxu1 }
 0x27b   : > { %v2009_v6 = vmul.f32 %v3843_v41, %v5944_v60  ;;  %v1734_v11 = vmul.f32 10.0, %v1718_v40  ;;  %v1838_v35 = vadd.f32 %v5889_v12, %v1837_v50  ;;  %v5975_v20 = vadd.f32 %v7817_v34, %v7816_v25  ;;  %v7820_v60 = vld [vmem:[#allocation4_spill] sm:$0xff]  ;;  %7822 = vst [vmem:[#allocation27_spill] sm:$0xff] %v5981_v57 }
 0x27c   : > { %v2017_v27 = vadd.f32 %v2016_v15, %v2008_v38  ;;  %v1735_v7 = vmul.f32 10.0, %v1719_v9  ;;  %v1826_v33 = vadd.f32 %v3840_v55, %v1825_v18  ;;  %v5979_v40 = vadd.f32 %v7820_v60, %v7819_v31  ;;  %v7824_v34 = vld [vmem:[#allocation24_spill] sm:$0xff]  ;;  %v7825_v9 = vld [vmem:[#allocation5_spill] sm:$0xff] }
 0x27d   : > { %v5971_v49 = vadd.f32 %v2029_v42, %v2009_v6  ;;  %v1750_v29 = vadd.f32 -5.0, %v1734_v11  ;;  %7818 = vst [vmem:[#allocation22_spill] sm:$0xff] %v5975_v20  ;;  %v1839_v15 = vadd.f32 %v3841_v52, %v1838_v35  ;;  %v5983_v63 = vadd.f32 0.001, %v1579_v36 }
 0x27e   : > { %v1751_v19 = vadd.f32 -5.0, %v1735_v7  ;;  %7821 = vst [vmem:[#allocation3_spill] sm:$0xff] %v5979_v40  ;;  %v2686_v42 = vadd.f32 %v2685_v1, %v2684_v53  ;;  %v1827_v38 = vadd.f32 %v3842_v3, %v1826_v33  ;;  %v5992_v50 = vadd.f32 %v7825_v9, %v7824_v34  ;;  %v7827_v3 = vld [vmem:[#allocation2_spill] sm:$0xff]  ;;  %v7828_v33 = vld [vmem:[#allocation29_spill] sm:$0xff] }
 0x27f   : > { %7823 = vst [vmem:[#allocation4_spill] sm:$0xff] %v5983_v63  ;;  %v1766_v12 = vsel %vm1296_vm13, 5.000001, %v1750_v29  ;;  %v1840_v60 = vadd.f32 %v3843_v41, %v1839_v15  ;;  %v7829_v1 = vld [vmem:[#allocation6_spill] sm:$0xff] }
 0x280   : > { %vm1788_vm14 = vcmp.ge.f32.partialorder %v5694_v58, %v1766_v12  ;;  %v1767_v55 = vsel %vm1296_vm13, 5.000001, %v1751_v19  ;;  %7826 = vst [vmem:[#allocation24_spill] sm:$0xff] %v5992_v50  ;;  %v6000_v58 = vadd.f32 %v7827_v3, %v7824_v34  ;;  %v6004_v11 = vadd.f32 %v7829_v1, %v7828_v33  ;;  %v7837_v1 = vld [vmem:[#allocation11_spill] sm:$0xff] }
 0x281   : > { %v3844_v6 = vsel %vm1788_vm14, 1.0, %v7776_v4  ;;  %vm1789_vm0 = vcmp.ge.f32.partialorder %v5710_v56, %v1767_v55  ;;  %4086 = vrcp.f32 %v2686_v42  ;;  %v2096_v56 = vrot.slane %v5979_v40, 7 }
 0x282   : > { %v1828_v52 = vadd.f32 %v3844_v6, %v1827_v38  ;;  %v2010_v36 = vmul.f32 %v3844_v6, %v5983_v63  ;;  %v3845_v53 = vsel %vm1789_vm0, 1.0, %v7776_v4  ;;  %7830 = vst [vmem:[#allocation5_spill] sm:$0xff] %v6004_v11  ;;  %v2095_v29 = vrot.slane %v5992_v50, 7  ;;  %v7831_v38 = vld [vmem:[#allocation78_spill] sm:$0xff]  ;;  %v7845_v50 = vld [vmem:[#allocation16_spill] sm:$0xff] }
 0x283   : > { %v1841_v18 = vadd.f32 %v3845_v53, %v1840_v60  ;;  %v1580_v55 = vmul.f32 0.936, %v7831_v38  ;;  %v7600_v34 = vrot.slane %v6000_v58, 7  ;;  %v2098_v9 = vrot.slane %v6004_v11, 7  ;;  %v7832_v60 = vld [vmem:[#allocation7_spill] sm:$0xff]  ;;  %v7834_v6 = vld [vmem:[#allocation30_spill] sm:$0xff] }
 0x284   : > { %v1829_v41 = vrot.slane %v1828_v52, 4  ;;  %v2018_v7 = vadd.f32 %v2017_v27, %v2010_v36  ;;  %v6014_v42 = vadd.f32 %v7832_v60, %v7819_v31  ;;  %v7835_v36 = vld [vmem:[#allocation10_spill] sm:$0xff]  ;;  %v6022_v35 = vadd.f32 %v7837_v1, %v7828_v33  ;;  %v7844_v33 = vld [vmem:[#allocation15_spill] sm:$0xff] }
 0x285   : > { %v1842_v19 = vrot.slane %v1841_v18, 4  ;;  %v6018_v3 = vadd.f32 %v7835_v36, %v7834_v6  ;;  %v7840_v38 = vrot.slane %v5975_v20, 7  ;;  %v7843_v36 = vld [vmem:[#allocation31_spill] sm:$0xff]  ;;  %v6044_v57 = vadd.f32 %v7845_v50, %v7834_v6  ;;  %v1055_v50 = vpop.f32.mrf.mxu0 }
 0x286   : > { %v1830_v15 = vadd.f32 %v1829_v41, %v1828_v52  ;;  %v2019_v12 = vrot.slane %v2018_v7, 4  ;;  %7833 = vst [vmem:[#allocation2_spill] sm:$0xff] %v6014_v42  ;;  %v6028_v41 = vsel %vm2108_vm1, %v7600_v34, %v2096_v56  ;;  %v6040_v1 = vadd.f32 %v7844_v33, %v7843_v36 }
 0x287   : > { %v1843_v27 = vadd.f32 %v1842_v19, %v1841_v18  ;;  %7836 = vst [vmem:[#allocation29_spill] sm:$0xff] %v6018_v3  ;;  %v6034_v31 = vsel %vm2108_vm1, %v7840_v38, %v2095_v29  ;;  %v1198_v18 = vpop.f32.mrf.mxu1  ;;  %v6036_v60 = vpop.eup %4086  ;;  %v6046_v11 = vadd.f32 0.001, %v1580_v55  ;;  %v6050_v20 = vsel %vm2108_vm1, %v2096_v56, %v2098_v9  ;;  %v7850_v55 = vld [vmem:[#allocation26_spill] sm:$0xff] }
 0x288   : > { %7838 = vst [vmem:[#allocation6_spill] sm:$0xff] %v6022_v35  ;;  %v1831_v52 = vrot.slane %v1830_v15, 2  ;;  %v2020_v19 = vadd.f32 %v2019_v12, %v2018_v7  ;;  %v2097_v38 = vrot.slane %v6014_v42, 7  ;;  %v7848_v7 = vld [vmem:[#allocation32_spill] sm:$0xff]  ;;  %v7849_v12 = vld [vmem:[#allocation19_spill] sm:$0xff]  ;;  %v2100_v33 = vrot.slane %v6018_v3, 7 }
 0x289   : > { %7839 = vst [vmem:[#allocation78_spill] sm:$0xff] %v6028_v41  ;;  %v1844_v63 = vrot.slane %v1843_v27, 2  ;;  %v2099_v40 = vrot.slane %v6022_v35, 7  ;;  %v6066_v42 = vmul.f32 %v6036_v60, %v5634_v43  ;;  %v2102_v3 = vrot.slane %v6040_v1, 7 }
 0x28a   : > { %7841 = vst [vmem:[#allocation7_spill] sm:$0xff] %v6034_v31  ;;  %v1832_v34 = vadd.f32 %v1831_v52, %v1830_v15  ;;  %v6055_v31 = vadd.f32 %v7849_v12, %v7848_v7  ;;  %v2011_v15 = vmul.f32 %v3845_v53, %v6046_v11  ;;  %v7851_v52 = vld [vmem:[#allocation23_spill] sm:$0xff]  ;;  %v2021_v56 = vrot.slane %v2020_v19, 2 }
 0x28b   : > { %7842 = vst [vmem:[#allocation30_spill] sm:$0xff] %v6036_v60  ;;  %v6062_v0 = vadd.f32 %v7851_v52, %v7850_v55  ;;  %v6070_v12 = vmul.f32 %v6036_v60, %v5638_v8  ;;  %v7610_v35 = vrot.slane %v6044_v57, 7  ;;  %v6083_v43 = vadd.f32 %v1055_v50, %v7816_v25 }
 0x28c   : > { %7846 = vst [vmem:[#allocation10_spill] sm:$0xff] %v6046_v11  ;;  %v1833_v6 = vrot.slane %v1832_v34, 1  ;;  %v6075_v53 = vadd.f32 %v5971_v49, %v2011_v15  ;;  %v2104_v52 = vrot.slane %v6055_v31, 7  ;;  %v7854_v11 = vld [vmem:[#allocation20_spill] sm:$0xff]  ;;  %v6087_v8 = vsel %vm2108_vm1, %v2095_v29, %v2097_v38  ;;  %v7856_v49 = vld [vmem:[#allocation25_spill] sm:$0xff] }
 0x28d   : > { %7847 = vst [vmem:[#allocation11_spill] sm:$0xff] %v6050_v20  ;;  %v6080_v41 = vadd.f32 %v7854_v11, %v7843_v36  ;;  %v2106_v11 = vrot.slane %v6062_v0, 7  ;;  %v7857_v36 = vld [vmem:[#allocation28_spill] sm:$0xff]  ;;  %v6104_v29 = vmul.f32 %v6036_v60, %v5649_v45  ;;  %v2092_v50 = vrot.slane %v6083_v43, 7 }
 0x28e   : > { %7852 = vst [vmem:[#allocation31_spill] sm:$0xff] %v6066_v42  ;;  %v1834_v20 = vadd.f32 %v1833_v6, %v1832_v34  ;;  %v1845_v42 = vadd.f32 %v1844_v63, %v1843_v27  ;;  %v6091_v34 = vsel %vm2108_vm1, %v2098_v9, %v2100_v33  ;;  %v6095_v6 = vadd.f32 %v7856_v49, %v7848_v7 }
 0x28f   : > { %7853 = vst [vmem:[#allocation15_spill] sm:$0xff] %v6070_v12  ;;  %v6100_v25 = vadd.f32 %v7857_v36, %v7850_v55  ;;  %v2022_v63 = vadd.f32 %v2021_v56, %v2020_v19  ;;  %v6108_v9 = vsel %vm2108_vm1, %v2097_v38, %v2099_v40  ;;  %v6112_v27 = vsel %vm2108_vm1, %v2100_v33, %v2102_v3  ;;  %v1201_v38 = vpop.f32.mrf.mxu1  ;;  %v7861_v56 = vld [vmem:[#allocation12_spill] sm:$0xff]  ;;  %v7862_v36 = vld [vmem:[#allocation13_spill] sm:$0xff] }
 0x290   : > { %7855 = vst [vmem:[#allocation16_spill] sm:$0xff] %v6087_v8  ;;  %v1848_v15 = vmax.f32 %v1834_v20, 0.0  ;;  %v6118_v20 = vsel %vm2108_vm1, %v2099_v40, %v7610_v35  ;;  %v6124_v45 = vsel %vm2108_vm1, %v2102_v3, %v2104_v52  ;;  %v1846_v55 = vrot.slane %v1845_v42, 1 }
 0x291   : > { %7858 = vst [vmem:[#allocation32_spill] sm:$0xff] %v6104_v29  ;;  %v6137_v40 = vsel %vm2108_vm1, %v2104_v52, %v2106_v11  ;;  %v6141_v49 = vadd.f32 %v1198_v18, %v7861_v56  ;;  %v6144_v33 = vadd.f32 %v1201_v38, %v7862_v36  ;;  %v7863_v29 = vrot.slane %v6000_v58, 7 }
 0x292   : > { %7859 = vst [vmem:[#allocation19_spill] sm:$0xff] %v6108_v9  ;;  %v6120_v7 = vmin.f32 %v1848_v15, 63.0  ;;  %v2023_v15 = vrot.slane %v2022_v63, 1  ;;  %v1847_v38 = vadd.f32 %v1846_v55, %v1845_v42 }
 0x293   : > { %7860 = vst [vmem:[#allocation26_spill] sm:$0xff] %v6118_v20  ;;  %v2121_v52 = vsel %vm2108_vm1, %v2092_v50, %v7863_v29  ;;  %v2123_v29 = vsel %vm2108_vm1, %v2106_v11, %v2092_v50 }
 0x294   : > { %vm1852_vm4 = vcmp.eq.f32.partialorder %v5673_v21, %v6120_v7  ;;  %vm1854_vm7 = vcmp.eq.f32.partialorder %v5696_v51, %v6120_v7  ;;  %vm1856_vm8 = vcmp.eq.f32.partialorder %v5734_v47, %v6120_v7  ;;  %vm1858_vm2 = vcmp.eq.f32.partialorder %v5783_v46, %v6120_v7 }
 0x295   : > { %v3846_v35 = vsel %vm1852_vm4, 1.0, %v7776_v4  ;;  %v3848_v19 = vsel %vm1854_vm7, 1.0, %v7776_v4  ;;  %vm1860_vm11 = vcmp.eq.f32.partialorder %v5818_v59, %v6120_v7  ;;  %v6157_v18 = vsel %vm1856_vm8, 1.0, %v7776_v4 }
 0x296   : > { %vm1862_vm14 = vcmp.eq.f32.partialorder %v5870_v44, %v6120_v7  ;;  %vm1864_vm0 = vcmp.eq.f32.partialorder %v5910_v26, %v6120_v7  ;;  %v1902_v56 = vmul.f32 %v3846_v35, %v5661_v14  ;;  %v1904_v36 = vmul.f32 %v3848_v19, %v5698_v5 }
 0x297   : > { %vm1866_vm4 = vcmp.eq.f32.partialorder %v5950_v16, %v6120_v7  ;;  %v6170_v3 = vsel %vm1858_vm2, 1.0, %v7776_v4  ;;  %v2024_v42 = vadd.f32 %v2023_v15, %v2022_v63  ;;  %v1906_v55 = vmul.f32 %v6157_v18, %v5736_v48 }
 0x298   : > { %v1918_v12 = vadd.f32 %v1904_v36, %v1902_v56  ;;  %v1950_v60 = vmul.f32 %v3846_v35, %v5241_v10  ;;  %v1952_v14 = vmul.f32 %v3848_v19, %v5191_v32  ;;  %v6177_v5 = vsel %vm1860_vm11, 1.0, %v7776_v4 }
 0x299   : > { %v6180_v11 = vsel %vm1862_vm14, 1.0, %v7776_v4  ;;  %v6183_v50 = vsel %vm1864_vm0, 1.0, %v7776_v4  ;;  %v1849_v20 = vmax.f32 %v1847_v38, 0.0  ;;  %v1908_v63 = vmul.f32 %v6170_v3, %v5785_v37 }
 0x29a   : > { %v1919_v15 = vadd.f32 %v1918_v12, %v1906_v55  ;;  %v1954_v48 = vmul.f32 %v6157_v18, %v5175_v62  ;;  %v1966_v10 = vadd.f32 %v1952_v14, %v1950_v60  ;;  %v6190_v32 = vsel %vm1866_vm4, 1.0, %v7776_v4 }
 0x29b   : > { %v6192_v56 = vmul.f32 10.0, %v2024_v42  ;;  %v2044_v36 = vmul.f32 %v3846_v35, %v5729_v17  ;;  %v2046_v9 = vmul.f32 %v3848_v19, %v5731_v23  ;;  %v1910_v38 = vmul.f32 %v6177_v5, %v5830_v22 }
 0x29c   : > { %v1920_v8 = vadd.f32 %v1919_v15, %v1908_v63  ;;  %v1956_v37 = vmul.f32 %v6170_v3, %v5167_v24  ;;  %v1967_v12 = vadd.f32 %v1966_v10, %v1954_v48  ;;  %v1912_v62 = vmul.f32 %v6180_v11, %v5872_v61  ;;  %v7864_v10 = vld [vmem:[#allocation79_spill] sm:$0xff] }
 0x29d   : > { %v1914_v60 = vmul.f32 %v6183_v50, %v5912_v13  ;;  %v1958_v42 = vmul.f32 %v6177_v5, %v7784_v30  ;;  %v6206_v17 = vmin.f32 %v1849_v20, 63.0  ;;  %v2048_v22 = vmul.f32 %v6157_v18, %v5780_v28 }
 0x29e   : > { %v1921_v23 = vadd.f32 %v1920_v8, %v1910_v38  ;;  %v1968_v55 = vadd.f32 %v1967_v12, %v1956_v37  ;;  %v2060_v14 = vadd.f32 %v2046_v9, %v2044_v36  ;;  %v1916_v24 = vmul.f32 %v6190_v32, %v5952_v39  ;;  %v7865_v8 = vld [vmem:[#allocation62_spill] sm:$0xff]  ;;  %v7866_v37 = vld [vmem:[#allocation75_spill] sm:$0xff] }
 0x29f   : > { %v1960_v61 = vmul.f32 %v6180_v11, %v7794_v2  ;;  %v2125_v63 = vmul.f32 %v3846_v35, %v2123_v29  ;;  %v2127_v15 = vmul.f32 %v3848_v19, %v2121_v52  ;;  %v2050_v30 = vmul.f32 %v6170_v3, %v7864_v10  ;;  %v7867_v9 = vld [vmem:[#allocation78_spill] sm:$0xff] }
 0x2a0   : > { %v1922_v13 = vadd.f32 %v1921_v23, %v1912_v62  ;;  %v1969_v48 = vadd.f32 %v1968_v55, %v1958_v42  ;;  %v2061_v20 = vadd.f32 %v2060_v14, %v2048_v22  ;;  %v1962_v38 = vmul.f32 %v6183_v50, %v7865_v8  ;;  %v7868_v62 = vld [vmem:[#allocation61_spill] sm:$0xff]  ;;  %v7869_v23 = vld [vmem:[#allocation11_spill] sm:$0xff] }
 0x2a1   : > { %v2052_v28 = vmul.f32 %v6177_v5, %v7866_v37  ;;  %v2129_v39 = vmul.f32 %v6157_v18, %v7867_v9  ;;  %v2141_v36 = vadd.f32 %v2127_v15, %v2125_v63  ;;  %v2199_v52 = vmul.f32 %v3846_v35, %v6083_v43  ;;  %v7870_v37 = vld [vmem:[#allocation84_spill] sm:$0xff]  ;;  %v7872_v15 = vld [vmem:[#allocation3_spill] sm:$0xff] }
 0x2a2   : > { %v1923_v12 = vadd.f32 %v1922_v13, %v1914_v60  ;;  %v1970_v2 = vadd.f32 %v1969_v48, %v1960_v61  ;;  %v2062_v29 = vadd.f32 %v2061_v20, %v2050_v30  ;;  %v1964_v42 = vmul.f32 %v6190_v32, %v7868_v62  ;;  %v7871_v60 = vld [vmem:[#allocation82_spill] sm:$0xff] }
 0x2a3   : > { %v2131_v55 = vmul.f32 %v6170_v3, %v7869_v23  ;;  %v2142_v22 = vadd.f32 %v2141_v36, %v2129_v39  ;;  %v2201_v14 = vmul.f32 %v3848_v19, %v6000_v58  ;;  %v2054_v9 = vmul.f32 %v6180_v11, %v7870_v37  ;;  %v7873_v19 = vld [vmem:[#allocation4_spill] sm:$0xff]  ;;  %v7874_v39 = vld [vmem:[#allocation5_spill] sm:$0xff] }
 0x2a4   : > { %v1924_v10 = vadd.f32 %v1923_v12, %v1916_v24  ;;  %v1971_v8 = vadd.f32 %v1970_v2, %v1962_v38  ;;  %v2063_v63 = vadd.f32 %v2062_v29, %v2052_v28  ;;  %v2056_v61 = vmul.f32 %v6183_v50, %v7871_v60  ;;  %v6242_v12 = vpop.f32.mrf.mxu1  ;;  %v7875_v23 = vld [vmem:[#allocation29_spill] sm:$0xff] }
 0x2a5   : > { %v2133_v35 = vmul.f32 %v6177_v5, %v6091_v34  ;;  %v2143_v43 = vadd.f32 %v2142_v22, %v2131_v55  ;;  %v2203_v13 = vmul.f32 %v6157_v18, %v7872_v15  ;;  %v2215_v58 = vadd.f32 %v2201_v14, %v2199_v52 }
 0x2a6   : > { %v1925_v48 = vrot.slane %v1924_v10, 4  ;;  %v1972_v30 = vadd.f32 %v1971_v8, %v1964_v42  ;;  %v2064_v20 = vadd.f32 %v2063_v63, %v2054_v9  ;;  %v2058_v24 = vmul.f32 %v6190_v32, %v7873_v19 }
 0x2a7   : > { %v2135_v38 = vmul.f32 %v6180_v11, %v6112_v27  ;;  %v2144_v28 = vadd.f32 %v2143_v43, %v2133_v35  ;;  %v2205_v36 = vmul.f32 %v6170_v3, %v7874_v39  ;;  %v2216_v18 = vadd.f32 %v2215_v58, %v2203_v13 }
 0x2a8   : > { %v1926_v34 = vadd.f32 %v1925_v48, %v1924_v10  ;;  %v1973_v2 = vrot.slane %v1972_v30, 4  ;;  %v2065_v29 = vadd.f32 %v2064_v20, %v2056_v61  ;;  %v2137_v62 = vmul.f32 %v6183_v50, %v6124_v45 }
 0x2a9   : > { %v2139_v52 = vmul.f32 %v6190_v32, %v6137_v40  ;;  %v2145_v42 = vadd.f32 %v2144_v28, %v2135_v38  ;;  %v2207_v27 = vmul.f32 %v6177_v5, %v7875_v23  ;;  %v2217_v3 = vadd.f32 %v2216_v18, %v2205_v36  ;;  %v7876_v36 = vld [vmem:[#allocation106_spill] sm:$0xff] }
 0x2aa   : > { %v1927_v55 = vrot.slane %v1926_v34, 2  ;;  %v1974_v22 = vadd.f32 %v1973_v2, %v1972_v30  ;;  %v2066_v14 = vadd.f32 %v2065_v29, %v2058_v24  ;;  %v2209_v10 = vmul.f32 %v6180_v11, %v6040_v1  ;;  %v7877_v2 = vld [vmem:[#allocation112_spill] sm:$0xff] }
 0x2ab   : > { %v2146_v8 = vadd.f32 %v2145_v42, %v2137_v62  ;;  %vm1853_vm7 = vcmp.eq.f32.partialorder %v5673_v21, %v6206_v17  ;;  %vm1855_vm8 = vcmp.eq.f32.partialorder %v5696_v51, %v6206_v17  ;;  %v2218_v9 = vadd.f32 %v2217_v3, %v2207_v27 }
 0x2ac   : > { %v1928_v45 = vadd.f32 %v1927_v55, %v1926_v34  ;;  %v1975_v40 = vrot.slane %v1974_v22, 2  ;;  %v2067_v37 = vrot.slane %v2066_v14, 4  ;;  %v6257_v5 = vadd.f32 -5.0, %v6192_v56 }
 0x2ad   : > { %v2147_v63 = vadd.f32 %v2146_v8, %v2139_v52  ;;  %v2211_v60 = vmul.f32 %v6183_v50, %v6055_v31  ;;  %v2032_v61 = vrot.slane %v6075_v53, 4  ;;  %v2219_v43 = vadd.f32 %v2218_v9, %v2209_v10  ;;  %v7878_v9 = vld [vmem:[#allocation114_spill] sm:$0xff] }
 0x2ae   : > { %v1929_v1 = vrot.slane %v1928_v45, 1  ;;  %v1976_v11 = vadd.f32 %v1975_v40, %v1974_v22  ;;  %v2068_v35 = vadd.f32 %v2067_v37, %v2066_v14  ;;  %v2213_v13 = vmul.f32 %v6190_v32, %v6062_v0  ;;  %v1207_v0 = vpop.f32.mrf.mxu1 }
 0x2af   : > { %v2148_v15 = vrot.slane %v2147_v63, 4  ;;  %v6268_v56 = vsel %vm1853_vm7, 1.0, %v7776_v4  ;;  %v6274_v31 = vsel %vm1855_vm8, 1.0, %v7776_v4  ;;  %v2220_v20 = vadd.f32 %v2219_v43, %v2211_v60 }
 0x2b0   : > { %v1930_v50 = vadd.f32 %v1929_v1, %v1928_v45  ;;  %v1977_v48 = vrot.slane %v1976_v11, 1  ;;  %v2069_v30 = vrot.slane %v2068_v35, 2  ;;  %vm1900_vm2 = vcmp.eq.f32.partialorder %v6120_v7, 63.0  ;;  %v7879_v1 = vld [vmem:[#allocation118_spill] sm:$0xff] }
 0x2b1   : > { %v2149_v58 = vadd.f32 %v2148_v15, %v2147_v63  ;;  %vm1857_vm11 = vcmp.eq.f32.partialorder %v5734_v47, %v6206_v17  ;;  %vm1859_vm14 = vcmp.eq.f32.partialorder %v5783_v46, %v6206_v17  ;;  %v2221_v38 = vadd.f32 %v2220_v20, %v2213_v13  ;;  %v7882_v20 = vld [vmem:[#allocation8_spill] sm:$0xff]  ;;  %v7923_v47 = vld [vmem:[#allocation26_spill] sm:$0xff] }
 0x2b2   : > { %v1944_v32 = vmul.f32 10.0, %v1930_v50  ;;  %v1978_v19 = vadd.f32 %v1977_v48, %v1976_v11  ;;  %v2070_v24 = vadd.f32 %v2069_v30, %v2068_v35  ;;  %v2042_v28 = vsub.f32 5.0, %v6257_v5  ;;  %v7880_v35 = vld [vmem:[#allocation72_spill] sm:$0xff]  ;;  %v7881_v48 = vld [vmem:[#allocation71_spill] sm:$0xff] }
 0x2b3   : > { %v2150_v39 = vrot.slane %v2149_v58, 2  ;;  %v1903_v34 = vmul.f32 %v6268_v56, %v7876_v36  ;;  %v1905_v29 = vmul.f32 %v6274_v31, %v7877_v2  ;;  %v2222_v52 = vrot.slane %v2221_v38, 4 }
 0x2b4   : > { %v6286_v18 = vadd.f32 -5.0, %v1944_v32  ;;  %v2071_v62 = vrot.slane %v2070_v24, 1  ;;  %vm1861_vm0 = vcmp.eq.f32.partialorder %v5818_v59, %v6206_v17  ;;  %vm1863_vm4 = vcmp.eq.f32.partialorder %v5870_v44, %v6206_v17 }
 0x2b5   : > { %v2151_v42 = vadd.f32 %v2150_v39, %v2149_v58  ;;  %v6296_v23 = vsel %vm1857_vm11, 1.0, %v7776_v4  ;;  %v6302_v27 = vsel %vm1859_vm14, 1.0, %v7776_v4  ;;  %v1992_v22 = vmul.f32 10.0, %v1978_v19  ;;  %v7883_v58 = vld [vmem:[#allocation77_spill] sm:$0xff] }
 0x2b6   : > { %v1948_v55 = vsub.f32 5.0, %v6286_v18  ;;  %v2072_v14 = vadd.f32 %v2071_v62, %v2070_v24  ;;  %v2223_v3 = vadd.f32 %v2222_v52, %v2221_v38  ;;  %vm1865_vm7 = vcmp.eq.f32.partialorder %v5910_v26, %v6206_v17  ;;  %v7884_v19 = vld [vmem:[#allocation9_spill] sm:$0xff]  ;;  %v7885_v24 = vld [vmem:[#allocation27_spill] sm:$0xff]  ;;  %v6349_v36 = vpop.f32.mrf.mxu1 }
 0x2b7   : > { %vm1867_vm8 = vcmp.eq.f32.partialorder %v5950_v16, %v6206_v17  ;;  %v6310_v8 = vsel %vm1861_vm0, 1.0, %v7776_v4  ;;  %v1931_v10 = vadd.f32 %v1905_v29, %v1903_v34  ;;  %v1907_v63 = vmul.f32 %v6296_v23, %v7878_v9  ;;  %v7886_v29 = vld [vmem:[#allocation64_spill] sm:$0xff] }
 0x2b8   : > { %v6314_v45 = vsel %vm1900_vm2, %v1948_v55, %v1992_v22  ;;  %v2086_v40 = vmul.f32 10.0, %v2072_v14  ;;  %v2224_v37 = vrot.slane %v2223_v3, 2  ;;  %v2152_v60 = vrot.slane %v2151_v42, 1  ;;  %v7887_v14 = vld [vmem:[#allocation14_spill] sm:$0xff]  ;;  %v7898_v55 = vld [vmem:[#allocation119_spill] sm:$0xff] }
 0x2b9   : > { %4088 = vrcp.f32 %v6314_v45  ;;  %v1909_v11 = vmul.f32 %v6302_v27, %v7879_v1  ;;  %v1951_v43 = vmul.f32 %v6268_v56, %v7880_v35  ;;  %v1932_v50 = vadd.f32 %v1931_v10, %v1907_v63  ;;  %v7888_v10 = vld [vmem:[#allocation17_spill] sm:$0xff]  ;;  %v7889_v35 = vld [vmem:[#allocation63_spill] sm:$0xff] }
 0x2ba   : > { %v6325_v15 = vsel %vm1900_vm2, %v2042_v28, %v2086_v40  ;;  %v2225_v13 = vadd.f32 %v2224_v37, %v2223_v3  ;;  %v1953_v30 = vmul.f32 %v6274_v31, %v7881_v48  ;;  %v6331_v32 = vadd.f32 %v7883_v58, %v7882_v20  ;;  %v7890_v48 = vld [vmem:[#allocation121_spill] sm:$0xff] }
 0x2bb   : > { %v6335_v38 = vadd.f32 %v7885_v24, %v7884_v19  ;;  %v6341_v39 = vsel %vm1863_vm4, 1.0, %v7776_v4  ;;  %v6347_v28 = vsel %vm1865_vm7, 1.0, %v7776_v4  ;;  %v6355_v2 = vsel %vm1867_vm8, 1.0, %v7776_v4 }
 0x2bc   : > { %v2226_v34 = vrot.slane %v2225_v13, 1  ;;  %v1911_v62 = vmul.f32 %v6310_v8, %v7886_v29  ;;  %v1933_v52 = vadd.f32 %v1932_v50, %v1909_v11  ;;  %v6365_v3 = vadd.f32 %v6242_v12, %v7887_v14  ;;  %v7891_v12 = vld [vmem:[#allocation123_spill] sm:$0xff]  ;;  %v7895_v29 = vld [vmem:[#allocation69_spill] sm:$0xff] }
 0x2bd   : > { %v2614_v22 = vmax.f32 %v6335_v38, %v6144_v33  ;;  %v6368_v40 = vadd.f32 %v1207_v0, %v7888_v10  ;;  %v6370_v37 = vadd.f32 %v2152_v60, %v2151_v42  ;;  %v1979_v63 = vadd.f32 %v1953_v30, %v1951_v43  ;;  %v7892_v0 = vld [vmem:[#allocation70_spill] sm:$0xff]  ;;  %v7893_v30 = vld [vmem:[#allocation115_spill] sm:$0xff] }
 0x2be   : > { %v1934_v9 = vadd.f32 %v1933_v52, %v1911_v62  ;;  %v2033_v1 = vadd.f32 %v2032_v61, %v6075_v53  ;;  %v1913_v50 = vmul.f32 %v6341_v39, %v7889_v35  ;;  %v1915_v20 = vmul.f32 %v6347_v28, %v7890_v48  ;;  %v7894_v61 = vld [vmem:[#allocation116_spill] sm:$0xff]  ;;  %v1213_v26 = vpop.f32.mrf.mxu1 }
 0x2bf   : > { %v4089_v11 = vpop.eup %4088  ;;  %v1917_v58 = vmul.f32 %v6355_v2, %v7891_v12  ;;  %v1955_v42 = vmul.f32 %v6296_v23, %v7892_v0  ;;  %v6383_v60 = vadd.f32 %v2226_v34, %v2225_v13  ;;  %v2045_v53 = vmul.f32 %v6268_v56, %v7893_v30  ;;  %v7896_v48 = vld [vmem:[#allocation68_spill] sm:$0xff] }
 0x2c0   : > { %v2274_v43 = vmul.f32 %v4089_v11, %v6314_v45  ;;  %v2047_v19 = vmul.f32 %v6274_v31, %v7894_v61  ;;  %vm2278_vm11 = vweird.f32 %v6314_v45  ;;  %v1935_v24 = vadd.f32 %v1934_v9, %v1913_v50 }
 0x2c1   : > { %v1957_v62 = vmul.f32 %v6302_v27, %v7895_v29  ;;  %v1980_v52 = vadd.f32 %v1979_v63, %v1955_v42  ;;  %v2169_v14 = vmin.f32 %v6370_v37, 20.0  ;;  %v2282_v13 = vand.u32 2147483647, %v6314_v45  ;;  %v7897_v63 = vld [vmem:[#allocation67_spill] sm:$0xff] }
 0x2c2   : > { %v2275_v10 = vsub.f32 1.0, %v2274_v43  ;;  %v2284_v34 = vand.u32 2147483648, %v6314_v45  ;;  %v1936_v35 = vadd.f32 %v1935_v24, %v1915_v20  ;;  %v1959_v12 = vmul.f32 %v6310_v8, %v7896_v48  ;;  %v7899_v48 = vld [vmem:[#allocation66_spill] sm:$0xff] }
 0x2c3   : > { %v1981_v0 = vadd.f32 %v1980_v52, %v1957_v62  ;;  %v2034_v30 = vrot.slane %v2033_v1, 2  ;;  %v2243_v61 = vmin.f32 %v6383_v60, 20.0  ;;  %vm2279_vm14 = vweird.f32 %v4089_v11 }
 0x2c4   : > { %v2276_v9 = vmul.f32 %v4089_v11, %v2275_v10  ;;  %v2073_v50 = vadd.f32 %v2047_v19, %v2045_v53  ;;  %v1937_v29 = vadd.f32 %v1936_v35, %v1917_v58  ;;  %v1961_v42 = vmul.f32 %v6341_v39, %v7897_v63  ;;  %vm2280_vm0 = vmor %vm2278_vm11, %vm2279_vm14 }
 0x2c5   : > { %v1982_v43 = vadd.f32 %v1981_v0, %v1959_v12  ;;  %v2049_v16 = vmul.f32 %v6296_v23, %v7898_v55  ;;  %v2171_v20 = vmul.f32 1.442695, %v2169_v14  ;;  %v2285_v44 = vor.u32 1.1754944e-38, %v2284_v34  ;;  %v7900_v12 = vld [vmem:[#allocation83_spill] sm:$0xff]  ;;  %v7901_v0 = vld [vmem:[#allocation21_spill] sm:$0xff] }
 0x2c6   : > { %v2277_v24 = vadd.f32 %v4089_v11, %v2276_v9  ;;  %v1963_v62 = vmul.f32 %v6347_v28, %v7899_v48  ;;  %v1938_v52 = vrot.slane %v1937_v29, 4  ;;  %v2035_v58 = vadd.f32 %v2034_v30, %v2033_v1  ;;  %v7903_v1 = vld [vmem:[#allocation65_spill] sm:$0xff]  ;;  %v7904_v30 = vld [vmem:[#allocation18_spill] sm:$0xff] }
 0x2c7   : > { %v1983_v53 = vadd.f32 %v1982_v43, %v1961_v42  ;;  %v2074_v19 = vadd.f32 %v2073_v50, %v2049_v16  ;;  %v2245_v10 = vmul.f32 1.442695, %v2243_v61  ;;  %vm2283_vm4 = vcmp.eq.f32.partialorder %v2282_v13, 8.507059e+37  ;;  %v7905_v50 = vld [vmem:[#allocation22_spill] sm:$0xff] }
 0x2c8   : > { %v2281_v35 = vsel %vm2280_vm0, %v4089_v11, %v2277_v24  ;;  %v2051_v55 = vmul.f32 %v6302_v27, %v7900_v12  ;;  %v6410_v14 = vadd.f32 %v1213_v26, %v7901_v0  ;;  %v1939_v9 = vadd.f32 %v1938_v52, %v1937_v29  ;;  %v7908_v24 = vld [vmem:[#allocation120_spill] sm:$0xff] }
 0x2c9   : > { %v6412_v34 = vsel %vm2283_vm4, %v2285_v44, %v2281_v35  ;;  %v1984_v63 = vadd.f32 %v1983_v53, %v1963_v62  ;;  %4090 = vpow2.f32 %v2171_v20  ;;  %v1965_v16 = vmul.f32 %v6355_v2, %v7903_v1  ;;  %v7910_v53 = vld [vmem:[#allocation81_spill] sm:$0xff] }
 0x2ca   : > { %7902 = vst [vmem:[#allocation23_spill] sm:$0xff] %v6410_v14  ;;  %v6416_v45 = vmul.f32 %v6412_v34, %v6325_v15  ;;  %v2075_v11 = vadd.f32 %v2074_v19, %v2051_v55  ;;  %v2616_v13 = vmax.f32 %v2614_v22, %v6368_v40  ;;  %v6423_v61 = vadd.f32 %v6349_v36, %v7904_v30 }
 0x2cb   : > { %v1940_v26 = vrot.slane %v1939_v9, 2  ;;  %v2036_v44 = vrot.slane %v2035_v58, 1  ;;  %v7906_v29 = vrot.slane %v7905_v50, 7  ;;  %v7907_v42 = vrot.slane %v6100_v25, 7 }
 0x2cc   : > { %4092 = vpow2.f32 %v2245_v10  ;;  %v1985_v20 = vadd.f32 %v1984_v63, %v1965_v16  ;;  %v2053_v48 = vmul.f32 %v6310_v8, %v7908_v24  ;;  %v7909_v22 = vmax.f32 %v6331_v32, %v6141_v49  ;;  %v7911_v10 = vld [vmem:[#allocation7_spill] sm:$0xff]  ;;  %v7916_v24 = vld [vmem:[#allocation73_spill] sm:$0xff] }
 0x2cd   : > { %v2124_v43 = vsel %vm2108_vm1, %v7907_v42, %v7906_v29  ;;  %v2618_v62 = vmax.f32 %v2616_v13, %v6410_v14  ;;  %v1941_v52 = vadd.f32 %v1940_v26, %v1939_v9  ;;  %v2055_v19 = vmul.f32 %v6341_v39, %v7910_v53 }
 0x2ce   : > { %v2615_v36 = vmax.f32 %v7909_v22, %v6365_v3  ;;  %v1986_v35 = vrot.slane %v1985_v20, 4  ;;  %v2076_v12 = vadd.f32 %v2075_v11, %v2053_v48  ;;  %v2126_v55 = vmul.f32 %v6268_v56, %v2124_v43 }
 0x2cf   : > { %v2128_v0 = vmul.f32 %v6274_v31, %v7911_v10  ;;  %v7912_v63 = vrot.slane %v6080_v41, 7  ;;  %v7913_v1 = vrot.slane %v6044_v57, 7  ;;  %v1942_v9 = vrot.slane %v1941_v52, 1  ;;  %v6450_v26 = vpop.eup %4090 }
 0x2d0   : > { %v2617_v13 = vmax.f32 %v2615_v36, %v6423_v61  ;;  %v2037_v30 = vadd.f32 %v2036_v44, %v2035_v58  ;;  %v7914_v11 = vrot.slane %v6095_v6, 7  ;;  %v1987_v43 = vadd.f32 %v1986_v35, %v1985_v20 }
 0x2d1   : > { %v2114_v16 = vsel %vm2108_vm1, %v7913_v1, %v7912_v63  ;;  %v7915_v29 = vmov %v7912_v63  ;;  %v2057_v48 = vmul.f32 %v6347_v28, %v7916_v24  ;;  %v2077_v22 = vadd.f32 %v2076_v12, %v2055_v19  ;;  %v7919_v63 = vld [vmem:[#allocation10_spill] sm:$0xff] }
 0x2d2   : > { %v2112_v42 = vsel %vm2108_vm1, %v7915_v29, %v7914_v11  ;;  %v7917_v53 = vrot.slane %v6100_v25, 7  ;;  %v7918_v36 = vmov %v7914_v11  ;;  %v6466_v44 = vmax.f32 %v2617_v13, %v2618_v62  ;;  %v6470_v59 = vpop.eup %4092  ;;  %v7920_v11 = vld [vmem:[#allocation16_spill] sm:$0xff] }
 0x2d3   : > { %v1943_v10 = vadd.f32 %v1942_v9, %v1941_v52  ;;  %v2059_v1 = vmul.f32 %v6355_v2, %v7919_v63  ;;  %v1988_v20 = vrot.slane %v1987_v43, 2  ;;  %v2078_v35 = vadd.f32 %v2077_v22, %v2057_v48 }
 0x2d4   : > { %v2110_v58 = vsel %vm2108_vm1, %v7918_v36, %v7917_v53  ;;  %v2130_v19 = vmul.f32 %v6296_v23, %v7920_v11  ;;  %v2154_v12 = vadd.f32 %v2128_v0, %v2126_v55  ;;  %v2175_v29 = vadd.f32 1.0, %v6450_v26  ;;  %v7921_v53 = vld [vmem:[#allocation19_spill] sm:$0xff]  ;;  %v7922_v0 = vld [vmem:[#allocation24_spill] sm:$0xff] }
 0x2d5   : > { %v2178_v24 = vmul.f32 -0.5, %v6450_v26  ;;  %vm1901_vm7 = vcmp.eq.f32.partialorder %v6206_v17, 63.0  ;;  %v1945_v62 = vmul.f32 10.0, %v1943_v10  ;;  %v2039_v13 = vmul.f32 10.0, %v2037_v30 }
 0x2d6   : > { %v1989_v52 = vadd.f32 %v1988_v20, %v1987_v43  ;;  %v2079_v9 = vadd.f32 %v2078_v35, %v2059_v1  ;;  %v2132_v36 = vmul.f32 %v6302_v27, %v7921_v53  ;;  %v2155_v63 = vadd.f32 %v2154_v12, %v2130_v19 }
 0x2d7   : > { %v2249_v48 = vadd.f32 1.0, %v6470_v59  ;;  %v1947_v22 = vadd.f32 -5.0, %v1945_v62  ;;  %v2200_v55 = vmul.f32 %v6268_v56, %v7905_v50  ;;  %v2202_v11 = vmul.f32 %v6274_v31, %v7922_v0  ;;  %v7924_v56 = vld [vmem:[#allocation2_spill] sm:$0xff] }
 0x2d8   : > { %v1990_v54 = vrot.slane %v1989_v52, 1  ;;  %v2080_v46 = vrot.slane %v2079_v9, 4  ;;  %v2134_v30 = vmul.f32 %v6310_v8, %v7923_v47  ;;  %v2156_v43 = vadd.f32 %v2155_v63, %v2132_v36  ;;  %v7925_v36 = vld [vmem:[#allocation6_spill] sm:$0xff] }
 0x2d9   : > { %4094 = vlog2.f32 %v2175_v29  ;;  %v2179_v10 = vadd.f32 1.0, %v2178_v24  ;;  %v2252_v1 = vmul.f32 -0.5, %v6470_v59  ;;  %v2136_v20 = vmul.f32 %v6341_v39, %v2114_v16 }
 0x2da   : > { %v1949_v35 = vsub.f32 5.0, %v1947_v22  ;;  %v1991_v19 = vadd.f32 %v1990_v54, %v1989_v52  ;;  %v2081_v12 = vadd.f32 %v2080_v46, %v2079_v9  ;;  %v2157_v62 = vadd.f32 %v2156_v43, %v2134_v30 }
 0x2db   : > { %4096 = vlog2.f32 %v2249_v48  ;;  %v2204_v31 = vmul.f32 %v6296_v23, %v7924_v56  ;;  %v2228_v50 = vadd.f32 %v2202_v11, %v2200_v55  ;;  %v2307_v53 = vrot.slane %v1947_v22, 4 }
 0x2dc   : > { %v1993_v0 = vmul.f32 10.0, %v1991_v19  ;;  %v2082_v14 = vrot.slane %v2081_v12, 2  ;;  %v2138_v47 = vmul.f32 %v6347_v28, %v2112_v42  ;;  %v2158_v29 = vadd.f32 %v2157_v62, %v2136_v20  ;;  %v7927_v20 = vld [vmem:[#allocation30_spill] sm:$0xff] }
 0x2dd   : > { %v2140_v24 = vmul.f32 %v6355_v2, %v2110_v58  ;;  %v2206_v16 = vmul.f32 %v6302_v27, %v7925_v36  ;;  %v2229_v63 = vadd.f32 %v2228_v50, %v2204_v31  ;;  %vm2308_vm8 = vcmask 1043456  }
 0x2de   : > { %v6496_v54 = vsel %vm1901_vm7, %v1949_v35, %v1993_v0  ;;  %v2083_v46 = vadd.f32 %v2082_v14, %v2081_v12  ;;  %v2159_v23 = vadd.f32 %v2158_v29, %v2138_v47  ;;  %v6500_v52 = vsel %vm2308_vm8, %v6286_v18, %v2307_v53  ;;  %v7928_v53 = vld [vmem:[#allocation104_spill] sm:$0xff] }
 0x2df   : > { %v4095_v9 = vpop.eup %4094  ;;  %v6502_v42 = vadd.f32 -5.0, %v2039_v13  ;;  %v2208_v58 = vmul.f32 %v6310_v8, %v6044_v57  ;;  %v2230_v48 = vadd.f32 %v2229_v63, %v2206_v16  ;;  %4098 = vrcp.f32 %v6496_v54  ;;  %v7926_v13 = vld [vmem:[#allocation103_spill] sm:$0xff] }
 0x2e0   : > { %v2620_v27 = vrot.slane %v6466_v44, 4  ;;  %v2181_v22 = vand.u32 2147483647, %v6450_v26  ;;  %v2084_v55 = vrot.slane %v2083_v46, 1  ;;  %v2160_v14 = vadd.f32 %v2159_v23, %v2140_v24 }
 0x2e1   : > { %v4097_v11 = vpop.eup %4096  ;;  %v2253_v30 = vadd.f32 1.0, %v2252_v1  ;;  %v2210_v18 = vmul.f32 %v6341_v39, %v6080_v41  ;;  %v2231_v43 = vadd.f32 %v2230_v48, %v2208_v58  ;;  %v6513_v35 = vmul.f32 %v7927_v20, %v7926_v13 }
 0x2e2   : > { %v2177_v57 = vmul.f32 0.6931472, %v4095_v9  ;;  %v2180_v8 = vmul.f32 %v6450_v26, %v2179_v10  ;;  %v2085_v19 = vadd.f32 %v2084_v55, %v2083_v46  ;;  %v2161_v12 = vrot.slane %v2160_v14, 4 }
 0x2e3   : > { %v2255_v62 = vand.u32 2147483647, %v6470_v59  ;;  %v2043_v56 = vsub.f32 5.0, %v6502_v42  ;;  %v2212_v1 = vmul.f32 %v6347_v28, %v6095_v6  ;;  %v2232_v31 = vadd.f32 %v2231_v43, %v2210_v18  ;;  %v6531_v6 = vpop.f32.mrf.mxu2 }
 0x2e4   : > { %v2251_v50 = vmul.f32 0.6931472, %v4097_v11  ;;  %v2087_v41 = vmul.f32 10.0, %v2085_v19  ;;  %v2162_v39 = vadd.f32 %v2161_v12, %v2160_v14  ;;  %v6522_v0 = vmul.f32 %v7927_v20, %v7928_v53 }
 0x2e5   : > { %v4099_v47 = vpop.eup %4098  ;;  %vm6524_vm11 = vcmp.lt.f32.partialorder %v2181_v22, 0.0004427343  ;;  %v2254_v10 = vmul.f32 %v6470_v59, %v2253_v30  ;;  %v2214_v29 = vmul.f32 %v6355_v2, %v6100_v25  ;;  %v2233_v24 = vadd.f32 %v2232_v31, %v2212_v1 }
 0x2e6   : > { %v2183_v28 = vsel %vm6524_vm11, %v2180_v8, %v2177_v57  ;;  %v6537_v36 = vsel %vm1901_vm7, %v2043_v56, %v2087_v41  ;;  %v2163_v16 = vrot.slane %v2162_v39, 2  ;;  %v2289_v63 = vmul.f32 %v4099_v47, %v6496_v54 }
 0x2e7   : > { %v2621_v46 = vmax.f32 %v6466_v44, %v2620_v27  ;;  %vm2167_vm14 = vcmp.gt.f32.partialorder %v6370_v37, 20.0  ;;  %vm6542_vm0 = vcmp.lt.f32.partialorder %v2255_v62, 0.0004427343  ;;  %v2234_v25 = vadd.f32 %v2233_v24, %v2214_v29  ;;  %v7933_v44 = vld [vmem:[#allocation97_spill] sm:$0xff] }
 0x2e8   : > { %vm2241_vm4 = vcmp.gt.f32.partialorder %v6383_v60, 20.0  ;;  %v2257_v2 = vsel %vm6542_vm0, %v2254_v10, %v2251_v50  ;;  %v2164_v23 = vadd.f32 %v2163_v16, %v2162_v39  ;;  %v2290_v9 = vsub.f32 1.0, %v2289_v63  ;;  %v7934_v62 = vld [vmem:[#allocation105_spill] sm:$0xff] }
 0x2e9   : > { %v2193_v58 = vsel %vm2167_vm14, %v6370_v37, %v2183_v28  ;;  %v2235_v48 = vrot.slane %v2234_v25, 4  ;;  %v2299_v22 = vand.u32 2147483648, %v6496_v54  ;;  %v2832_v27 = vadd.f32 %v6531_v6, %v7933_v44  ;;  %v7935_v24 = vld [vmem:[#allocation109_spill] sm:$0xff] }
 0x2ea   : > { %v2165_v55 = vrot.slane %v2164_v23, 1  ;;  %v2291_v14 = vmul.f32 %v4099_v47, %v2290_v9  ;;  %vm2294_vm11 = vweird.f32 %v4099_v47  ;;  %v2297_v11 = vand.u32 2147483647, %v6496_v54 }
 0x2eb   : > { %v2622_v30 = vrot.slane %v2621_v46, 2  ;;  %v2267_v18 = vsel %vm2241_vm4, %v6383_v60, %v2257_v2  ;;  %v2236_v43 = vadd.f32 %v2235_v48, %v2234_v25  ;;  %v2195_v13 = vadd.f32 0.001, %v2193_v58  ;;  %v6563_v60 = vpop.f32.mrf.mxu2 }
 0x2ec   : > { %v6555_v57 = vadd.f32 %v2165_v55, %v2164_v23  ;;  %v2292_v8 = vadd.f32 %v4099_v47, %v2291_v14  ;;  %vm2293_vm14 = vweird.f32 %v6496_v54  ;;  %v2300_v19 = vor.u32 1.1754944e-38, %v2299_v22  ;;  %v7937_v22 = vld [vmem:[#allocation31_spill] sm:$0xff] }
 0x2ed   : > { %v2237_v37 = vrot.slane %v2236_v43, 2  ;;  %vm2295_vm0 = vmor %vm2293_vm14, %vm2294_vm11  ;;  %v2848_v12 = vmul.f32 10.0, %v2832_v27  ;;  %v6560_v56 = vmul.f32 %v7927_v20, %v7934_v62  ;;  %v2269_v1 = vadd.f32 0.001, %v2267_v18 }
 0x2ee   : > { %v2170_v31 = vmin.f32 %v6555_v57, 20.0  ;;  %v2296_v50 = vsel %vm2295_vm0, %v4099_v47, %v2292_v8  ;;  %vm2298_vm4 = vcmp.eq.f32.partialorder %v2297_v11, 8.507059e+37  ;;  %v2623_v41 = vmax.f32 %v2621_v46, %v2622_v30  ;;  %v7936_v47 = vld [vmem:[#allocation95_spill] sm:$0xff] }
 0x2ef   : > { %v2238_v39 = vadd.f32 %v2237_v37, %v2236_v43  ;;  %v2301_v53 = vsel %vm2298_vm4, %v2300_v19, %v2296_v50  ;;  %v2310_v54 = vrot.slane %v6500_v52, 6  ;;  %v2896_v28 = vperm.slane %v7935_v24, 3  ;;  %v7938_v43 = vld [vmem:[#allocation108_spill] sm:$0xff]  ;;  %v7940_v50 = vld [vmem:[#allocation15_spill] sm:$0xff] }
 0x2f0   : > { %v2173_v26 = vmul.f32 1.442695, %v2170_v31  ;;  %v6567_v10 = vmul.f32 %v2301_v53, %v6537_v36  ;;  %v2315_v29 = vrot.slane %v2301_v53, 4  ;;  %vm2090_vm11 = vcmp.eq.f32.partialorder %v6120_v7, 0.0 }
 0x2f1   : > { %v2239_v16 = vrot.slane %v2238_v39, 1  ;;  %v2864_v63 = vadd.f32 -5.0, %v2848_v12  ;;  %v2834_v59 = vadd.f32 %v6563_v60, %v7936_v47  ;;  %v2197_v25 = vsel %vm2090_vm11, 1.0, %v2195_v13 }
 0x2f2   : > { %v2271_v46 = vsel %vm1900_vm2, 1.0, %v2269_v1  ;;  %4100 = vpow2.f32 %v2173_v26  ;;  %v2316_v52 = vsel %vm2308_vm8, %v6412_v34, %v2315_v29  ;;  %v2312_v23 = vsub.f32 %v7935_v24, %v2310_v54 }
 0x2f3   : > { %v6577_v2 = vadd.f32 %v2239_v16, %v2238_v39  ;;  %v2317_v9 = vrot.slane %v2316_v52, 6  ;;  %v2850_v58 = vmul.f32 10.0, %v2834_v59  ;;  %v2624_v48 = vrot.slane %v2623_v41, 1 }
 0x2f4   : > { %v2718_v27 = vmul.f32 0.936, %v7937_v22  ;;  %v6581_v55 = vperm.slane %v2896_v28, 3  ;;  %v2880_v7 = vsel %vm1289_vm3, 5.000001, %v2864_v63  ;;  %v2341_v18 = vadd.f32 %v2271_v46, %v2197_v25 }
 0x2f5   : > { %v2244_v14 = vmin.f32 %v6577_v2, 20.0  ;;  %v2319_v11 = vmul.f32 %v2317_v9, %v2312_v23  ;;  %v2866_v30 = vadd.f32 -5.0, %v2850_v58  ;;  %v2343_v34 = vmul.f32 2.0, %v6416_v45 }
 0x2f6   : > { %v6589_v13 = vmul.f32 %v7927_v20, %v7938_v43  ;;  %v6597_v1 = vmax.f32 %v2623_v41, %v2624_v48  ;;  %v6599_v31 = vadd.f32 0.001, %v2718_v27  ;;  %vm2902_vm2 = vcmp.ge.f32.partialorder %v6581_v55, %v2880_v7 }
 0x2f7   : > { %v2247_v8 = vmul.f32 1.442695, %v2244_v14  ;;  %v6591_v37 = vmul.f32 %v2319_v11, %v2319_v11  ;;  %v6593_v19 = vsub.f32 1.0, %v2319_v11  ;;  %v2882_v12 = vsel %vm1290_vm5, 5.000001, %v2866_v30 }
 0x2f8   : > { %v4101_v62 = vpop.eup %4100  ;;  %7939 = vst [vmem:[#allocation20_spill] sm:$0xff] %v6599_v31  ;;  %v2720_v39 = vmul.f32 0.936, %v7940_v50  ;;  %vm2904_vm14 = vcmp.ge.f32.partialorder %v6581_v55, %v2882_v12  ;;  %v2345_v16 = vsub.f32 %v2341_v18, %v2343_v34  ;;  %v6609_v63 = vmul.f32 2.0, %v6567_v10 }
 0x2f9   : > { %v2184_v53 = vadd.f32 1.0, %v4101_v62  ;;  %v2187_v54 = vmul.f32 -0.5, %v4101_v62  ;;  %4102 = vpow2.f32 %v2247_v8  ;;  %v2322_v26 = vmul.f32 %v6593_v19, %v2319_v11 }
 0x2fa   : > { %v2324_v29 = vperm.slane %v6591_v37, 2  ;;  %v7628_v28 = vperm.slane %v6591_v37, 6  ;;  %v2392_v41 = vperm.slane %v6593_v19, 2  ;;  %v6612_v59 = vsel %vm2902_vm2, 1.0, %v7776_v4 }
 0x2fb   : > { %4104 = vlog2.f32 %v2184_v53  ;;  %v2331_v9 = vperm.slane %v2322_v26, 2  ;;  %v6620_v58 = vperm.slane %v2322_v26, 6  ;;  %v2188_v48 = vadd.f32 1.0, %v2187_v54 }
 0x2fc   : > { %v2328_v52 = vmul.f32 %v2324_v29, %v6416_v45  ;;  %v6618_v23 = vmul.f32 %v7628_v28, %v6567_v10  ;;  %v2396_v22 = vmul.f32 %v2392_v41, %v2197_v25  ;;  %v6622_v27 = vadd.f32 0.001, %v2720_v39 }
 0x2fd   : > { %v6627_v14 = vsel %vm2904_vm14, 1.0, %v7776_v4  ;;  %v2335_v11 = vmul.f32 %v2331_v9, %v2197_v25  ;;  %v2347_v7 = vmul.f32 %v2345_v16, %v2331_v9  ;;  %v2387_v30 = vmul.f32 %v2343_v34, %v2331_v9 }
 0x2fe   : > { %7941 = vst [vmem:[#allocation25_spill] sm:$0xff] %v6622_v27  ;;  %v6631_v18 = vmul.f32 %v6609_v63, %v6620_v58  ;;  %v2190_v8 = vand.u32 2147483647, %v4101_v62  ;;  %v2385_v50 = vmul.f32 %v2324_v29, %v2271_v46  ;;  %v3124_v53 = vmul.f32 %v6612_v59, %v6599_v31 }
 0x2ff   : > { %v4103_v43 = vpop.eup %4102  ;;  %v3126_v39 = vmul.f32 %v6627_v14, %v6622_v27  ;;  %v2627_v12 = vsub.f32 %v6331_v32, %v6597_v1  ;;  %v2629_v25 = vsub.f32 %v6335_v38, %v6597_v1  ;;  %v2337_v54 = vadd.f32 %v2335_v11, %v2328_v52 }
 0x300   : > { %v2258_v34 = vadd.f32 1.0, %v4103_v43  ;;  %v2261_v16 = vmul.f32 -0.5, %v4103_v43  ;;  %v6642_v9 = vadd.f32 %v2347_v7, %v6416_v45  ;;  %v2389_v46 = vadd.f32 %v2387_v30, %v2385_v50 }
 0x301   : > { %v4105_v26 = vpop.eup %4104  ;;  %v6644_v29 = vadd.f32 %v3126_v39, %v3124_v53  ;;  %v2189_v31 = vmul.f32 %v4101_v62, %v2188_v48  ;;  %v2398_v27 = vmul.f32 %v2396_v22, %v2392_v41  ;;  %vm2191_vm0 = vcmp.lt.f32.partialorder %v2190_v8, 0.0004427343  ;;  %v7942_v22 = vld [vmem:[#allocation110_spill] sm:$0xff] }
 0x302   : > { %v2186_v28 = vmul.f32 0.6931472, %v4105_v26  ;;  %4106 = vlog2.f32 %v2258_v34  ;;  %v6647_v32 = vmul.f32 %v2337_v54, %v6325_v15  ;;  %v2383_v38 = vmul.f32 %v6416_v45, %v6416_v45 }
 0x303   : > { %4108 = vrcp.f32 %v6642_v9  ;;  %vm2168_vm4 = vcmp.gt.f32.partialorder %v6555_v57, 20.0  ;;  %v2400_v11 = vadd.f32 %v2398_v27, %v2389_v46  ;;  %v2644_v7 = vmul.f32 1.442695, %v2627_v12 }
 0x304   : > { %v2192_v52 = vsel %vm2191_vm0, %v2189_v31, %v2186_v28  ;;  %v2262_v50 = vadd.f32 1.0, %v2261_v16  ;;  %4110 = vlog2.f32 %v6642_v9  ;;  %v2648_v62 = vmul.f32 1.442695, %v2629_v25 }
 0x305   : > { %v2194_v30 = vsel %vm2168_vm4, %v6555_v57, %v2192_v52  ;;  %v2264_v48 = vand.u32 2147483647, %v4103_v43  ;;  %v2402_v15 = vmul.f32 %v2400_v11, %v2383_v38  ;;  %vm2091_vm11 = vcmp.eq.f32.partialorder %v6206_v17, 0.0 }
 0x306   : > { %v2196_v41 = vadd.f32 0.001, %v2194_v30  ;;  %v6658_v8 = vmul.f32 %v7927_v20, %v7942_v22  ;;  %v2631_v31 = vsub.f32 %v6141_v49, %v6597_v1  ;;  %v2263_v53 = vmul.f32 %v4103_v43, %v2262_v50 }
 0x307   : > { %4112 = vlog2.f32 %v2402_v15  ;;  %vm2265_vm2 = vcmp.lt.f32.partialorder %v2264_v48, 0.0004427343  ;;  %v2393_v25 = vperm.slane %v6593_v19, 6  ;;  %v2633_v34 = vsub.f32 %v6144_v33, %v6597_v1 }
 0x308   : > { %v4107_v45 = vpop.eup %4106  ;;  %v2198_v28 = vsel %vm2091_vm11, 1.0, %v2196_v41  ;;  %4114 = vpow2.f32 %v2644_v7  ;;  %vm2242_vm14 = vcmp.gt.f32.partialorder %v6577_v2, 20.0  ;;  %v2652_v26 = vmul.f32 1.442695, %v2631_v31 }
 0x309   : > { %v4109_v57 = vpop.eup %4108  ;;  %v2260_v27 = vmul.f32 0.6931472, %v4107_v45  ;;  %v2336_v39 = vmul.f32 %v6620_v58, %v2198_v28  ;;  %4116 = vpow2.f32 %v2648_v62  ;;  %v2360_v19 = vand.u32 2147483647, %v6642_v9 }
 0x30a   : > { %v2352_v12 = vmul.f32 %v4109_v57, %v6642_v9  ;;  %v4111_v20 = vpop.eup %4110  ;;  %v2362_v11 = vand.u32 2147483648, %v6642_v9  ;;  %v2635_v33 = vsub.f32 %v6365_v3, %v6597_v1  ;;  %vm2357_vm0 = vweird.f32 %v4109_v57 }
 0x30b   : > { %v2266_v49 = vsel %vm2265_vm2, %v2263_v53, %v2260_v27  ;;  %v2338_v54 = vadd.f32 %v2336_v39, %v6618_v23  ;;  %v2409_v46 = vmul.f32 0.6931472, %v4111_v20  ;;  %v2397_v23 = vmul.f32 %v2393_v25, %v2198_v28 }
 0x30c   : > { %v2268_v43 = vsel %vm2242_vm14, %v6577_v2, %v2266_v49  ;;  %v2353_v16 = vsub.f32 1.0, %v2352_v12  ;;  %v2656_v2 = vmul.f32 1.442695, %v2633_v34  ;;  %vm2356_vm4 = vweird.f32 %v6642_v9 }
 0x30d   : > { %v2270_v38 = vadd.f32 0.001, %v2268_v43  ;;  %v6671_v52 = vmul.f32 %v2338_v54, %v6537_v36  ;;  %v4113_v7 = vpop.eup %4112  ;;  %v6683_v36 = vmul.f32 2.0, %v2409_v46  ;;  %v7943_v3 = vperm.slane %v6591_v37, 6  ;;  %vm2358_vm11 = vmor %vm2356_vm4, %vm2357_vm0  ;;  %v7944_v46 = vld [vmem:[#allocation92_spill] sm:$0xff] }
 0x30e   : > { %v2354_v30 = vmul.f32 %v4109_v57, %v2353_v16  ;;  %v6677_v50 = vpop.eup %4114  ;;  %v6681_v41 = vmul.f32 0.6931472, %v4113_v7  ;;  %4118 = vpow2.f32 %v2652_v26  ;;  %vm2361_vm2 = vcmp.eq.f32.partialorder %v2360_v19, 8.507059e+37  ;;  %v6714_v16 = vpop.f32.mrf.mxu2 }
 0x30f   : > { %v2272_v62 = vsel %vm1901_vm7, 1.0, %v2270_v38  ;;  %v6685_v48 = vpop.eup %4116  ;;  %v2363_v31 = vor.u32 1.1754944e-38, %v2362_v11  ;;  %v2399_v12 = vmul.f32 %v2397_v23, %v2393_v25  ;;  %v2384_v49 = vmul.f32 %v6567_v10, %v6567_v10  ;;  %v7945_v11 = vld [vmem:[#allocation23_spill] sm:$0xff] }
 0x310   : > { %v2342_v15 = vadd.f32 %v2272_v62, %v2198_v28  ;;  %v2355_v22 = vadd.f32 %v4109_v57, %v2354_v30  ;;  %v2386_v45 = vmul.f32 %v7943_v3, %v2272_v62  ;;  %v2414_v17 = vsub.f32 %v6681_v41, %v6683_v36  ;;  %v7953_v36 = vld [vmem:[#allocation88_spill] sm:$0xff] }
 0x311   : > { %v2660_v28 = vmul.f32 1.442695, %v2635_v33  ;;  %v2687_v9 = vadd.f32 %v6685_v48, %v6677_v50  ;;  %4120 = vpow2.f32 %v2656_v2  ;;  %v2639_v43 = vsub.f32 %v6423_v61, %v6597_v1 }
 0x312   : > { %v2346_v27 = vsub.f32 %v2342_v15, %v6609_v63  ;;  %v2359_v53 = vsel %vm2358_vm11, %v4109_v57, %v2355_v22  ;;  %v2390_v39 = vadd.f32 %v6631_v18, %v2386_v45  ;;  %v2637_v63 = vsub.f32 %v6368_v40, %v6597_v1  ;;  %v7946_v15 = vld [vmem:[#allocation32_spill] sm:$0xff] }
 0x313   : > { %v2364_v20 = vsel %vm2361_vm2, %v2363_v31, %v2359_v53  ;;  %4122 = vpow2.f32 %v2660_v28  ;;  %v2836_v38 = vadd.f32 %v6714_v16, %v7944_v46  ;;  %v2641_v7 = vsub.f32 %v7945_v11, %v6597_v1  ;;  %v7948_v11 = vld [vmem:[#allocation90_spill] sm:$0xff] }
 0x314   : > { %v2348_v37 = vmul.f32 %v2346_v27, %v6620_v58  ;;  %v2365_v34 = vmul.f32 %v2364_v20, %v6647_v32  ;;  %v2401_v54 = vadd.f32 %v2399_v12, %v2390_v39  ;;  %v6706_v26 = vpop.eup %4118  ;;  %v2664_v32 = vmul.f32 1.442695, %v2637_v63  ;;  %v7947_v20 = vld [vmem:[#allocation113_spill] sm:$0xff] }
 0x315   : > { %v2688_v58 = vadd.f32 %v6706_v26, %v2687_v9  ;;  %v2668_v33 = vmul.f32 1.442695, %v2639_v43  ;;  %v2852_v23 = vmul.f32 10.0, %v2836_v38  ;;  %v2722_v22 = vmul.f32 0.936, %v7946_v15 }
 0x316   : > { %v2350_v18 = vadd.f32 %v2348_v37, %v6567_v10  ;;  %v6704_v57 = vadd.f32 %v2365_v34, %v6257_v5  ;;  %v2403_v25 = vmul.f32 %v2401_v54, %v2384_v49  ;;  %v2672_v53 = vmul.f32 1.442695, %v2641_v7  ;;  %v6732_v54 = vpop.f32.mrf.mxu2 }
 0x317   : > { %v6711_v40 = vpop.eup %4120  ;;  %v2868_v27 = vadd.f32 -5.0, %v2852_v23  ;;  %v6729_v49 = vadd.f32 0.001, %v2722_v22  ;;  %v2838_v7 = vadd.f32 %v6732_v54, %v7948_v11  ;;  %v2724_v15 = vmul.f32 0.936, %v6513_v35 }
 0x318   : > { %4124 = vrcp.f32 %v2350_v18  ;;  %v2689_v10 = vadd.f32 %v6711_v40, %v2688_v58  ;;  %v2375_v39 = vand.u32 2147483647, %v2350_v18  ;;  %v2377_v12 = vand.u32 2147483648, %v2350_v18 }
 0x319   : > { %4126 = vlog2.f32 %v2403_v25  ;;  %v6716_v5 = vpop.eup %4122  ;;  %v2884_v37 = vsel %vm1291_vm9, 5.000001, %v2868_v27  ;;  %vm2371_vm0 = vweird.f32 %v2350_v18  ;;  %v7952_v27 = vld [vmem:[#allocation117_spill] sm:$0xff]  ;;  %vm2416_vm2 = vcmp.ge.f32.partialorder %v7935_v24, -5.0 }
 0x31a   : > { %4128 = vlog2.f32 %v2350_v18  ;;  %v2690_v62 = vadd.f32 %v6716_v5, %v2689_v10  ;;  %vm2906_vm14 = vcmp.ge.f32.partialorder %v6581_v55, %v2884_v37  ;;  %vm2376_vm11 = vcmp.eq.f32.partialorder %v2375_v39, 8.507059e+37 }
 0x31b   : > { %4130 = vpow2.f32 %v2664_v32  ;;  %v6735_v58 = vsel %vm2906_vm14, 1.0, %v7776_v4  ;;  %v2378_v32 = vor.u32 1.1754944e-38, %v2377_v12  ;;  %v6765_v35 = vadd.f32 0.001, %v2724_v15 }
 0x31c   : > { %4132 = vpow2.f32 %v2668_v33  ;;  %v3128_v43 = vmul.f32 %v6735_v58, %v6729_v49  ;;  %v7954_v37 = vmov 0 }
 0x31d   : > { %4134 = vpow2.f32 %v2672_v53 }
 0x31e   : > { %v4125_v19 = vpop.eup %4124 }
 0x31f   : > { %v4127_v30 = vpop.eup %4126  ;;  %v2367_v61 = vmul.f32 %v4125_v19, %v2350_v18  ;;  %vm2372_vm7 = vweird.f32 %v4125_v19  ;;  %v3141_v18 = vadd.f32 %v6644_v29, %v3128_v43  ;;  %v6756_v29 = vpop.f32.mrf.mxu2 }
 0x320   : > { %v4129_v2 = vpop.eup %4128  ;;  %v2407_v45 = vmul.f32 0.6931472, %v4127_v30  ;;  %vm2373_vm4 = vmor %vm2371_vm0, %vm2372_vm7  ;;  %vm2417_vm7 = vcmp.le.f32.partialorder %v7935_v24, 5.0 }
 0x321   : > { %v2368_v3 = vsub.f32 1.0, %v2367_v61  ;;  %v2411_v31 = vmul.f32 0.6931472, %v4129_v2  ;;  %v6724_v28 = vpop.eup %4130  ;;  %vm6773_vm0 = vmand %vm2416_vm2, %vm2417_vm7 }
 0x322   : > { %v2691_v34 = vadd.f32 %v6724_v28, %v2690_v62  ;;  %v6741_v33 = vpop.eup %4132  ;;  %v6750_v62 = vpop.f32.mrf.mxu3  ;;  %v7955_v37 = vsel %vm6773_vm0, 4294967295, %v7954_v37 }
 0x323   : > { %v2369_v1 = vmul.f32 %v4125_v19, %v2368_v3  ;;  %v2413_v9 = vmul.f32 2.0, %v2411_v31  ;;  %7949 = vst [vmem:[#allocation28_spill] sm:$0xff] %v6741_v33 }
 0x324   : > { %v2692_v61 = vadd.f32 %v6741_v33, %v2691_v34  ;;  %7950 = vst [vmem:[#allocation12_spill] sm:$0xff] %v6750_v62  ;;  %v7979_v33 = vld [vmem:[#allocation55_spill] sm:$0xff] }
 0x325   : > { %v2370_v63 = vadd.f32 %v4125_v19, %v2369_v1  ;;  %v2415_v25 = vsub.f32 %v2407_v45, %v2413_v9  ;;  %v6754_v45 = vpop.eup %4134  ;;  %v2726_v9 = vmul.f32 0.936, %v6522_v0  ;;  %7956 = vst [vmem:[#allocation79_spill] sm:$0xff] %v7955_v37 }
 0x326   : > { %7951 = vst [vmem:[#allocation13_spill] sm:$0xff] %v6754_v45  ;;  %v2693_v31 = vadd.f32 %v6754_v45, %v2692_v61  ;;  %v7971_v45 = vld [vmem:[#allocation99_spill] sm:$0xff] }
 0x327   : > { %v2374_v10 = vsel %vm2373_vm4, %v4125_v19, %v2370_v63  ;;  %v2439_v38 = vrot.slane %v2415_v25, 4  ;;  %v2854_v19 = vmul.f32 10.0, %v2838_v7  ;;  %v6787_v0 = vpop.f32.mrf.mxu2 }
 0x328   : > { %v2379_v30 = vsel %vm2376_vm11, %v2378_v32, %v2374_v10  ;;  %v2694_v63 = vrot.slane %v2693_v31, 4 }
 0x329   : > { %v2380_v23 = vmul.f32 %v2379_v30, %v6671_v52  ;;  %v2440_v2 = vsel %vm2308_vm8, %v2414_v17, %v2439_v38  ;;  %v2870_v3 = vadd.f32 -5.0, %v2854_v19  ;;  %v2840_v17 = vadd.f32 %v6756_v29, %v7953_v36  ;;  %v7959_v30 = vld [vmem:[#allocation87_spill] sm:$0xff] }
 0x32a   : > { %v6782_v10 = vpop.f32.mrf.mxu3  ;;  %v6784_v38 = vadd.f32 0.001, %v2726_v9  ;;  %v2842_v61 = vadd.f32 %v6787_v0, %v7959_v30  ;;  %v2441_v19 = vrot.slane %v2440_v2, 6 }
 0x32b   : > { %v2382_v22 = vadd.f32 %v2380_v23, %v6502_v42  ;;  %v2886_v41 = vsel %vm1292_vm12, 5.000001, %v2870_v3  ;;  %v2856_v39 = vmul.f32 10.0, %v2840_v17  ;;  %7958 = vst [vmem:[#allocation62_spill] sm:$0xff] %v6782_v10  ;;  %v2695_v23 = vadd.f32 %v2694_v63, %v2693_v31 }
 0x32c   : > { %vm2908_vm14 = vcmp.ge.f32.partialorder %v6581_v55, %v2886_v41  ;;  %v2858_v15 = vmul.f32 10.0, %v2842_v61  ;;  %v7961_v3 = vmov 0  ;;  %v2728_v41 = vmul.f32 0.936, %v6560_v56 }
 0x32d   : > { %v2421_v52 = vrot.slane %v2382_v22, 4  ;;  %v3885_v53 = vsel %vm2908_vm14, 1.0, %v7776_v4  ;;  %v2872_v34 = vadd.f32 -5.0, %v2856_v39  ;;  %v7960_v22 = vlaneseq }
 0x32e   : > { %v3130_v1 = vmul.f32 %v3885_v53, %v6765_v35  ;;  %v2874_v17 = vadd.f32 -5.0, %v2858_v15  ;;  %v2443_v31 = vsel %vm6773_vm0, %v2441_v19, 0.0  ;;  %v2730_v19 = vmul.f32 0.936, %v6589_v13 }
 0x32f   : > { %v2422_v42 = vsel %vm2308_vm8, %v6704_v57, %v2421_v52  ;;  %v7957_v57 = vld [vmem:[#allocation74_spill] sm:$0xff]  ;;  %v2888_v43 = vsel %vm1293_vm15, 5.000001, %v2872_v34  ;;  %vm6794_vm11 = vcmp.lt.s32.totalorder %v7960_v22, 256  ;;  %v6809_v9 = vpop.f32.mrf.mxu2  ;;  %v2950_v22 = vadd.f32 %v6627_v14, %v6612_v59 }
 0x330   : > { %v2423_v12 = vrot.slane %v2422_v42, 6  ;;  %v3142_v32 = vadd.f32 %v3141_v18, %v3130_v1  ;;  %vm2910_vm4 = vcmp.ge.f32.partialorder %v6581_v55, %v2888_v43  ;;  %v7962_v3 = vsel %vm6794_vm11, 4294967295, %v7961_v3  ;;  %v7965_v34 = vld [vmem:[#allocation86_spill] sm:$0xff] }
 0x331   : > { %v3887_v7 = vsel %vm2910_vm4, 1.0, %v7776_v4  ;;  %7963 = vst [vmem:[#allocation75_spill] sm:$0xff] %v7962_v3  ;;  %v2696_v42 = vrot.slane %v2695_v23, 2  ;;  %v2890_v2 = vsel %vm1294_vm6, 5.000001, %v2874_v17  ;;  %v2844_v63 = vadd.f32 %v6809_v9, %v7965_v34  ;;  %v7967_v17 = vld [vmem:[#allocation76_spill] sm:$0xff] }
 0x332   : > { %v2425_v25 = vsel %vm6773_vm0, %v2423_v12, %v7935_v24  ;;  %v3132_v18 = vmul.f32 %v3887_v7, %v6784_v38  ;;  %v7964_v12 = vld [vmem:[#allocation80_spill] sm:$0xff]  ;;  %v6806_v1 = vadd.f32 0.001, %v2728_v41  ;;  %vm2912_vm2 = vcmp.ge.f32.partialorder %v6581_v55, %v2890_v2 }
 0x333   : > { %2427 = vst [vmem:[#allocation1] sm:$0xff] %v2425_v25  ;;  %v3889_v56 = vsel %vm2912_vm2, 1.0, %v7776_v4  ;;  %v6814_v25 = vpop.f32.mrf.mxu3  ;;  %v2697_v43 = vadd.f32 %v2696_v42, %v2695_v23  ;;  %v2860_v61 = vmul.f32 10.0, %v2844_v63  ;;  %v6823_v2 = vadd.f32 0.001, %v2730_v19 }
 0x334   : > { %v3143_v52 = vadd.f32 %v3142_v32, %v3132_v18  ;;  %7966 = vst [vmem:[#allocation78_spill] sm:$0xff] %v6814_v25  ;;  %v3134_v32 = vmul.f32 %v3889_v56, %v6806_v1 }
 0x335   : > { %v2876_v15 = vadd.f32 -5.0, %v2860_v61  ;;  %v2698_v41 = vrot.slane %v2697_v43, 1 }
 0x336   : > { %v3144_v18 = vadd.f32 %v3143_v52, %v3134_v32  ;;  %v7968_v52 = vld [vmem:[#allocation85_spill] sm:$0xff] }
 0x337   : > { %v6826_v37 = vpop.f32.mrf.mxu2  ;;  %v2699_v14 = vadd.f32 %v2698_v41, %v2697_v43 }
 0x338   : > { %v2846_v13 = vadd.f32 %v6826_v37, %v7968_v52 }
 0x339   : > { %4136 = vrcp.f32 %v2699_v14  ;;  %v7975_v14 = vld [vmem:[#allocation34_spill] sm:$0xff] }
 0x33a   : > { %v2429_v39 = vld [vmem:[#allocation1 + $0x2] ss:$4 sm:$0xff]  ;;  %v2862_v63 = vmul.f32 10.0, %v2846_v13 }
 0x33b   : > { %3862 = vst.msk [vmem:[%s5825_s30 + $0x2] ss:$4 sm:$0x3] %vm6794_vm11, %v2429_v39  ;;  %v2892_v39 = vsel %vm1295_vm10, 5.000001, %v2876_v15  ;;  %v6832_v32 = vpop.f32.mrf.mxu3 }
 0x33c   : > { %2445 = vst [vmem:[#allocation1] sm:$0xff] %v2443_v31  ;;  %v2951_v31 = vadd.f32 %v6735_v58, %v2950_v22  ;;  %vm2914_vm7 = vcmp.ge.f32.partialorder %v6581_v55, %v2892_v39  ;;  %v2878_v19 = vadd.f32 -5.0, %v2862_v63  ;;  %v7970_v22 = vld [vmem:[#allocation122_spill] sm:$0xff]  ;;  %v7976_v63 = vld [vmem:[#allocation100_spill] sm:$0xff] }
 0x33d   : > { %v3891_v23 = vsel %vm2914_vm7, 1.0, %v7776_v4  ;;  %7969 = vst [vmem:[#allocation61_spill] sm:$0xff] %v6832_v32 }
 0x33e   : > { %v2952_v42 = vadd.f32 %v3885_v53, %v2951_v31  ;;  %v3136_v59 = vmul.f32 %v3891_v23, %v6823_v2  ;;  %v2894_v39 = vsel %vm1296_vm13, 5.000001, %v2878_v19  ;;  %v2835_v53 = vadd.f32 %v6782_v10, %v7971_v45 }
 0x33f   : > { %vm2916_vm14 = vcmp.ge.f32.partialorder %v6581_v55, %v2894_v39 }
 0x340   : > { %v2953_v61 = vadd.f32 %v3887_v7, %v2952_v42  ;;  %v6834_v58 = vadd.f32 %v3144_v18, %v3136_v59  ;;  %v6842_v43 = vsel %vm2916_vm14, 1.0, %v7776_v4  ;;  %v7972_v7 = vld [vmem:[#allocation102_spill] sm:$0xff]  ;;  %v2851_v13 = vmul.f32 10.0, %v2835_v53 }
 0x341   : > { %v2833_v18 = vadd.f32 %v6750_v62, %v7972_v7  ;;  %v7973_v42 = vld [vmem:[#allocation98_spill] sm:$0xff]  ;;  %v2897_v7 = vperm.slane %v7935_v24, 7 }
 0x342   : > { %v2954_v15 = vadd.f32 %v3889_v56, %v2953_v61  ;;  %v6847_v56 = vpop.eup %4136  ;;  %v6855_v61 = vadd.f32 %v7976_v63, %v7975_v14  ;;  %v2867_v39 = vadd.f32 -5.0, %v2851_v13  ;;  %v7978_v13 = vld [vmem:[#allocation96_spill] sm:$0xff] }
 0x343   : > { %v6851_v59 = vpop.f32.mrf.mxu3  ;;  %v2849_v19 = vmul.f32 10.0, %v2833_v18  ;;  %v2705_v53 = vmul.f32 %v6847_v56, %v6685_v48  ;;  %v6869_v24 = vperm.slane %v2897_v7, 3 }
 0x344   : > { %v2955_v3 = vadd.f32 %v3891_v23, %v2954_v15  ;;  %v2837_v23 = vadd.f32 %v6814_v25, %v7973_v42  ;;  %7974 = vst [vmem:[#allocation11_spill] sm:$0xff] %v6851_v59  ;;  %v2707_v42 = vmul.f32 %v6847_v56, %v6706_v26  ;;  %v7980_v26 = vrot.slane %v7979_v33, 7  ;;  %v7991_v33 = vld [vmem:[#allocation25_spill] sm:$0xff] }
 0x345   : > { %7977 = vst [vmem:[#allocation84_spill] sm:$0xff] %v6855_v61  ;;  %v2865_v25 = vadd.f32 -5.0, %v2849_v19  ;;  %v2721_v62 = vmul.f32 0.936, %v2705_v53  ;;  %v2711_v53 = vmul.f32 %v6847_v56, %v6716_v5 }
 0x346   : > { %v2956_v41 = vadd.f32 %v6842_v43, %v2955_v3  ;;  %v2703_v3 = vmul.f32 %v6847_v56, %v6677_v50  ;;  %v2853_v45 = vmul.f32 10.0, %v2837_v23  ;;  %v2883_v50 = vsel %vm1290_vm5, 5.000001, %v2867_v39 }
 0x347   : > { %v2839_v23 = vadd.f32 %v6832_v32, %v7978_v13  ;;  %v2723_v48 = vmul.f32 0.936, %v2707_v42  ;;  %vm2905_vm5 = vcmp.ge.f32.partialorder %v6869_v24, %v2883_v50  ;;  %v6898_v50 = vadd.f32 0.001, %v2721_v62 }
 0x348   : > { %v2957_v31 = vrot.slane %v2956_v41, 4  ;;  %v2719_v63 = vmul.f32 0.936, %v2703_v3  ;;  %v2869_v18 = vadd.f32 -5.0, %v2853_v45  ;;  %v2709_v3 = vmul.f32 %v6847_v56, %v6711_v40 }
 0x349   : > { %v2881_v45 = vsel %vm1289_vm3, 5.000001, %v2865_v25  ;;  %v2855_v39 = vmul.f32 10.0, %v2839_v23  ;;  %v6900_v13 = vadd.f32 0.001, %v2723_v48 }
 0x34a   : > { %v2958_v55 = vadd.f32 %v2957_v31, %v2956_v41  ;;  %v3234_v31 = vrot.slane %v6855_v61, 7  ;;  %v6879_v19 = vadd.f32 0.001, %v2719_v63  ;;  %v7984_v63 = vld [vmem:[#allocation35_spill] sm:$0xff]  ;;  %vm2903_vm3 = vcmp.ge.f32.partialorder %v6869_v24, %v2881_v45  ;;  %v7987_v45 = vld [vmem:[#allocation93_spill] sm:$0xff] }
 0x34b   : > { %v6884_v7 = vpop.f32.mrf.mxu3  ;;  %7986 = vst [vmem:[#allocation3_spill] sm:$0xff] %v6900_v13  ;;  %v6908_v5 = vmul.f32 0.936, %v2709_v3  ;;  %v2732_v23 = vmul.f32 0.936, %v6658_v8  ;;  %v2871_v62 = vadd.f32 -5.0, %v2855_v39 }
 0x34c   : > { %v2959_v15 = vrot.slane %v2958_v55, 2  ;;  %7982 = vst [vmem:[#allocation82_spill] sm:$0xff] %v6884_v7  ;;  %v2843_v3 = vadd.f32 %v6884_v7, %v7987_v45  ;;  %v6923_v8 = vsel %vm2903_vm3, 1.0, %v7776_v4 }
 0x34d   : > { %v6955_v7 = vsel %vm1292_vm12, 5.000001, %v2871_v62 }
 0x34e   : > { %v2960_v41 = vadd.f32 %v2959_v15, %v2958_v55  ;;  %v6875_v15 = vsel %vm2108_vm1, %v7980_v26, %v3234_v31  ;;  %v7985_v26 = vrot.slane %v7984_v63, 7 }
 0x350   : > { %v2961_v10 = vrot.slane %v2960_v41, 1  ;;  %v6896_v25 = vsel %vm2108_vm1, %v3234_v31, %v7985_v26  ;;  %v6918_v31 = vmul.f32 0.936, %v2711_v53 }
 0x352   : > { %v2962_v14 = vadd.f32 %v2961_v10, %v2960_v41  ;;  %v2885_v10 = vsel %vm1291_vm9, 5.000001, %v2869_v18  ;;  %v7983_v41 = vld [vmem:[#allocation94_spill] sm:$0xff]  ;;  %v6906_v18 = vsel %vm2905_vm5, 1.0, %v7776_v4 }
 0x353   : > { %v2841_v40 = vadd.f32 %v6851_v59, %v7983_v41  ;;  %vm2907_vm9 = vcmp.ge.f32.partialorder %v6869_v24, %v2885_v10  ;;  %v6935_v39 = vadd.f32 %v6906_v18, %v6923_v8  ;;  %v2859_v59 = vmul.f32 10.0, %v2843_v3 }
 0x354   : > { %v2976_v42 = vmax.f32 %v2962_v14, 0.0  ;;  %v6938_v53 = vsel %vm2907_vm9, 1.0, %v7776_v4 }
 0x355   : > { %v2857_v48 = vmul.f32 10.0, %v2841_v40  ;;  %v6940_v40 = vadd.f32 0.001, %v2732_v23 }
 0x356   : > { %v6902_v14 = vmin.f32 %v2976_v42, 63.0 }
 0x357   : > { %v2873_v23 = vadd.f32 -5.0, %v2857_v48 }
 0x358   : > { %vm2980_vm4 = vcmp.eq.f32.partialorder %v5673_v21, %v6902_v14  ;;  %vm2982_vm2 = vcmp.eq.f32.partialorder %v5696_v51, %v6902_v14  ;;  %vm2984_vm7 = vcmp.eq.f32.partialorder %v7947_v20, %v6902_v14  ;;  %vm2986_vm14 = vcmp.eq.f32.partialorder %v7952_v27, %v6902_v14  ;;  %v6960_v20 = vpop.f32.mrf.mxu3  ;;  %v7990_v21 = vld [vmem:[#allocation20_spill] sm:$0xff] }
 0x359   : > { %v6928_v42 = vsel %vm2980_vm4, 1.0, %v7776_v4  ;;  %v6931_v10 = vsel %vm2982_vm2, 1.0, %v7776_v4  ;;  %v6943_v26 = vsel %vm2984_vm7, 1.0, %v7776_v4  ;;  %vm2988_vm5 = vcmp.eq.f32.partialorder %v7957_v57, %v6902_v14  ;;  %7988 = vst [vmem:[#allocation4_spill] sm:$0xff] %v6960_v20 }
 0x35a   : > { %vm2990_vm3 = vcmp.eq.f32.partialorder %v7964_v12, %v6902_v14  ;;  %v3030_v45 = vmul.f32 %v6928_v42, %v6531_v6  ;;  %v3032_v41 = vmul.f32 %v6931_v10, %v6563_v60  ;;  %v6958_v32 = vsel %vm2986_vm14, 1.0, %v7776_v4 }
 0x35b   : > { %v3034_v55 = vmul.f32 %v6943_v26, %v6714_v16  ;;  %v3078_v6 = vmul.f32 %v6928_v42, %v7933_v44  ;;  %v3080_v60 = vmul.f32 %v6931_v10, %v7936_v47  ;;  %vm2992_vm12 = vcmp.eq.f32.partialorder %v7967_v17, %v6902_v14 }
 0x35c   : > { %v3046_v51 = vadd.f32 %v3032_v41, %v3030_v45  ;;  %vm2994_vm9 = vcmp.eq.f32.partialorder %v7970_v22, %v6902_v14  ;;  %v6973_v62 = vsel %vm2988_vm5, 1.0, %v7776_v4  ;;  %v6976_v48 = vsel %vm2990_vm3, 1.0, %v7776_v4  ;;  %v7989_v45 = vld [vmem:[#allocation91_spill] sm:$0xff] }
 0x35d   : > { %v3036_v16 = vmul.f32 %v6958_v32, %v6732_v54  ;;  %v3082_v44 = vmul.f32 %v6943_v26, %v7944_v46  ;;  %v3094_v47 = vadd.f32 %v3080_v60, %v3078_v6  ;;  %v2845_v3 = vadd.f32 %v6960_v20, %v7989_v45  ;;  %v7992_v45 = vld [vmem:[#allocation40_spill] sm:$0xff] }
 0x35e   : > { %v3047_v41 = vadd.f32 %v3046_v51, %v3034_v55  ;;  %v3138_v27 = vmul.f32 %v6842_v43, %v6940_v40  ;;  %v3172_v61 = vmul.f32 %v6928_v42, %v7990_v21  ;;  %v3174_v13 = vmul.f32 %v6931_v10, %v7991_v33 }
 0x35f   : > { %v3038_v54 = vmul.f32 %v6973_v62, %v6756_v29  ;;  %v3084_v46 = vmul.f32 %v6958_v32, %v7948_v11  ;;  %v3095_v55 = vadd.f32 %v3094_v47, %v3082_v44  ;;  %v6998_v6 = vsel %vm2992_vm12, 1.0, %v7776_v4 }
 0x360   : > { %v3048_v51 = vadd.f32 %v3047_v41, %v3036_v16  ;;  %v7004_v21 = vsel %vm2994_vm9, 1.0, %v7776_v4  ;;  %v3040_v33 = vmul.f32 %v6976_v48, %v6787_v0  ;;  %v3146_v29 = vadd.f32 %v6834_v58, %v3138_v27 }
 0x361   : > { %v3096_v11 = vadd.f32 %v3095_v55, %v3084_v46  ;;  %v3176_v60 = vmul.f32 %v6943_v26, %v6729_v49  ;;  %v3188_v16 = vadd.f32 %v3174_v13, %v3172_v61  ;;  %v3086_v41 = vmul.f32 %v6973_v62, %v7953_v36 }
 0x362   : > { %v3049_v43 = vadd.f32 %v3048_v51, %v3038_v54  ;;  %v3147_v44 = vrot.slane %v3146_v29, 4  ;;  %v3252_v47 = vmul.f32 %v6928_v42, %v6896_v25  ;;  %v3254_v20 = vmul.f32 %v6931_v10, %v7992_v45 }
 0x363   : > { %v3042_v0 = vmul.f32 %v6998_v6, %v6809_v9  ;;  %v3178_v58 = vmul.f32 %v6958_v32, %v6765_v35  ;;  %v3189_v54 = vadd.f32 %v3188_v16, %v3176_v60  ;;  %v2889_v49 = vsel %vm1293_vm15, 5.000001, %v2873_v23  ;;  %v7993_v35 = vld [vmem:[#allocation41_spill] sm:$0xff] }
 0x364   : > { %v3050_v27 = vadd.f32 %v3049_v43, %v3040_v33  ;;  %v2861_v61 = vmul.f32 10.0, %v2845_v3  ;;  %v3097_v36 = vadd.f32 %v3096_v11, %v3086_v41  ;;  %v3148_v13 = vadd.f32 %v3147_v44, %v3146_v29  ;;  %v7994_v16 = vld [vmem:[#allocation45_spill] sm:$0xff] }
 0x365   : > { %v3044_v25 = vmul.f32 %v7004_v21, %v6826_v37  ;;  %v3180_v45 = vmul.f32 %v6973_v62, %v6784_v38  ;;  %v3190_v46 = vadd.f32 %v3189_v54, %v3178_v58  ;;  %v3088_v9 = vmul.f32 %v6976_v48, %v7959_v30 }
 0x366   : > { %v3051_v51 = vadd.f32 %v3050_v27, %v3042_v0  ;;  %v3149_v55 = vrot.slane %v3148_v13, 2  ;;  %v3256_v33 = vmul.f32 %v6943_v26, %v7993_v35  ;;  %v3268_v43 = vadd.f32 %v3254_v20, %v3252_v47  ;;  %v7997_v35 = vld [vmem:[#allocation57_spill] sm:$0xff] }
 0x367   : > { %v2875_v23 = vadd.f32 -5.0, %v2859_v59  ;;  %v3182_v29 = vmul.f32 %v6976_v48, %v6806_v1  ;;  %v3191_v11 = vadd.f32 %v3190_v46, %v3180_v45  ;;  %v3098_v37 = vadd.f32 %v3097_v36, %v3088_v9  ;;  %v7995_v1 = vld [vmem:[#allocation49_spill] sm:$0xff] }
 0x368   : > { %v3052_v3 = vadd.f32 %v3051_v51, %v3044_v25  ;;  %v3150_v60 = vadd.f32 %v3149_v55, %v3148_v13  ;;  %v3258_v38 = vmul.f32 %v6958_v32, %v7994_v16  ;;  %v3269_v41 = vadd.f32 %v3268_v43, %v3256_v33  ;;  %v7996_v13 = vld [vmem:[#allocation53_spill] sm:$0xff] }
 0x369   : > { %vm2909_vm15 = vcmp.ge.f32.partialorder %v6869_v24, %v6955_v7  ;;  %v2877_v30 = vadd.f32 -5.0, %v2861_v61  ;;  %v3184_v44 = vmul.f32 %v6998_v6, %v6823_v2  ;;  %v3192_v20 = vadd.f32 %v3191_v11, %v3182_v29  ;;  %v7070_v29 = vpop.f32.mrf.mxu3 }
 0x36a   : > { %v3053_v59 = vrot.slane %v3052_v3, 4  ;;  %v3090_v47 = vmul.f32 %v6998_v6, %v7965_v34  ;;  %v3260_v0 = vmul.f32 %v6973_v62, %v7995_v1  ;;  %v3270_v27 = vadd.f32 %v3269_v41, %v3258_v38 }
 0x36b   : > { %vm2911_vm4 = vcmp.ge.f32.partialorder %v6869_v24, %v2889_v49  ;;  %v3151_v58 = vrot.slane %v3150_v60, 1  ;;  %v3186_v54 = vmul.f32 %v7004_v21, %v6940_v40  ;;  %v3193_v36 = vadd.f32 %v3192_v20, %v3184_v44 }
 0x36c   : > { %v2891_v61 = vsel %vm1294_vm6, 5.000001, %v2875_v23  ;;  %v3099_v2 = vadd.f32 %v3098_v37, %v3090_v47  ;;  %v3262_v25 = vmul.f32 %v6976_v48, %v7996_v13  ;;  %v3271_v51 = vadd.f32 %v3270_v27, %v3260_v0  ;;  %v7998_v37 = vld [vmem:[#allocation89_spill] sm:$0xff]  ;;  %v7999_v13 = vld [vmem:[#allocation28_spill] sm:$0xff] }
 0x36d   : > { %v2964_v34 = vadd.f32 %v6938_v53, %v6935_v39  ;;  %v7056_v45 = vsel %vm2909_vm15, 1.0, %v7776_v4  ;;  %v2893_v40 = vsel %vm1295_vm10, 5.000001, %v2877_v30  ;;  %v3194_v46 = vadd.f32 %v3193_v36, %v3186_v54 }
 0x36e   : > { %v3054_v9 = vadd.f32 %v3053_v59, %v3052_v3  ;;  %v3092_v55 = vmul.f32 %v7004_v21, %v7968_v52  ;;  %v3264_v33 = vmul.f32 %v6998_v6, %v7997_v35  ;;  %v3272_v43 = vadd.f32 %v3271_v51, %v3262_v25 }
 0x36f   : > { %v7067_v39 = vsel %vm2911_vm4, 1.0, %v7776_v4  ;;  %vm2913_vm6 = vcmp.ge.f32.partialorder %v6869_v24, %v2891_v61  ;;  %v3152_v7 = vadd.f32 %v3151_v58, %v3150_v60  ;;  %v3195_v23 = vrot.slane %v3194_v46, 4 }
 0x370   : > { %v3100_v11 = vadd.f32 %v3099_v2, %v3092_v55  ;;  %v3266_v3 = vmul.f32 %v7004_v21, %v6875_v15  ;;  %v3273_v52 = vadd.f32 %v3272_v43, %v3264_v33  ;;  %v2847_v16 = vadd.f32 %v7070_v29, %v7998_v37 }
 0x371   : > { %v2965_v38 = vadd.f32 %v7056_v45, %v2964_v34  ;;  %v2713_v49 = vmul.f32 %v6847_v56, %v6724_v28  ;;  %vm2915_vm10 = vcmp.ge.f32.partialorder %v6869_v24, %v2893_v40  ;;  %v3196_v41 = vadd.f32 %v3195_v23, %v3194_v46 }
 0x372   : > { %v7081_v60 = vsel %vm2913_vm6, 1.0, %v7776_v4  ;;  %v3055_v30 = vrot.slane %v3054_v9, 2  ;;  %v3274_v44 = vadd.f32 %v3273_v52, %v3266_v3  ;;  %v2863_v20 = vmul.f32 10.0, %v2847_v16  ;;  %v8000_v52 = vld [vmem:[#allocation36_spill] sm:$0xff] }
 0x373   : > { %v7084_v15 = vadd.f32 0.001, %v6908_v5  ;;  %v2966_v59 = vadd.f32 %v7067_v39, %v2965_v38  ;;  %v3166_v47 = vmul.f32 10.0, %v3152_v7  ;;  %v3197_v1 = vrot.slane %v3196_v41, 2 }
 0x374   : > { %v7088_v0 = vsel %vm2915_vm10, 1.0, %v7776_v4  ;;  %v3101_v28 = vrot.slane %v3100_v11, 4  ;;  %v3275_v27 = vrot.slane %v3274_v44, 4  ;;  %v2879_v58 = vadd.f32 -5.0, %v2863_v20  ;;  %v8002_v20 = vld [vmem:[#allocation3_spill] sm:$0xff] }
 0x375   : > { %v3125_v54 = vmul.f32 %v6923_v8, %v6879_v19  ;;  %v2729_v36 = vmul.f32 0.936, %v2713_v49  ;;  %v2967_v61 = vadd.f32 %v7081_v60, %v2966_v59  ;;  %v3198_v2 = vadd.f32 %v3197_v1, %v3196_v41  ;;  %v2447_v41 = vld [vmem:[#allocation1 + $0x2] ss:$4 sm:$0xff] }
 0x376   : > { %v2715_v5 = vmul.f32 %v6847_v56, %v7999_v13  ;;  %v3056_v25 = vadd.f32 %v3055_v30, %v3054_v9  ;;  %v3276_v51 = vadd.f32 %v3275_v27, %v3274_v44  ;;  %v2895_v34 = vsel %vm1296_vm13, 5.000001, %v2879_v58  ;;  %v8001_v30 = vld [vmem:[#allocation13_spill] sm:$0xff]  ;;  %2449 = vst.msk [vmem:[%s7113_s9] ss:$2 sm:$0x3] %vm6794_vm11, %v2447_v41 }
 0x377   : > { %v2968_v40 = vadd.f32 %v7088_v0, %v2967_v61  ;;  %v7099_v46 = vadd.f32 -5.0, %v3166_v47  ;;  %v3199_v55 = vrot.slane %v3198_v2, 1  ;;  %vm2917_vm2 = vcmp.ge.f32.partialorder %v6869_v24, %v2895_v34 }
 0x378   : > { %v7103_v8 = vadd.f32 0.001, %v6918_v31  ;;  %v3102_v35 = vadd.f32 %v3101_v28, %v3100_v11  ;;  %v3277_v33 = vrot.slane %v3276_v51, 2  ;;  %v3894_v43 = vsel %vm2917_vm2, 1.0, %v7776_v4 }
 0x379   : > { %v3127_v9 = vmul.f32 %v6906_v18, %v6898_v50  ;;  %v7108_v7 = vadd.f32 0.001, %v2729_v36  ;;  %v3200_v23 = vadd.f32 %v3199_v55, %v3198_v2  ;;  %v2969_v24 = vadd.f32 %v3894_v43, %v2968_v40  ;;  %v8005_v2 = vld [vmem:[#allocation43_spill] sm:$0xff] }
 0x37a   : > { %v3057_v3 = vrot.slane %v3056_v25, 1  ;;  %v3278_v31 = vadd.f32 %v3277_v33, %v3276_v51  ;;  %v3326_v11 = vmul.f32 %v6928_v42, %v7984_v63  ;;  %v3328_v16 = vmul.f32 %v6931_v10, %v8000_v52  ;;  %v8004_v42 = vld [vmem:[#allocation38_spill] sm:$0xff] }
 0x37b   : > { %v2731_v38 = vmul.f32 0.936, %v2715_v5  ;;  %v3170_v18 = vsub.f32 5.0, %v7099_v46  ;;  %v3214_v49 = vmul.f32 10.0, %v3200_v23  ;;  %v2717_v44 = vmul.f32 %v6847_v56, %v8001_v30 }
 0x37c   : > { %v3129_v59 = vmul.f32 %v6938_v53, %v8002_v20  ;;  %vm3028_vm13 = vcmp.eq.f32.partialorder %v6902_v14, 63.0  ;;  %v3103_v47 = vrot.slane %v3102_v35, 2  ;;  %v3279_v1 = vrot.slane %v3278_v31, 1 }
 0x37d   : > { %v7130_v63 = vsel %vm3028_vm13, %v3170_v18, %v3214_v49  ;;  %v3330_v10 = vmul.f32 %v6943_v26, %v8004_v42  ;;  %v3342_v27 = vadd.f32 %v3328_v16, %v3326_v11  ;;  %v2970_v58 = vrot.slane %v2969_v24, 4  ;;  %v8007_v11 = vld [vmem:[#allocation51_spill] sm:$0xff] }
 0x37e   : > { %v3153_v56 = vadd.f32 %v3127_v9, %v3125_v54  ;;  %v3131_v53 = vmul.f32 %v7056_v45, %v7084_v15  ;;  %v3058_v36 = vadd.f32 %v3057_v3, %v3056_v25  ;;  %v7136_v61 = vadd.f32 %v3279_v1, %v3278_v31  ;;  %v8006_v9 = vld [vmem:[#allocation47_spill] sm:$0xff] }
 0x37f   : > { %v3332_v13 = vmul.f32 %v6958_v32, %v8005_v2  ;;  %v3343_v5 = vadd.f32 %v3342_v27, %v3330_v10  ;;  %v2733_v51 = vmul.f32 0.936, %v2717_v44  ;;  %v2971_v34 = vadd.f32 %v2970_v58, %v2969_v24  ;;  %v8008_v49 = vld [vmem:[#allocation55_spill] sm:$0xff] }
 0x380   : > { %v3154_v40 = vadd.f32 %v3153_v56, %v3129_v59  ;;  %v3133_v55 = vmul.f32 %v7067_v39, %v7103_v8  ;;  %v3104_v26 = vadd.f32 %v3103_v47, %v3102_v35  ;;  %v3296_v33 = vmin.f32 %v7136_v61, 20.0  ;;  %v8009_v47 = vld [vmem:[#allocation84_spill] sm:$0xff]  ;;  %v8011_v56 = vld [vmem:[#allocation101_spill] sm:$0xff] }
 0x381   : > { %v7143_v54 = vadd.f32 0.001, %v2731_v38  ;;  %v3334_v45 = vmul.f32 %v6973_v62, %v8006_v9  ;;  %v3344_v25 = vadd.f32 %v3343_v5, %v3332_v13  ;;  %v2972_v23 = vrot.slane %v2971_v34, 2 }
 0x382   : > { %v3155_v3 = vadd.f32 %v3154_v40, %v3131_v53  ;;  %v3135_v32 = vmul.f32 %v7081_v60, %v7108_v7  ;;  %v3072_v31 = vmul.f32 10.0, %v3058_v36  ;;  %v3298_v24 = vmul.f32 1.442695, %v3296_v33 }
 0x383   : > { %v3336_v52 = vmul.f32 %v6976_v48, %v8007_v11  ;;  %v3345_v39 = vadd.f32 %v3344_v25, %v3334_v45  ;;  %v7151_v35 = vadd.f32 0.001, %v2733_v51  ;;  %v2973_v16 = vadd.f32 %v2972_v23, %v2971_v34  ;;  %v8012_v23 = vld [vmem:[#allocation107_spill] sm:$0xff] }
 0x384   : > { %v3156_v38 = vadd.f32 %v3155_v3, %v3133_v55  ;;  %v3137_v18 = vmul.f32 %v7088_v0, %v7143_v54  ;;  %v3105_v62 = vrot.slane %v3104_v26, 1  ;;  %4138 = vpow2.f32 %v3298_v24  ;;  %v8010_v0 = vld [vmem:[#allocation34_spill] sm:$0xff]  ;;  %v8013_v3 = vld [vmem:[#allocation111_spill] sm:$0xff] }
 0x385   : > { %v3338_v41 = vmul.f32 %v6998_v6, %v8008_v49  ;;  %v3346_v30 = vadd.f32 %v3345_v39, %v3336_v52  ;;  %v2974_v60 = vrot.slane %v2973_v16, 1  ;;  %v7157_v59 = vadd.f32 -5.0, %v3072_v31  ;;  %v8017_v52 = vld [vmem:[#allocation37_spill] sm:$0xff] }
 0x386   : > { %v3157_v44 = vadd.f32 %v3156_v38, %v3135_v32  ;;  %v3139_v48 = vmul.f32 %v3894_v43, %v7151_v35  ;;  %v3340_v1 = vmul.f32 %v7004_v21, %v8009_v47  ;;  %v3106_v58 = vadd.f32 %v3105_v62, %v3104_v26  ;;  %v8014_v32 = vld [vmem:[#allocation59_spill] sm:$0xff]  ;;  %v8019_v62 = vld [vmem:[#allocation113_spill] sm:$0xff] }
 0x387   : > { %v3347_v42 = vadd.f32 %v3346_v30, %v3338_v41  ;;  %v2975_v10 = vadd.f32 %v2974_v60, %v2973_v16  ;;  %v7164_v53 = vadd.f32 %v8011_v56, %v8010_v0  ;;  %v3076_v13 = vsub.f32 5.0, %v7157_v59  ;;  %v8024_v56 = vld [vmem:[#allocation62_spill] sm:$0xff] }
 0x388   : > { %v3158_v27 = vadd.f32 %v3157_v44, %v3137_v18  ;;  %v3120_v43 = vmul.f32 10.0, %v3106_v58  ;;  %v8015_v31 = vrot.slane %v8014_v32, 7  ;;  %v8018_v39 = vrot.slane %v8017_v52, 7  ;;  %v8023_v58 = vld [vmem:[#allocation12_spill] sm:$0xff] }
 0x389   : > { %v3348_v36 = vadd.f32 %v3347_v42, %v3340_v1  ;;  %v2977_v6 = vmax.f32 %v2975_v10, 0.0  ;;  %v3235_v21 = vrot.slane %v7164_v53, 7  ;;  %vm3294_vm5 = vcmp.gt.f32.partialorder %v7136_v61, 20.0 }
 0x38a   : > { %v4139_v2 = vpop.eup %4138  ;;  %v3159_v5 = vadd.f32 %v3158_v27, %v3139_v48  ;;  %v7172_v26 = vsel %vm3028_vm13, %v3076_v13, %v3120_v43  ;;  %v8022_v48 = vld [vmem:[#allocation117_spill] sm:$0xff] }
 0x38b   : > { %v3302_v51 = vadd.f32 1.0, %v4139_v2  ;;  %v3349_v34 = vrot.slane %v3348_v36, 4  ;;  %v7167_v40 = vmin.f32 %v2977_v6, 63.0  ;;  %v3305_v33 = vmul.f32 -0.5, %v4139_v2 }
 0x38c   : > { %v3160_v9 = vrot.slane %v3159_v5, 4  ;;  %v3308_v45 = vand.u32 2147483647, %v4139_v2  ;;  %v7182_v11 = vsel %vm2108_vm1, %v8015_v31, %v3235_v21  ;;  %v7188_v16 = vsel %vm2108_vm1, %v3235_v21, %v8018_v39  ;;  %v8029_v31 = vld [vmem:[#allocation99_spill] sm:$0xff] }
 0x38d   : > { %4140 = vlog2.f32 %v3302_v51  ;;  %v3350_v55 = vadd.f32 %v3349_v34, %v3348_v36  ;;  %vm2981_vm7 = vcmp.eq.f32.partialorder %v8012_v23, %v7167_v40  ;;  %vm2983_vm14 = vcmp.eq.f32.partialorder %v8013_v3, %v7167_v40  ;;  %v8028_v23 = vld [vmem:[#allocation102_spill] sm:$0xff] }
 0x38e   : > { %4142 = vrcp.f32 %v7172_v26  ;;  %v3306_v18 = vadd.f32 1.0, %v3305_v33  ;;  %vm2985_vm3 = vcmp.eq.f32.partialorder %v8019_v62, %v7167_v40  ;;  %v7195_v49 = vsel %vm2981_vm7, 1.0, %v7776_v4  ;;  %v8027_v33 = vld [vmem:[#allocation78_spill] sm:$0xff] }
 0x38f   : > { %v3351_v25 = vrot.slane %v3350_v55, 2  ;;  %v7198_v41 = vsel %vm2983_vm14, 1.0, %v7776_v4  ;;  %vm7200_vm12 = vcmp.lt.f32.partialorder %v3308_v45, 0.0004427343  ;;  %vm2987_vm1 = vcmp.eq.f32.partialorder %v8022_v48, %v7167_v40 }
 0x390   : > { %v7206_v47 = vadd.f32 %v3160_v9, %v3159_v5  ;;  %v3409_v42 = vand.u32 2147483647, %v7172_v26  ;;  %vm2989_vm9 = vcmp.eq.f32.partialorder %v7957_v57, %v7167_v40  ;;  %vm2991_vm15 = vcmp.eq.f32.partialorder %v7964_v12, %v7167_v40 }
 0x391   : > { %v3352_v38 = vadd.f32 %v3351_v25, %v3350_v55  ;;  %v7216_v27 = vsel %vm2985_vm3, 1.0, %v7776_v4  ;;  %v3031_v0 = vmul.f32 %v7195_v49, %v8023_v58  ;;  %v3033_v36 = vmul.f32 %v7198_v41, %v8024_v56 }
 0x392   : > { %v3307_v6 = vmul.f32 %v4139_v2, %v3306_v18  ;;  %v3411_v13 = vand.u32 2147483648, %v7172_v26  ;;  %vm2993_vm4 = vcmp.eq.f32.partialorder %v7967_v17, %v7167_v40  ;;  %vm2995_vm6 = vcmp.eq.f32.partialorder %v7970_v22, %v7167_v40  ;;  %v8031_v17 = vld [vmem:[#allocation98_spill] sm:$0xff]  ;;  %v8032_v22 = vld [vmem:[#allocation11_spill] sm:$0xff] }
 0x393   : > { %v4141_v30 = vpop.eup %4140  ;;  %v3353_v44 = vrot.slane %v3352_v38, 1  ;;  %vm3405_vm10 = vweird.f32 %v7172_v26  ;;  %v7233_v51 = vsel %vm2987_vm1, 1.0, %v7776_v4  ;;  %v7236_v2 = vsel %vm2989_vm9, 1.0, %v7776_v4 }
 0x394   : > { %v3304_v1 = vmul.f32 0.6931472, %v4141_v30  ;;  %v4143_v57 = vpop.eup %4142  ;;  %vm7241_vm2 = vcmp.eq.f32.partialorder %v3409_v42, 8.507059e+37  ;;  %v7249_v55 = vsel %vm2991_vm15, 1.0, %v7776_v4  ;;  %v3035_v9 = vmul.f32 %v7216_v27, %v8027_v33  ;;  %v8030_v30 = vld [vmem:[#allocation61_spill] sm:$0xff]  ;;  %v8035_v33 = vld [vmem:[#allocation4_spill] sm:$0xff] }
 0x395   : > { %v7213_v10 = vadd.f32 %v3353_v44, %v3352_v38  ;;  %v3401_v43 = vmul.f32 %v4143_v57, %v7172_v26  ;;  %v3059_v25 = vadd.f32 %v3033_v36, %v3031_v0  ;;  %v3079_v3 = vmul.f32 %v7195_v49, %v8028_v23  ;;  %v8033_v36 = vld [vmem:[#allocation82_spill] sm:$0xff] }
 0x396   : > { %v3310_v34 = vsel %vm7200_vm12, %v3307_v6, %v3304_v1  ;;  %v3081_v24 = vmul.f32 %v7198_v41, %v8029_v31  ;;  %v3412_v38 = vor.u32 1.1754944e-38, %v3411_v13  ;;  %v7261_v12 = vsel %vm2993_vm4, 1.0, %v7776_v4  ;;  %v8034_v13 = vld [vmem:[#allocation96_spill] sm:$0xff] }
 0x397   : > { %v3370_v5 = vmin.f32 %v7213_v10, 20.0  ;;  %v3402_v39 = vsub.f32 1.0, %v3401_v43  ;;  %v7267_v18 = vsel %vm2995_vm6, 1.0, %v7776_v4  ;;  %v3320_v62 = vsel %vm3294_vm5, %v7136_v61, %v3310_v34 }
 0x398   : > { %v3037_v60 = vmul.f32 %v7233_v51, %v8030_v30  ;;  %v3060_v44 = vadd.f32 %v3059_v25, %v3035_v9  ;;  %vm3406_vm7 = vweird.f32 %v4143_v57  ;;  %v3083_v1 = vmul.f32 %v7216_v27, %v8031_v17  ;;  %v8036_v25 = vld [vmem:[#allocation94_spill] sm:$0xff] }
 0x399   : > { %v3372_v45 = vmul.f32 1.442695, %v3370_v5  ;;  %v3403_v48 = vmul.f32 %v4143_v57, %v3402_v39  ;;  %v3107_v42 = vadd.f32 %v3081_v24, %v3079_v3  ;;  %vm3218_vm14 = vcmp.eq.f32.partialorder %v6902_v14, 0.0  ;;  %vm3407_vm5 = vmor %vm3405_vm10, %vm3406_vm7  ;;  %v8037_v3 = vld [vmem:[#allocation93_spill] sm:$0xff] }
 0x39a   : > { %v3039_v4 = vmul.f32 %v7236_v2, %v8032_v22  ;;  %v3061_v58 = vadd.f32 %v3060_v44, %v3037_v60  ;;  %v3173_v61 = vmul.f32 %v7195_v49, %v6879_v19  ;;  %v3175_v0 = vmul.f32 %v7198_v41, %v6898_v50 }
 0x39b   : > { %4144 = vpow2.f32 %v3372_v45  ;;  %v3404_v56 = vadd.f32 %v4143_v57, %v3403_v48  ;;  %v3041_v6 = vmul.f32 %v7249_v55, %v8033_v36  ;;  %v3085_v5 = vmul.f32 %v7233_v51, %v8034_v13  ;;  %v8038_v48 = vld [vmem:[#allocation91_spill] sm:$0xff] }
 0x39c   : > { %v3108_v34 = vadd.f32 %v3107_v42, %v3083_v1  ;;  %v3322_v43 = vadd.f32 0.001, %v3320_v62  ;;  %v3043_v9 = vmul.f32 %v7261_v12, %v8035_v33  ;;  %v3045_v19 = vmul.f32 %v7267_v18, %v7070_v29 }
 0x39d   : > { %v3062_v45 = vadd.f32 %v3061_v58, %v3039_v4  ;;  %v3408_v50 = vsel %vm3407_vm5, %v4143_v57, %v3404_v56  ;;  %v3087_v23 = vmul.f32 %v7236_v2, %v8036_v25  ;;  %v3089_v31 = vmul.f32 %v7249_v55, %v8037_v3 }
 0x39e   : > { %v3109_v24 = vadd.f32 %v3108_v34, %v3085_v5  ;;  %v7299_v26 = vsel %vm7241_vm2, %v3412_v38, %v3408_v50  ;;  %v3177_v30 = vmul.f32 %v7216_v27, %v8002_v20  ;;  %v3201_v60 = vadd.f32 %v3175_v0, %v3173_v61 }
 0x39f   : > { %v3063_v62 = vadd.f32 %v3062_v45, %v3041_v6  ;;  %v7305_v57 = vmul.f32 %v7299_v26, %v7130_v63  ;;  %v3091_v17 = vmul.f32 %v7261_v12, %v8038_v48  ;;  %v3179_v21 = vmul.f32 %v7233_v51, %v7084_v15 }
 0x3a0   : > { %v3110_v42 = vadd.f32 %v3109_v24, %v3087_v23  ;;  %v3202_v38 = vadd.f32 %v3201_v60, %v3177_v30  ;;  %v3181_v20 = vmul.f32 %v7236_v2, %v7103_v8  ;;  %v3253_v4 = vmul.f32 %v7195_v49, %v7188_v16  ;;  %v8039_v8 = vld [vmem:[#allocation42_spill] sm:$0xff]  ;;  %v8044_v30 = vld [vmem:[#allocation39_spill] sm:$0xff] }
 0x3a1   : > { %v4145_v39 = vpop.eup %4144  ;;  %v3064_v1 = vadd.f32 %v3063_v62, %v3043_v9  ;;  %vm3368_vm3 = vcmp.gt.f32.partialorder %v7213_v10, 20.0  ;;  %v7318_v36 = vsel %vm3218_vm14, 1.0, %v3322_v43  ;;  %v3093_v15 = vmul.f32 %v7267_v18, %v7998_v37  ;;  %v8042_v37 = vld [vmem:[#allocation46_spill] sm:$0xff] }
 0x3a2   : > { %v3376_v29 = vadd.f32 1.0, %v4145_v39  ;;  %v3379_v44 = vmul.f32 -0.5, %v4145_v39  ;;  %v3382_v22 = vand.u32 2147483647, %v4145_v39  ;;  %v3111_v0 = vadd.f32 %v3110_v42, %v3089_v31  ;;  %v8043_v31 = vld [vmem:[#allocation50_spill] sm:$0xff] }
 0x3a3   : > { %v3065_v61 = vadd.f32 %v3064_v1, %v3045_v19  ;;  %v3203_v56 = vadd.f32 %v3202_v38, %v3179_v21  ;;  %v3183_v6 = vmul.f32 %v7249_v55, %v7108_v7  ;;  %v3255_v13 = vmul.f32 %v7198_v41, %v8039_v8  ;;  %v8046_v42 = vld [vmem:[#allocation58_spill] sm:$0xff]  ;;  %v8048_v8 = vld [vmem:[#allocation60_spill] sm:$0xff] }
 0x3a4   : > { %4146 = vlog2.f32 %v3376_v29  ;;  %v3380_v58 = vadd.f32 1.0, %v3379_v44  ;;  %v3112_v5 = vadd.f32 %v3111_v0, %v3091_v17  ;;  %v3185_v34 = vmul.f32 %v7261_v12, %v7143_v54  ;;  %v8045_v17 = vld [vmem:[#allocation54_spill] sm:$0xff] }
 0x3a5   : > { %v3066_v16 = vrot.slane %v3065_v61, 4  ;;  %v3204_v33 = vadd.f32 %v3203_v56, %v3181_v20  ;;  %vm7328_vm12 = vcmp.lt.f32.partialorder %v3382_v22, 0.0004427343  ;;  %v3187_v43 = vmul.f32 %v7267_v18, %v7151_v35 }
 0x3a6   : > { %v3257_v19 = vmul.f32 %v7216_v27, %v8042_v37  ;;  %v3281_v7 = vadd.f32 %v3255_v13, %v3253_v4  ;;  %v3381_v45 = vmul.f32 %v4145_v39, %v3380_v58  ;;  %v3113_v25 = vadd.f32 %v3112_v5, %v3093_v15  ;;  %v8050_v37 = vld [vmem:[#allocation52_spill] sm:$0xff] }
 0x3a7   : > { %v3067_v50 = vadd.f32 %v3066_v16, %v3065_v61  ;;  %v3205_v23 = vadd.f32 %v3204_v33, %v3183_v6  ;;  %v3259_v54 = vmul.f32 %v7233_v51, %v8043_v31  ;;  %v3327_v62 = vmul.f32 %v7195_v49, %v8017_v52  ;;  %v8051_v31 = vld [vmem:[#allocation56_spill] sm:$0xff] }
 0x3a8   : > { %v3282_v24 = vadd.f32 %v3281_v7, %v3257_v19  ;;  %v3329_v60 = vmul.f32 %v7198_v41, %v8044_v30  ;;  %v3114_v44 = vrot.slane %v3113_v25, 4  ;;  %v7343_v39 = vmul.f32 2.0, %v7305_v57  ;;  %v8047_v41 = vld [vmem:[#allocation44_spill] sm:$0xff] }
 0x3a9   : > { %v3068_v29 = vrot.slane %v3067_v50, 2  ;;  %v3206_v48 = vadd.f32 %v3205_v23, %v3185_v34  ;;  %v3261_v1 = vmul.f32 %v7236_v2, %v8045_v17  ;;  %v3263_v21 = vmul.f32 %v7249_v55, %v8046_v42  ;;  %v8049_v34 = vld [vmem:[#allocation48_spill] sm:$0xff] }
 0x3aa   : > { %v4147_v3 = vpop.eup %4146  ;;  %v3283_v38 = vadd.f32 %v3282_v24, %v3259_v54  ;;  %v3115_v22 = vadd.f32 %v3114_v44, %v3113_v25  ;;  %v3331_v20 = vmul.f32 %v7216_v27, %v8047_v41  ;;  %v3355_v0 = vadd.f32 %v3329_v60, %v3327_v62 }
 0x3ab   : > { %v3378_v35 = vmul.f32 0.6931472, %v4147_v3  ;;  %v3069_v49 = vadd.f32 %v3068_v29, %v3067_v50  ;;  %v3207_v58 = vadd.f32 %v3206_v48, %v3187_v43  ;;  %v3265_v13 = vmul.f32 %v7261_v12, %v8048_v8 }
 0x3ac   : > { %v3284_v61 = vadd.f32 %v3283_v38, %v3261_v1  ;;  %v3116_v6 = vrot.slane %v3115_v22, 2  ;;  %v3267_v16 = vmul.f32 %v7267_v18, %v7182_v11  ;;  %v3333_v27 = vmul.f32 %v7233_v51, %v8049_v34 }
 0x3ad   : > { %v3384_v52 = vsel %vm7328_vm12, %v3381_v45, %v3378_v35  ;;  %v3070_v15 = vrot.slane %v3069_v49, 1  ;;  %v3356_v33 = vadd.f32 %v3355_v0, %v3331_v20  ;;  %v3335_v19 = vmul.f32 %v7236_v2, %v8050_v37 }
 0x3ae   : > { %v3394_v4 = vsel %vm3368_vm3, %v7213_v10, %v3384_v52  ;;  %v3285_v5 = vadd.f32 %v3284_v61, %v3263_v21  ;;  %v3117_v43 = vadd.f32 %v3116_v6, %v3115_v22  ;;  %v3208_v45 = vrot.slane %v3207_v58, 4 }
 0x3af   : > { %v3396_v56 = vadd.f32 0.001, %v3394_v4  ;;  %v3071_v9 = vadd.f32 %v3070_v15, %v3069_v49  ;;  %v3357_v50 = vadd.f32 %v3356_v33, %v3333_v27  ;;  %v3162_v51 = vrot.slane %v7206_v47, 2 }
 0x3b0   : > { %v3286_v11 = vadd.f32 %v3285_v5, %v3265_v13  ;;  %v3118_v23 = vrot.slane %v3117_v43, 1  ;;  %v3337_v54 = vmul.f32 %v7249_v55, %v8051_v31  ;;  %v3209_v30 = vadd.f32 %v3208_v45, %v3207_v58 }
 0x3b1   : > { %v7364_v10 = vsel %vm3028_vm13, 1.0, %v3396_v56  ;;  %v3073_v25 = vmul.f32 10.0, %v3071_v9  ;;  %v3358_v24 = vadd.f32 %v3357_v50, %v3335_v19  ;;  %v3339_v35 = vmul.f32 %v7261_v12, %v8014_v32 }
 0x3b2   : > { %v7370_v7 = vadd.f32 %v7364_v10, %v7318_v36  ;;  %v3287_v3 = vadd.f32 %v3286_v11, %v3267_v16  ;;  %v3119_v62 = vadd.f32 %v3118_v23, %v3117_v43  ;;  %v3163_v17 = vadd.f32 %v3162_v51, %v7206_v47 }
 0x3b3   : > { %v3075_v2 = vadd.f32 -5.0, %v3073_v25  ;;  %v3359_v29 = vadd.f32 %v3358_v24, %v3337_v54  ;;  %vm3029_vm13 = vcmp.eq.f32.partialorder %v7167_v40, 63.0  ;;  %v3341_v55 = vmul.f32 %v7267_v18, %v7164_v53 }
 0x3b4   : > { %v3471_v14 = vsub.f32 %v7370_v7, %v7343_v39  ;;  %v3288_v60 = vrot.slane %v3287_v3, 4  ;;  %v3121_v48 = vmul.f32 10.0, %v3119_v62  ;;  %v3210_v32 = vrot.slane %v3209_v30, 2 }
 0x3b5   : > { %v3077_v44 = vsub.f32 5.0, %v3075_v2  ;;  %v3434_v1 = vrot.slane %v3075_v2, 4  ;;  %v3360_v21 = vadd.f32 %v3359_v29, %v3339_v35  ;;  %v3164_v22 = vrot.slane %v3163_v17, 1  ;;  %v8052_v35 = vld [vmem:[#allocation109_spill] sm:$0xff] }
 0x3b6   : > { %v3289_v42 = vadd.f32 %v3288_v60, %v3287_v3  ;;  %v3211_v20 = vadd.f32 %v3210_v32, %v3209_v30  ;;  %vm3219_vm2 = vcmp.eq.f32.partialorder %v7167_v40, 0.0 }
 0x3b7   : > { %v3123_v38 = vsel %vm3029_vm13, %v3077_v44, %v3121_v48  ;;  %v3435_v52 = vsel %vm2308_vm8, %v7157_v59, %v3434_v1  ;;  %v3361_v49 = vadd.f32 %v3360_v21, %v3341_v55  ;;  %v3165_v0 = vadd.f32 %v3164_v22, %v3163_v17 }
 0x3b8   : > { %v3290_v12 = vrot.slane %v3289_v42, 2  ;;  %4148 = vrcp.f32 %v3123_v38  ;;  %v3212_v15 = vrot.slane %v3211_v20, 1  ;;  %v3426_v34 = vand.u32 2147483648, %v3123_v38 }
 0x3b9   : > { %v3362_v41 = vrot.slane %v3361_v49, 4  ;;  %v3167_v13 = vmul.f32 10.0, %v3165_v0  ;;  %v3424_v33 = vand.u32 2147483647, %v3123_v38  ;;  %vm3420_vm9 = vweird.f32 %v3123_v38 }
 0x3ba   : > { %v3291_v47 = vadd.f32 %v3290_v12, %v3289_v42  ;;  %v3213_v9 = vadd.f32 %v3212_v15, %v3211_v20  ;;  %v3427_v11 = vor.u32 1.1754944e-38, %v3426_v34  ;;  %v3436_v3 = vrot.slane %v3435_v52, 5 }
 0x3bb   : > { %v3363_v58 = vadd.f32 %v3362_v41, %v3361_v49  ;;  %v7392_v19 = vadd.f32 -5.0, %v3167_v13  ;;  %vm3425_vm4 = vcmp.eq.f32.partialorder %v3424_v33, 8.507059e+37 }
 0x3bc   : > { %v3292_v4 = vrot.slane %v3291_v47, 1  ;;  %v3215_v25 = vmul.f32 10.0, %v3213_v9  ;;  %v3438_v29 = vsub.f32 %v8052_v35, %v3436_v3 }
 0x3bd   : > { %v3364_v18 = vrot.slane %v3363_v58, 2  ;;  %v3171_v24 = vsub.f32 5.0, %v7392_v19 }
 0x3be   : > { %v4149_v61 = vpop.eup %4148  ;;  %v7387_v53 = vadd.f32 %v3292_v4, %v3291_v47 }
 0x3bf   : > { %v3416_v56 = vmul.f32 %v4149_v61, %v3123_v38  ;;  %v3365_v59 = vadd.f32 %v3364_v18, %v3363_v58  ;;  %vm3421_vm1 = vweird.f32 %v4149_v61  ;;  %v7400_v60 = vsel %vm3029_vm13, %v3171_v24, %v3215_v25 }
 0x3c0   : > { %v3297_v6 = vmin.f32 %v7387_v53, 20.0  ;;  %vm3422_vm15 = vmor %vm3420_vm9, %vm3421_vm1  ;;  %vm3295_vm6 = vcmp.gt.f32.partialorder %v7387_v53, 20.0 }
 0x3c1   : > { %v3417_v8 = vsub.f32 1.0, %v3416_v56  ;;  %v3366_v5 = vrot.slane %v3365_v59, 1 }
 0x3c2   : > { %v3300_v16 = vmul.f32 1.442695, %v3297_v6 }
 0x3c3   : > { %v3418_v27 = vmul.f32 %v4149_v61, %v3417_v8  ;;  %v7390_v43 = vadd.f32 %v3366_v5, %v3365_v59 }
 0x3c4   : > { %4150 = vpow2.f32 %v3300_v16 }
 0x3c5   : > { %v3419_v37 = vadd.f32 %v4149_v61, %v3418_v27  ;;  %v3371_v45 = vmin.f32 %v7390_v43, 20.0  ;;  %vm3369_vm7 = vcmp.gt.f32.partialorder %v7390_v43, 20.0 }
 0x3c7   : > { %v3423_v50 = vsel %vm3422_vm15, %v4149_v61, %v3419_v37  ;;  %v3374_v23 = vmul.f32 1.442695, %v3371_v45 }
 0x3c8   : > { %v3428_v51 = vsel %vm3425_vm4, %v3427_v11, %v3423_v50 }
 0x3c9   : > { %v3441_v31 = vrot.slane %v3428_v51, 4  ;;  %4152 = vpow2.f32 %v3374_v23  ;;  %v7404_v48 = vmul.f32 %v3428_v51, %v7400_v60 }
 0x3ca   : > { %v4151_v54 = vpop.eup %4150 }
 0x3cb   : > { %v3311_v2 = vadd.f32 1.0, %v4151_v54  ;;  %v3314_v62 = vmul.f32 -0.5, %v4151_v54  ;;  %v3442_v30 = vsel %vm2308_vm8, %v7299_v26, %v3441_v31  ;;  %v3317_v42 = vand.u32 2147483647, %v4151_v54 }
 0x3cc   : > { %v3443_v44 = vrot.slane %v3442_v30, 5  ;;  %v7408_v32 = vmul.f32 2.0, %v7404_v48 }
 0x3cd   : > { %4154 = vlog2.f32 %v3311_v2  ;;  %v3315_v1 = vadd.f32 1.0, %v3314_v62  ;;  %vm7410_vm10 = vcmp.lt.f32.partialorder %v3317_v42, 0.0004427343 }
 0x3ce   : > { %v3445_v17 = vmul.f32 %v3443_v44, %v3438_v29 }
 0x3cf   : > { %v4153_v55 = vpop.eup %4152  ;;  %v3316_v20 = vmul.f32 %v4151_v54, %v3315_v1 }
 0x3d0   : > { %v3446_v21 = vmul.f32 %v3445_v17, %v3445_v17  ;;  %v3447_v38 = vsub.f32 1.0, %v3445_v17  ;;  %v3385_v26 = vadd.f32 1.0, %v4153_v55  ;;  %v3388_v52 = vmul.f32 -0.5, %v4153_v55 }
 0x3d1   : > { %v3391_v58 = vand.u32 2147483647, %v4153_v55 }
 0x3d2   : > { %v3448_v12 = vmul.f32 %v3447_v38, %v3445_v17  ;;  %v3450_v49 = vperm.slane %v3446_v21, 3  ;;  %v3451_v22 = vperm.slane %v3446_v21, 7  ;;  %v3518_v47 = vperm.slane %v3447_v38, 3 }
 0x3d3   : > { %v4155_v41 = vpop.eup %4154  ;;  %4156 = vlog2.f32 %v3385_v26  ;;  %v3389_v15 = vadd.f32 1.0, %v3388_v52  ;;  %vm3392_vm14 = vcmp.lt.f32.partialorder %v3391_v58, 0.0004427343 }
 0x3d4   : > { %v3313_v61 = vmul.f32 0.6931472, %v4155_v41  ;;  %v3454_v0 = vmul.f32 %v3450_v49, %v7305_v57  ;;  %v3455_v18 = vmul.f32 %v3451_v22, %v7404_v48  ;;  %v3457_v56 = vperm.slane %v3448_v12, 3 }
 0x3d5   : > { %v3458_v6 = vperm.slane %v3448_v12, 7  ;;  %v3511_v59 = vmul.f32 %v3450_v49, %v7364_v10  ;;  %v3522_v8 = vmul.f32 %v3518_v47, %v7318_v36  ;;  %v3519_v10 = vperm.slane %v3447_v38, 7 }
 0x3d6   : > { %v3319_v13 = vsel %vm7410_vm10, %v3316_v20, %v3313_v61  ;;  %v3461_v16 = vmul.f32 %v3457_v56, %v7318_v36  ;;  %v3473_v5 = vmul.f32 %v3471_v14, %v3457_v56  ;;  %v3513_v34 = vmul.f32 %v7343_v39, %v3457_v56 }
 0x3d7   : > { %v3321_v27 = vsel %vm3295_vm6, %v7387_v53, %v3319_v13  ;;  %v3514_v33 = vmul.f32 %v7408_v32, %v3458_v6  ;;  %v3524_v9 = vmul.f32 %v3522_v8, %v3518_v47  ;;  %v3390_v7 = vmul.f32 %v4153_v55, %v3389_v15 }
 0x3d8   : > { %v3323_v37 = vadd.f32 0.001, %v3321_v27  ;;  %v3463_v45 = vadd.f32 %v3461_v16, %v3454_v0  ;;  %v3475_v11 = vadd.f32 %v3473_v5, %v7305_v57  ;;  %v3515_v50 = vadd.f32 %v3513_v34, %v3511_v59 }
 0x3d9   : > { %v4157_v36 = vpop.eup %4156  ;;  %v3509_v53 = vmul.f32 %v7305_v57, %v7305_v57 }
 0x3da   : > { %v3325_v14 = vsel %vm3219_vm2, 1.0, %v3323_v37  ;;  %v3387_v25 = vmul.f32 0.6931472, %v4157_v36  ;;  %v3465_v39 = vmul.f32 %v3463_v45, %v7130_v63  ;;  %4158 = vrcp.f32 %v3475_v11 }
 0x3db   : > { %v3462_v23 = vmul.f32 %v3458_v6, %v3325_v14  ;;  %v3523_v3 = vmul.f32 %v3519_v10, %v3325_v14  ;;  %v3526_v31 = vadd.f32 %v3524_v9, %v3515_v50  ;;  %4160 = vlog2.f32 %v3475_v11 }
 0x3dc   : > { %v3393_v51 = vsel %vm3392_vm14, %v3390_v7, %v3387_v25  ;;  %v3486_v38 = vand.u32 2147483647, %v3475_v11  ;;  %v3488_v26 = vand.u32 2147483648, %v3475_v11  ;;  %vm3482_vm3 = vweird.f32 %v3475_v11 }
 0x3dd   : > { %v3395_v54 = vsel %vm3369_vm7, %v7390_v43, %v3393_v51  ;;  %v3464_v24 = vadd.f32 %v3462_v23, %v3455_v18  ;;  %v3525_v62 = vmul.f32 %v3523_v3, %v3519_v10  ;;  %v3528_v30 = vmul.f32 %v3526_v31, %v3509_v53 }
 0x3de   : > { %v3397_v2 = vadd.f32 0.001, %v3395_v54  ;;  %v3510_v43 = vmul.f32 %v7404_v48, %v7404_v48 }
 0x3df   : > { %4162 = vlog2.f32 %v3528_v30 }
 0x3e0   : > { %v4159_v29 = vpop.eup %4158  ;;  %v3399_v63 = vsel %vm3029_vm13, 1.0, %v3397_v2  ;;  %vm3487_vm13 = vcmp.eq.f32.partialorder %v3486_v38, 8.507059e+37 }
 0x3e1   : > { %v3468_v57 = vadd.f32 %v3399_v63, %v3325_v14  ;;  %v3478_v44 = vmul.f32 %v4159_v29, %v3475_v11  ;;  %v3512_v17 = vmul.f32 %v3451_v22, %v3399_v63  ;;  %v4161_v1 = vpop.eup %4160  ;;  %vm3483_vm5 = vweird.f32 %v4159_v29 }
 0x3e2   : > { %v3535_v52 = vmul.f32 0.6931472, %v4161_v1  ;;  %vm3484_vm12 = vmor %vm3482_vm3, %vm3483_vm5 }
 0x3e3   : > { %v3472_v42 = vsub.f32 %v3468_v57, %v7408_v32  ;;  %v3479_v55 = vsub.f32 1.0, %v3478_v44  ;;  %v3516_v21 = vadd.f32 %v3514_v33, %v3512_v17  ;;  %v3489_v32 = vor.u32 1.1754944e-38, %v3488_v26 }
 0x3e4   : > { %v3538_v58 = vmul.f32 2.0, %v3535_v52 }
 0x3e5   : > { %v3474_v12 = vmul.f32 %v3472_v42, %v3458_v6  ;;  %v3480_v49 = vmul.f32 %v4159_v29, %v3479_v55  ;;  %v3527_v40 = vadd.f32 %v3525_v62, %v3516_v21  ;;  %v4163_v47 = vpop.eup %4162 }
 0x3e6   : > { %v3531_v4 = vmul.f32 0.6931472, %v4163_v47 }
 0x3e7   : > { %v3476_v41 = vadd.f32 %v3474_v12, %v7404_v48  ;;  %v3481_v22 = vadd.f32 %v4159_v29, %v3480_v49  ;;  %v3529_v20 = vmul.f32 %v3527_v40, %v3510_v43 }
 0x3e8   : > { %v3540_v18 = vsub.f32 %v3531_v4, %v3538_v58 }
 0x3e9   : > { %v3485_v61 = vsel %vm3484_vm12, %v4159_v29, %v3481_v22  ;;  %4164 = vrcp.f32 %v3476_v41  ;;  %v3503_v34 = vand.u32 2147483648, %v3476_v41  ;;  %v3501_v33 = vand.u32 2147483647, %v3476_v41 }
 0x3ea   : > { %v3490_v0 = vsel %vm3487_vm13, %v3489_v32, %v3485_v61  ;;  %4166 = vlog2.f32 %v3529_v20  ;;  %vm3497_vm9 = vweird.f32 %v3476_v41 }
 0x3eb   : > { %v3491_v56 = vmul.f32 %v3490_v0, %v3465_v39  ;;  %4168 = vlog2.f32 %v3476_v41  ;;  %v3504_v45 = vor.u32 1.1754944e-38, %v3503_v34  ;;  %vm3502_vm4 = vcmp.eq.f32.partialorder %v3501_v33, 8.507059e+37 }
 0x3ed   : > { %v3507_v15 = vadd.f32 %v3491_v56, %v7099_v46  ;;  %v3466_v46 = vmul.f32 %v3464_v24, %v7400_v60 }
 0x3ef   : > { %v4165_v6 = vpop.eup %4164 }
 0x3f0   : > { %v4167_v59 = vpop.eup %4166  ;;  %v3493_v8 = vmul.f32 %v4165_v6, %v3476_v41  ;;  %vm3498_vm1 = vweird.f32 %v4165_v6 }
 0x3f1   : > { %v4169_v48 = vpop.eup %4168  ;;  %v3533_v16 = vmul.f32 0.6931472, %v4167_v59  ;;  %vm3499_vm15 = vmor %vm3497_vm9, %vm3498_vm1 }
 0x3f2   : > { %v3494_v13 = vsub.f32 1.0, %v3493_v8  ;;  %v3537_v5 = vmul.f32 0.6931472, %v4169_v48 }
 0x3f4   : > { %v3495_v27 = vmul.f32 %v4165_v6, %v3494_v13  ;;  %v3539_v10 = vmul.f32 2.0, %v3537_v5 }
 0x3f6   : > { %v3496_v9 = vadd.f32 %v4165_v6, %v3495_v27  ;;  %v3541_v37 = vsub.f32 %v3533_v16, %v3539_v10 }
 0x3f8   : > { %v3500_v11 = vsel %vm3499_vm15, %v4165_v6, %v3496_v9  ;;  %v3558_v50 = vrot.slane %v3541_v37, 4 }
 0x3f9   : > { %v3505_v36 = vsel %vm3502_vm4, %v3504_v45, %v3500_v11 }
 0x3fa   : > { %v3506_v7 = vmul.f32 %v3505_v36, %v3466_v46  ;;  %v3559_v14 = vsel %vm2308_vm8, %v3540_v18, %v3558_v50 }
 0x3fb   : > { %v3560_v60 = vrot.slane %v3559_v14, 5 }
 0x3fc   : > { %v3508_v25 = vadd.f32 %v3506_v7, %v7392_v19 }
 0x3fd   : > { %v3562_v54 = vsel %vm6773_vm0, %v3560_v60, 0.0 }
 0x3fe   : > { %v3544_v39 = vrot.slane %v3508_v25, 4 }
 0x400   : > { %v3545_v53 = vsel %vm2308_vm8, %v3507_v15, %v3544_v39 }
 0x401   : > { %v3546_v23 = vrot.slane %v3545_v53, 5 }
 0x403   : > { %v3548_v3 = vsel %vm6773_vm0, %v3546_v23, %v8052_v35 }
 0x404   : > { %3550 = vst [vmem:[#allocation1] sm:$0xff] %v3548_v3 }
 0x40b   : > { %v3552_v31 = vld [vmem:[#allocation1 + $0x3] ss:$4 sm:$0xff] }
 0x40c   : > { %3911 = vst.msk [vmem:[%s5825_s30 + $0x3] ss:$4 sm:$0x3] %vm6794_vm11, %v3552_v31 }
 0x40d   : > { %3564 = vst [vmem:[#allocation1] sm:$0xff] %v3562_v54 }
 0x414   : > { %v3566_v24 = vld [vmem:[#allocation1 + $0x3] ss:$4 sm:$0xff] }
 0x415   : > { %3912 = vst.msk [vmem:[%s7113_s9 + $0x1] ss:$2 sm:$0x3] %vm6794_vm11, %v3566_v24 }
 0x416 PF: > { %s18_s26 = sadd.s32 1, %s4194_s26   ;;  %s8056_s24 = smov %s4190_s25 }
 0x417   : > { %p15_p5 = scmp.ge.s32.totalorder %s18_s26, 4   ;;  %s8057_s25 = smov %s8059_s27 }
 0x419   :  { %17 = sbr.rel (!%p15_p5) target bundleno = 2 (0x2), region = 93 }

</bundles_post_ra>
